<compile_context>
chip_gen: v5e
topology: v5e:2x2
jax: 0.10.0
libtpu: 0.0.40
codegen_flags: <defaults>
</compile_context>

<pallas_src>
import math
import functools

import jax
import jax.numpy as jnp
from jax.experimental import pallas as pl
from jax.experimental.pallas import tpu as pltpu

# ----------------------------- configuration -----------------------------
HID_DIM = 32
N_HEADS = 4
HEAD_DIM = HID_DIM // N_HEADS
PF_DIM = 64
N_LAYERS = 2
SRC_VOCAB = 20
TRG_VOCAB = 22
MAX_LEN = 16
SRC_PAD_IDX = 0
TRG_PAD_IDX = 0
VOCAB_PAD = 128          # lane-dense padded width for the final projection
ATTN_PAD = 128           # lane-dense padded width for attention probabilities

BATCH = 2
SRC_LEN = 8
TRG_LEN = 8

NEG_INF = -1e10          # matches masked_fill(..., -1e10) in the reference


# ----------------------------- in-kernel helpers -----------------------------
def _layernorm(x, g, b, eps=1e-5):
    """PyTorch nn.LayerNorm semantics (biased variance, eps inside rsqrt). f32 math."""
    mean = jnp.mean(x, axis=-1, keepdims=True)
    var = jnp.mean(jnp.square(x - mean), axis=-1, keepdims=True)
    return (x - mean) * jax.lax.rsqrt(var + eps) * g + b


def _bmm(a, b):
    """Head-batched matmul: (G, M, K) @ (G, K, N) -> (G, M, N), f32 accumulate."""
    return jax.lax.dot_general(a, b, (((2,), (1,)), ((0,), (0,))),
                               preferred_element_type=jnp.float32)


def _bmm_nt(a, b):
    """Head-batched matmul, rhs transposed: (G, M, K) @ (G, N, K)^T -> (G, M, N)."""
    return jax.lax.dot_general(a, b, (((2,), (2,)), ((0,), (0,))),
                               preferred_element_type=jnp.float32)


def _proj_heads(x_b16, w_h, b_h):
    """Project a (L, D) bf16 activation with head-stacked weights (G, D, Dh)."""
    G = w_h.shape[0]
    xb = jnp.broadcast_to(x_b16[None], (G,) + x_b16.shape)
    return _bmm(xb, w_h) + b_h                                   # (G, L, Dh) f32


def _attention(q, k, v, wo_h, bo, bias):
    """Multi-head attention, heads batched on the leading axis.

    q: (H, Lq, Dh) f32, k/v: (H, Lk, Dh) f32, wo_h: (H, Dh, D) bf16,
    bo: (1, D) f32, bias broadcastable to (H, Lq, Lk) additive mask.
    Returns (fc_o(attention), probs) with shapes ((Lq, D) f32, (H, Lq, Lk) f32).
    """
    H = q.shape[0]
    inv_scale = 1.0 / math.sqrt(q.shape[-1])
    e = _bmm_nt(q.astype(jnp.bfloat16), k.astype(jnp.bfloat16)) * inv_scale + bias
    e = e - jnp.max(e, axis=-1, keepdims=True)
    p = jnp.exp(e)
    p = p * pl.reciprocal(jnp.sum(p, axis=-1, keepdims=True), approx=True)
    ctx = _bmm(p.astype(jnp.bfloat16), v.astype(jnp.bfloat16))           # (H, Lq, Dh)
    out_h = _bmm(ctx.astype(jnp.bfloat16), wo_h)                         # (H, Lq, D)
    out = out_h[0]
    for h in range(1, H):
        out = out + out_h[h]
    return out + bo, p


# ----------------------------- fused encoder+decoder kernel -----------------------------
def _seq2seq_kernel(
        # per-batch inputs
        src_x_ref, trg_x_ref, src_bias_ref, trg_bias_ref,
        # encoder weights (stacked over layers, heads on leading axes)
        e_wqkv, e_bqkv, e_wo, e_bo, e_ln1g, e_ln1b,
        e_w1, e_b1, e_w2, e_b2, e_ln2g, e_ln2b,
        # decoder: masked self attention
        d_swqkv, d_sbqkv, d_swo, d_sbo, d_ln1g, d_ln1b,
        # decoder: cross attention
        d_cwq, d_cbq, d_cwkv, d_cbkv, d_cwo, d_cbo, d_ln2g, d_ln2b,
        # decoder: feed-forward
        d_w1, d_b1, d_w2, d_b2, d_ln3g, d_ln3b,
        # final projection (lane-padded)
        fcw, fcb,
        # outputs
        logits_ref, attn_ref,
        *, n_layers, n_heads):
    H = n_heads
    Ls = src_x_ref.shape[1]
    Lt = trg_x_ref.shape[1]

    src_bias = src_bias_ref[0]                       # (1, Ls) additive, masks keys
    trg_bias = trg_bias_ref[0]                       # (1, Lt) additive, masks keys

    # causal + target-pad additive mask, built in-kernel once
    row = jax.lax.broadcasted_iota(jnp.int32, (Lt, Lt), 0)
    col = jax.lax.broadcasted_iota(jnp.int32, (Lt, Lt), 1)
    causal = jnp.where(row >= col, 0.0, NEG_INF).astype(jnp.float32)
    self_bias = causal + trg_bias                    # (Lt, Lt)

    # ---------------- encoder ----------------
    x = src_x_ref[0]                                 # (Ls, D) f32
    for l in range(n_layers):
        qkv = _proj_heads(x.astype(jnp.bfloat16), e_wqkv[l], e_bqkv[l])   # (3H, Ls, Dh)
        att, _ = _attention(qkv[:H], qkv[H:2 * H], qkv[2 * H:],
                            e_wo[l], e_bo[l], src_bias)
        x = _layernorm(x + att, e_ln1g[l], e_ln1b[l])
        hid = jnp.maximum(
            jnp.dot(x.astype(jnp.bfloat16), e_w1[l],
                    preferred_element_type=jnp.float32) + e_b1[l], 0.0)
        ff = jnp.dot(hid.astype(jnp.bfloat16), e_w2[l],
                     preferred_element_type=jnp.float32) + e_b2[l]
        x = _layernorm(x + ff, e_ln2g[l], e_ln2b[l])

    enc_b16 = x.astype(jnp.bfloat16)                 # stays in VMEM; no HBM round trip

    # ---------------- decoder ----------------
    y = trg_x_ref[0]                                 # (Lt, D) f32
    p_last = None
    for l in range(n_layers):
        # masked self attention
        qkv = _proj_heads(y.astype(jnp.bfloat16), d_swqkv[l], d_sbqkv[l])  # (3H, Lt, Dh)
        att, _ = _attention(qkv[:H], qkv[H:2 * H], qkv[2 * H:],
                            d_swo[l], d_sbo[l], self_bias)
        y = _layernorm(y + att, d_ln1g[l], d_ln1b[l])

        # encoder-decoder cross attention
        q = _proj_heads(y.astype(jnp.bfloat16), d_cwq[l], d_cbq[l])        # (H, Lt, Dh)
        kv = _proj_heads(enc_b16, d_cwkv[l], d_cbkv[l])                    # (2H, Ls, Dh)
        att, p = _attention(q, kv[:H], kv[H:], d_cwo[l], d_cbo[l], src_bias)
        if l == n_layers - 1:
            p_last = p                                                     # (H, Lt, Ls) f32
        y = _layernorm(y + att, d_ln2g[l], d_ln2b[l])

        # position-wise feed-forward
        hid = jnp.maximum(
            jnp.dot(y.astype(jnp.bfloat16), d_w1[l],
                    preferred_element_type=jnp.float32) + d_b1[l], 0.0)
        ff = jnp.dot(hid.astype(jnp.bfloat16), d_w2[l],
                     preferred_element_type=jnp.float32) + d_b2[l]
        y = _layernorm(y + ff, d_ln3g[l], d_ln3b[l])

    # final projection, 128 output lanes for dense stores (sliced in wrapper)
    logits_ref[0] = jnp.dot(y.astype(jnp.bfloat16), fcw[...],
                            preferred_element_type=jnp.float32) + fcb[...]

    # last-layer cross-attention probabilities, lane-padded to 128 for dense stores
    pad = jnp.zeros((H, Lt, attn_ref.shape[-1] - Ls), jnp.float32)
    attn_ref[0] = jnp.concatenate([p_last, pad], axis=-1)


# ----------------------------- pallas_call wrapper -----------------------------
def _full_spec(shape):
    nd = len(shape)
    return pl.BlockSpec(shape, lambda b, _nd=nd: (0,) * _nd)


def seq2seq_pallas(src_x, trg_x, src_bias, trg_bias, packed):
    B, Ls, D = src_x.shape
    _, Lt, _ = trg_x.shape
    H = N_HEADS

    per_batch = [
        (src_x, pl.BlockSpec((1, Ls, D), lambda b: (b, 0, 0))),
        (trg_x, pl.BlockSpec((1, Lt, D), lambda b: (b, 0, 0))),
        (src_bias, pl.BlockSpec((1, 1, Ls), lambda b: (b, 0, 0))),
        (trg_bias, pl.BlockSpec((1, 1, Lt), lambda b: (b, 0, 0))),
    ]
    inputs = tuple(a for a, _ in per_batch) + packed
    in_specs = [s for _, s in per_batch] + [_full_spec(a.shape) for a in packed]

    out_shape = (
        jax.ShapeDtypeStruct((B, Lt, VOCAB_PAD), jnp.float32),
        jax.ShapeDtypeStruct((B, H, Lt, ATTN_PAD), jnp.float32),
    )
    out_specs = (
        pl.BlockSpec((1, Lt, VOCAB_PAD), lambda b: (b, 0, 0)),
        pl.BlockSpec((1, H, Lt, ATTN_PAD), lambda b: (b, 0, 0, 0)),
    )

    return pl.pallas_call(
        functools.partial(_seq2seq_kernel, n_layers=N_LAYERS, n_heads=H),
        grid=(B,),
        out_shape=out_shape,
        in_specs=in_specs,
        out_specs=out_specs,
        compiler_params=pltpu.CompilerParams(dimension_semantics=("parallel",)),
    )(*inputs)


# ----------------------------- one-time parameter packing (outside jit) -----------------------------
def _split_heads_w(w):   # (D, D) -> (H, D, Dh): column slice h*Dh:(h+1)*Dh per head
    return w.reshape(w.shape[0], N_HEADS, HEAD_DIM).transpose(1, 0, 2)


def _split_heads_b(b):   # (D,) -> (H, 1, Dh)
    return b.reshape(N_HEADS, 1, HEAD_DIM)


def _split_out_w(w):     # (D, D) -> (H, Dh, D): row slice per head (fc_o folded per head)
    return w.reshape(N_HEADS, HEAD_DIM, w.shape[1])


def prepare_params(params):
    """Stack per-layer weights along a leading layer axis, pre-split heads onto
    a leading axis, cast matmul operands to bf16, and lane-pad the final
    projection.  Runs ONCE at init, outside the jitted forward."""
    bf, f32 = jnp.bfloat16, jnp.float32
    ep, dp = params["encoder"], params["decoder"]
    eL, dL = ep["layers"], dp["layers"]

    def qkv_w(a):
        return jnp.concatenate([_split_heads_w(a["wq"]), _split_heads_w(a["wk"]),
                                _split_heads_w(a["wv"])], axis=0)

    def qkv_b(a):
        return jnp.concatenate([_split_heads_b(a["bq"]), _split_heads_b(a["bk"]),
                                _split_heads_b(a["bv"])], axis=0)

    def stack(fn, layers, dtype):
        return jnp.stack([fn(l) for l in layers], axis=0).astype(dtype)

    packed = (
        # encoder
        stack(lambda l: qkv_w(l["self_attn"]), eL, bf),
        stack(lambda l: qkv_b(l["self_attn"]), eL, f32),
        stack(lambda l: _split_out_w(l["self_attn"]["wo"]), eL, bf),
        stack(lambda l: l["self_attn"]["bo"][None, :], eL, f32),
        stack(lambda l: l["ln1_g"][None, :], eL, f32),
        stack(lambda l: l["ln1_b"][None, :], eL, f32),
        stack(lambda l: l["ff"]["w1"], eL, bf),
        stack(lambda l: l["ff"]["b1"][None, :], eL, f32),
        stack(lambda l: l["ff"]["w2"], eL, bf),
        stack(lambda l: l["ff"]["b2"][None, :], eL, f32),
        stack(lambda l: l["ln2_g"][None, :], eL, f32),
        stack(lambda l: l["ln2_b"][None, :], eL, f32),
        # decoder: masked self attention
        stack(lambda l: qkv_w(l["self_attn"]), dL, bf),
        stack(lambda l: qkv_b(l["self_attn"]), dL, f32),
        stack(lambda l: _split_out_w(l["self_attn"]["wo"]), dL, bf),
        stack(lambda l: l["self_attn"]["bo"][None, :], dL, f32),
        stack(lambda l: l["ln1_g"][None, :], dL, f32),
        stack(lambda l: l["ln1_b"][None, :], dL, f32),
        # decoder: cross attention
        stack(lambda l: _split_heads_w(l["enc_attn"]["wq"]), dL, bf),
        stack(lambda l: _split_heads_b(l["enc_attn"]["bq"]), dL, f32),
        stack(lambda l: jnp.concatenate([_split_heads_w(l["enc_attn"]["wk"]),
                                         _split_heads_w(l["enc_attn"]["wv"])], axis=0), dL, bf),
        stack(lambda l: jnp.concatenate([_split_heads_b(l["enc_attn"]["bk"]),
                                         _split_heads_b(l["enc_attn"]["bv"])], axis=0), dL, f32),
        stack(lambda l: _split_out_w(l["enc_attn"]["wo"]), dL, bf),
        stack(lambda l: l["enc_attn"]["bo"][None, :], dL, f32),
        stack(lambda l: l["ln2_g"][None, :], dL, f32),
        stack(lambda l: l["ln2_b"][None, :], dL, f32),
        # decoder: feed-forward
        stack(lambda l: l["ff"]["w1"], dL, bf),
        stack(lambda l: l["ff"]["b1"][None, :], dL, f32),
        stack(lambda l: l["ff"]["w2"], dL, bf),
        stack(lambda l: l["ff"]["b2"][None, :], dL, f32),
        stack(lambda l: l["ln3_g"][None, :], dL, f32),
        stack(lambda l: l["ln3_b"][None, :], dL, f32),
        # final projection, padded to 128 output lanes (extra columns are zero)
        jnp.zeros((HID_DIM, VOCAB_PAD), f32).at[:, :TRG_VOCAB].set(dp["fc_out_w"]).astype(bf),
        jnp.zeros((1, VOCAB_PAD), f32).at[0, :TRG_VOCAB].set(dp["fc_out_b"]),
    )
    return {
        "enc_tok_emb": ep["tok_emb"], "enc_pos_emb": ep["pos_emb"],
        "dec_tok_emb": dp["tok_emb"], "dec_pos_emb": dp["pos_emb"],
        "packed": packed,
    }


# ----------------------------- full forward pass -----------------------------
def seq2seq_transformer_forward(prepared, src, trg):
    B, Ls = src.shape
    _, Lt = trg.shape
    scale = math.sqrt(HID_DIM)

    # TODO(synk): token-embedding gather (data-dependent) stays in plain JAX glue.
    src_x = (prepared["enc_tok_emb"][src] * scale
             + prepared["enc_pos_emb"][:Ls][None, :, :]).astype(jnp.float32)
    trg_x = (prepared["dec_tok_emb"][trg] * scale
             + prepared["dec_pos_emb"][:Lt][None, :, :]).astype(jnp.float32)

    # compact additive key-masks (0 keep, -1e10 masked); full masks built in-kernel
    src_bias = jnp.where(src != SRC_PAD_IDX, 0.0, NEG_INF).astype(jnp.float32)[:, None, :]
    trg_bias = jnp.where(trg != TRG_PAD_IDX, 0.0, NEG_INF).astype(jnp.float32)[:, None, :]

    logits_pad, attn_pad = seq2seq_pallas(src_x, trg_x, src_bias, trg_bias,
                                          prepared["packed"])

    output = logits_pad[:, :, :TRG_VOCAB]            # (B, Lt, TRG_VOCAB)
    attention = attn_pad[:, :, :, :Ls]               # (B, H, Lt, Ls)
    return output, attention


# ----------------------------- parameter init -----------------------------
def _init_linear(key, in_dim, out_dim):
    k1, k2 = jax.random.split(key)
    bound = 1.0 / math.sqrt(in_dim)
    w = jax.random.uniform(k1, (in_dim, out_dim), jnp.float32, -bound, bound)
    b = jax.random.uniform(k2, (out_dim,), jnp.float32, -bound, bound)
    return w, b


def _init_mha(key, d):
    ks = jax.random.split(key, 4)
    p = {}
    for name, kk in zip(("q", "k", "v", "o"), ks):
        w, b = _init_linear(kk, d, d)
        p["w" + name], p["b" + name] = w, b
    return p


def _init_ffn(key, d, pf):
    k1, k2 = jax.random.split(key)
    w1, b1 = _init_linear(k1, d, pf)
    w2, b2 = _init_linear(k2, pf, d)
    return {"w1": w1, "b1": b1, "w2": w2, "b2": b2}


def init_params(key):
    ke, kd = jax.random.split(key)

    ks = jax.random.split(ke, 2 + N_LAYERS)
    enc = {
        "tok_emb": jax.random.normal(ks[0], (SRC_VOCAB, HID_DIM), jnp.float32),
        "pos_emb": jax.random.normal(ks[1], (MAX_LEN, HID_DIM), jnp.float32),
        "layers": [],
    }
    for i in range(N_LAYERS):
        k1, k2 = jax.random.split(ks[2 + i])
        enc["layers"].append({
            "self_attn": _init_mha(k1, HID_DIM),
            "ff": _init_ffn(k2, HID_DIM, PF_DIM),
            "ln1_g": jnp.ones((HID_DIM,), jnp.float32),
            "ln1_b": jnp.zeros((HID_DIM,), jnp.float32),
            "ln2_g": jnp.ones((HID_DIM,), jnp.float32),
            "ln2_b": jnp.zeros((HID_DIM,), jnp.float32),
        })

    ks = jax.random.split(kd, 3 + N_LAYERS)
    fc_out_w, fc_out_b = _init_linear(ks[2], HID_DIM, TRG_VOCAB)
    dec = {
        "tok_emb": jax.random.normal(ks[0], (TRG_VOCAB, HID_DIM), jnp.float32),
        "pos_emb": jax.random.normal(ks[1], (MAX_LEN, HID_DIM), jnp.float32),
        "fc_out_w": fc_out_w,
        "fc_out_b": fc_out_b,
        "layers": [],
    }
    for i in range(N_LAYERS):
        k1, k2, k3 = jax.random.split(ks[3 + i], 3)
        dec["layers"].append({
            "self_attn": _init_mha(k1, HID_DIM),
            "enc_attn": _init_mha(k2, HID_DIM),
            "ff": _init_ffn(k3, HID_DIM, PF_DIM),
            "ln1_g": jnp.ones((HID_DIM,), jnp.float32),
            "ln1_b": jnp.zeros((HID_DIM,), jnp.float32),
            "ln2_g": jnp.ones((HID_DIM,), jnp.float32),
            "ln2_b": jnp.zeros((HID_DIM,), jnp.float32),
            "ln3_g": jnp.ones((HID_DIM,), jnp.float32),
            "ln3_b": jnp.zeros((HID_DIM,), jnp.float32),
        })

    return {"encoder": enc, "decoder": dec}


# ----------------------------- main -----------------------------
if __name__ == "__main__":
    root = jax.random.PRNGKey(0)
    k_params, k_src, k_trg = jax.random.split(root, 3)

    params = init_params(k_params)
    prepared = prepare_params(params)    # stacking/padding hoisted out of the jitted path

    src = jax.random.randint(k_src, (BATCH, SRC_LEN), 0, SRC_VOCAB, dtype=jnp.int32)
    trg = jax.random.randint(k_trg, (BATCH, TRG_LEN), 0, TRG_VOCAB, dtype=jnp.int32)
    # force a couple of pad tokens so the masks actually do something
    src = src.at[0, -2:].set(SRC_PAD_IDX)
    trg = trg.at[1, -1].set(TRG_PAD_IDX)

    fwd = jax.jit(seq2seq_transformer_forward)
    output, attention = fwd(prepared, src, trg)
    jax.block_until_ready((output, attention))

    assert output.shape == (BATCH, TRG_LEN, TRG_VOCAB)
    assert attention.shape == (BATCH, N_HEADS, TRG_LEN, SRC_LEN)
    assert bool(jnp.all(jnp.isfinite(output)))
    assert bool(jnp.all(jnp.isfinite(attention)))
    print("KERNEL_OK")
</pallas_src>

<mosaic_0001>
module attributes {stable_mosaic.version = 11 : i64} {
  func.func @_seq2seq_kernel(%arg0: i32, %arg1: memref<1x8x32xf32, #tpu.memory_space<vmem>>, %arg2: memref<1x8x32xf32, #tpu.memory_space<vmem>>, %arg3: memref<1x1x8xf32, #tpu.memory_space<vmem>>, %arg4: memref<1x1x8xf32, #tpu.memory_space<vmem>>, %arg5: memref<2x12x32x8xbf16, #tpu.memory_space<vmem>>, %arg6: memref<2x12x1x8xf32, #tpu.memory_space<vmem>>, %arg7: memref<2x4x8x32xbf16, #tpu.memory_space<vmem>>, %arg8: memref<2x1x32xf32, #tpu.memory_space<vmem>>, %arg9: memref<2x1x32xf32, #tpu.memory_space<vmem>>, %arg10: memref<2x1x32xf32, #tpu.memory_space<vmem>>, %arg11: memref<2x32x64xbf16, #tpu.memory_space<vmem>>, %arg12: memref<2x1x64xf32, #tpu.memory_space<vmem>>, %arg13: memref<2x64x32xbf16, #tpu.memory_space<vmem>>, %arg14: memref<2x1x32xf32, #tpu.memory_space<vmem>>, %arg15: memref<2x1x32xf32, #tpu.memory_space<vmem>>, %arg16: memref<2x1x32xf32, #tpu.memory_space<vmem>>, %arg17: memref<2x12x32x8xbf16, #tpu.memory_space<vmem>>, %arg18: memref<2x12x1x8xf32, #tpu.memory_space<vmem>>, %arg19: memref<2x4x8x32xbf16, #tpu.memory_space<vmem>>, %arg20: memref<2x1x32xf32, #tpu.memory_space<vmem>>, %arg21: memref<2x1x32xf32, #tpu.memory_space<vmem>>, %arg22: memref<2x1x32xf32, #tpu.memory_space<vmem>>, %arg23: memref<2x4x32x8xbf16, #tpu.memory_space<vmem>>, %arg24: memref<2x4x1x8xf32, #tpu.memory_space<vmem>>, %arg25: memref<2x8x32x8xbf16, #tpu.memory_space<vmem>>, %arg26: memref<2x8x1x8xf32, #tpu.memory_space<vmem>>, %arg27: memref<2x4x8x32xbf16, #tpu.memory_space<vmem>>, %arg28: memref<2x1x32xf32, #tpu.memory_space<vmem>>, %arg29: memref<2x1x32xf32, #tpu.memory_space<vmem>>, %arg30: memref<2x1x32xf32, #tpu.memory_space<vmem>>, %arg31: memref<2x32x64xbf16, #tpu.memory_space<vmem>>, %arg32: memref<2x1x64xf32, #tpu.memory_space<vmem>>, %arg33: memref<2x64x32xbf16, #tpu.memory_space<vmem>>, %arg34: memref<2x1x32xf32, #tpu.memory_space<vmem>>, %arg35: memref<2x1x32xf32, #tpu.memory_space<vmem>>, %arg36: memref<2x1x32xf32, #tpu.memory_space<vmem>>, %arg37: memref<32x128xbf16, #tpu.memory_space<vmem>>, %arg38: memref<1x128xf32, #tpu.memory_space<vmem>>, %arg39: memref<1x8x128xf32, #tpu.memory_space<vmem>>, %arg40: memref<1x4x8x128xf32, #tpu.memory_space<vmem>>) attributes {dimension_semantics = [#tpu.dimension_semantics<parallel>], iteration_bounds = array<i64: 2>, scalar_prefetch = 0 : i64, scratch_operands = 0 : i64, tpu.core_type = #tpu.core_type<tc>, window_params = [{transform_indices = @transform_0, window_bounds = array<i64: 1, 8, 32>}, {transform_indices = @transform_1, window_bounds = array<i64: 1, 8, 32>}, {transform_indices = @transform_2, window_bounds = array<i64: 1, 1, 8>}, {transform_indices = @transform_3, window_bounds = array<i64: 1, 1, 8>}, {pipeline_mode = #tpu.pipeline_mode<synchronous>, transform_indices = @transform_4, window_bounds = array<i64: 2, 12, 32, 8>}, {pipeline_mode = #tpu.pipeline_mode<synchronous>, transform_indices = @transform_5, window_bounds = array<i64: 2, 12, 1, 8>}, {pipeline_mode = #tpu.pipeline_mode<synchronous>, transform_indices = @transform_6, window_bounds = array<i64: 2, 4, 8, 32>}, {pipeline_mode = #tpu.pipeline_mode<synchronous>, transform_indices = @transform_7, window_bounds = array<i64: 2, 1, 32>}, {pipeline_mode = #tpu.pipeline_mode<synchronous>, transform_indices = @transform_8, window_bounds = array<i64: 2, 1, 32>}, {pipeline_mode = #tpu.pipeline_mode<synchronous>, transform_indices = @transform_9, window_bounds = array<i64: 2, 1, 32>}, {pipeline_mode = #tpu.pipeline_mode<synchronous>, transform_indices = @transform_10, window_bounds = array<i64: 2, 32, 64>}, {pipeline_mode = #tpu.pipeline_mode<synchronous>, transform_indices = @transform_11, window_bounds = array<i64: 2, 1, 64>}, {pipeline_mode = #tpu.pipeline_mode<synchronous>, transform_indices = @transform_12, window_bounds = array<i64: 2, 64, 32>}, {pipeline_mode = #tpu.pipeline_mode<synchronous>, transform_indices = @transform_13, window_bounds = array<i64: 2, 1, 32>}, {pipeline_mode = #tpu.pipeline_mode<synchronous>, transform_indices = @transform_14, window_bounds = array<i64: 2, 1, 32>}, {pipeline_mode = #tpu.pipeline_mode<synchronous>, transform_indices = @transform_15, window_bounds = array<i64: 2, 1, 32>}, {pipeline_mode = #tpu.pipeline_mode<synchronous>, transform_indices = @transform_16, window_bounds = array<i64: 2, 12, 32, 8>}, {pipeline_mode = #tpu.pipeline_mode<synchronous>, transform_indices = @transform_17, window_bounds = array<i64: 2, 12, 1, 8>}, {pipeline_mode = #tpu.pipeline_mode<synchronous>, transform_indices = @transform_18, window_bounds = array<i64: 2, 4, 8, 32>}, {pipeline_mode = #tpu.pipeline_mode<synchronous>, transform_indices = @transform_19, window_bounds = array<i64: 2, 1, 32>}, {pipeline_mode = #tpu.pipeline_mode<synchronous>, transform_indices = @transform_20, window_bounds = array<i64: 2, 1, 32>}, {pipeline_mode = #tpu.pipeline_mode<synchronous>, transform_indices = @transform_21, window_bounds = array<i64: 2, 1, 32>}, {pipeline_mode = #tpu.pipeline_mode<synchronous>, transform_indices = @transform_22, window_bounds = array<i64: 2, 4, 32, 8>}, {pipeline_mode = #tpu.pipeline_mode<synchronous>, transform_indices = @transform_23, window_bounds = array<i64: 2, 4, 1, 8>}, {pipeline_mode = #tpu.pipeline_mode<synchronous>, transform_indices = @transform_24, window_bounds = array<i64: 2, 8, 32, 8>}, {pipeline_mode = #tpu.pipeline_mode<synchronous>, transform_indices = @transform_25, window_bounds = array<i64: 2, 8, 1, 8>}, {pipeline_mode = #tpu.pipeline_mode<synchronous>, transform_indices = @transform_26, window_bounds = array<i64: 2, 4, 8, 32>}, {pipeline_mode = #tpu.pipeline_mode<synchronous>, transform_indices = @transform_27, window_bounds = array<i64: 2, 1, 32>}, {pipeline_mode = #tpu.pipeline_mode<synchronous>, transform_indices = @transform_28, window_bounds = array<i64: 2, 1, 32>}, {pipeline_mode = #tpu.pipeline_mode<synchronous>, transform_indices = @transform_29, window_bounds = array<i64: 2, 1, 32>}, {pipeline_mode = #tpu.pipeline_mode<synchronous>, transform_indices = @transform_30, window_bounds = array<i64: 2, 32, 64>}, {pipeline_mode = #tpu.pipeline_mode<synchronous>, transform_indices = @transform_31, window_bounds = array<i64: 2, 1, 64>}, {pipeline_mode = #tpu.pipeline_mode<synchronous>, transform_indices = @transform_32, window_bounds = array<i64: 2, 64, 32>}, {pipeline_mode = #tpu.pipeline_mode<synchronous>, transform_indices = @transform_33, window_bounds = array<i64: 2, 1, 32>}, {pipeline_mode = #tpu.pipeline_mode<synchronous>, transform_indices = @transform_34, window_bounds = array<i64: 2, 1, 32>}, {pipeline_mode = #tpu.pipeline_mode<synchronous>, transform_indices = @transform_35, window_bounds = array<i64: 2, 1, 32>}, {pipeline_mode = #tpu.pipeline_mode<synchronous>, transform_indices = @transform_36, window_bounds = array<i64: 32, 128>}, {pipeline_mode = #tpu.pipeline_mode<synchronous>, transform_indices = @transform_37, window_bounds = array<i64: 1, 128>}, {transform_indices = @transform_38, window_bounds = array<i64: 1, 8, 128>}, {transform_indices = @transform_39, window_bounds = array<i64: 1, 4, 8, 128>}]} {
    %c0 = arith.constant 0 : index
    %c0_0 = arith.constant 0 : index
    %c0_1 = arith.constant 0 : index
    %0 = vector.load %arg3[%c0, %c0_0, %c0_1] : memref<1x1x8xf32, #tpu.memory_space<vmem>>, vector<1x1x8xf32>
    %1 = vector.shape_cast %0 : vector<1x1x8xf32> to vector<1x8xf32>
    %c0_2 = arith.constant 0 : index
    %c0_3 = arith.constant 0 : index
    %c0_4 = arith.constant 0 : index
    %2 = vector.load %arg4[%c0_2, %c0_3, %c0_4] : memref<1x1x8xf32, #tpu.memory_space<vmem>>, vector<1x1x8xf32>
    %3 = vector.shape_cast %2 : vector<1x1x8xf32> to vector<1x8xf32>
    %4 = tpu.iota {dimensions = array<i32: 0>} : vector<8x8xi32>
    %5 = tpu.iota {dimensions = array<i32: 1>} : vector<8x8xi32>
    %6 = arith.cmpi sge, %4, %5 : vector<8x8xi32>
    %cst = arith.constant 0.000000e+00 : f32
    %cst_5 = arith.constant -1.000000e+10 : f32
    %7 = vector.broadcast %cst : f32 to vector<8x8xf32>
    %8 = vector.broadcast %cst_5 : f32 to vector<8x8xf32>
    %9 = arith.select %6, %7, %8 : vector<8x8xi1>, vector<8x8xf32>
    %10 = vector.broadcast %3 : vector<1x8xf32> to vector<8x8xf32>
    %11 = arith.addf %9, %10 : vector<8x8xf32>
    %c0_6 = arith.constant 0 : index
    %c0_7 = arith.constant 0 : index
    %c0_8 = arith.constant 0 : index
    %12 = vector.load %arg1[%c0_6, %c0_7, %c0_8] : memref<1x8x32xf32, #tpu.memory_space<vmem>>, vector<1x8x32xf32>
    %13 = vector.shape_cast %12 : vector<1x8x32xf32> to vector<8x32xf32>
    %14 = arith.truncf %13 : vector<8x32xf32> to vector<8x32xbf16>
    %c0_9 = arith.constant 0 : index
    %c0_10 = arith.constant 0 : index
    %c0_11 = arith.constant 0 : index
    %c0_12 = arith.constant 0 : index
    %15 = vector.load %arg5[%c0_9, %c0_10, %c0_11, %c0_12] : memref<2x12x32x8xbf16, #tpu.memory_space<vmem>>, vector<1x12x32x8xbf16>
    %16 = vector.shape_cast %15 : vector<1x12x32x8xbf16> to vector<12x32x8xbf16>
    %c0_13 = arith.constant 0 : index
    %c0_14 = arith.constant 0 : index
    %c0_15 = arith.constant 0 : index
    %c0_16 = arith.constant 0 : index
    %17 = vector.load %arg6[%c0_13, %c0_14, %c0_15, %c0_16] : memref<2x12x1x8xf32, #tpu.memory_space<vmem>>, vector<1x12x1x8xf32>
    %18 = vector.shape_cast %17 : vector<1x12x1x8xf32> to vector<12x1x8xf32>
    %19 = vector.shape_cast %14 : vector<8x32xbf16> to vector<1x8x32xbf16>
    %20 = vector.shape_cast %19 : vector<1x8x32xbf16> to vector<1x8x32xbf16>
    %21 = vector.broadcast %20 : vector<1x8x32xbf16> to vector<12x8x32xbf16>
    %cst_17 = arith.constant dense<0.000000e+00> : vector<12x8x8xf32>
    %22 = tpu.matmul %21, %16, %cst_17 {dimension_numbers = #tpu.dot_dimension_numbers<[2], [1], [1], [2], [0, 0, 0, 1, 1, 2], [0], [0]>} : vector<12x8x32xbf16>, vector<12x32x8xbf16>, vector<12x8x8xf32> -> vector<12x8x8xf32>
    %23 = vector.broadcast %18 : vector<12x1x8xf32> to vector<12x8x8xf32>
    %24 = arith.addf %22, %23 : vector<12x8x8xf32>
    %25 = vector.extract_strided_slice %24 {offsets = [0, 0, 0], sizes = [4, 8, 8], strides = [1, 1, 1]} : vector<12x8x8xf32> to vector<4x8x8xf32>
    %26 = vector.extract_strided_slice %24 {offsets = [4, 0, 0], sizes = [4, 8, 8], strides = [1, 1, 1]} : vector<12x8x8xf32> to vector<4x8x8xf32>
    %27 = vector.extract_strided_slice %24 {offsets = [8, 0, 0], sizes = [4, 8, 8], strides = [1, 1, 1]} : vector<12x8x8xf32> to vector<4x8x8xf32>
    %c0_18 = arith.constant 0 : index
    %c0_19 = arith.constant 0 : index
    %c0_20 = arith.constant 0 : index
    %c0_21 = arith.constant 0 : index
    %28 = vector.load %arg7[%c0_18, %c0_19, %c0_20, %c0_21] : memref<2x4x8x32xbf16, #tpu.memory_space<vmem>>, vector<1x4x8x32xbf16>
    %29 = vector.shape_cast %28 : vector<1x4x8x32xbf16> to vector<4x8x32xbf16>
    %c0_22 = arith.constant 0 : index
    %c0_23 = arith.constant 0 : index
    %c0_24 = arith.constant 0 : index
    %30 = vector.load %arg8[%c0_22, %c0_23, %c0_24] : memref<2x1x32xf32, #tpu.memory_space<vmem>>, vector<1x1x32xf32>
    %31 = vector.shape_cast %30 : vector<1x1x32xf32> to vector<1x32xf32>
    %32 = arith.truncf %25 : vector<4x8x8xf32> to vector<4x8x8xbf16>
    %33 = arith.truncf %26 : vector<4x8x8xf32> to vector<4x8x8xbf16>
    %cst_25 = arith.constant dense<0.000000e+00> : vector<4x8x8xf32>
    %34 = tpu.matmul %32, %33, %cst_25 {dimension_numbers = #tpu.dot_dimension_numbers<[2], [2], [1], [1], [0, 0, 0, 1, 1, 1], [0], [0]>} : vector<4x8x8xbf16>, vector<4x8x8xbf16>, vector<4x8x8xf32> -> vector<4x8x8xf32>
    %cst_26 = arith.constant 0.353553385 : f32
    %35 = vector.broadcast %cst_26 : f32 to vector<4x8x8xf32>
    %36 = arith.mulf %34, %35 : vector<4x8x8xf32>
    %37 = vector.shape_cast %1 : vector<1x8xf32> to vector<1x1x8xf32>
    %38 = vector.broadcast %37 : vector<1x1x8xf32> to vector<4x8x8xf32>
    %39 = arith.addf %36, %38 : vector<4x8x8xf32>
    %cst_27 = arith.constant dense<0xFF800000> : vector<4x8xf32>
    %40 = vector.multi_reduction <maximumf>, %39, %cst_27 [2] : vector<4x8x8xf32> to vector<4x8xf32>
    %41 = vector.shape_cast %40 : vector<4x8xf32> to vector<4x8x1xf32>
    %42 = vector.broadcast %41 : vector<4x8x1xf32> to vector<4x8x8xf32>
    %43 = arith.subf %39, %42 : vector<4x8x8xf32>
    %44 = math.exp %43 : vector<4x8x8xf32>
    %cst_28 = arith.constant dense<0.000000e+00> : vector<4x8xf32>
    %45 = vector.multi_reduction <add>, %44, %cst_28 [2] : vector<4x8x8xf32> to vector<4x8xf32>
    %46 = vector.shape_cast %45 : vector<4x8xf32> to vector<4x8x1xf32>
    %47 = tpu.reciprocal %46 {approx = true} : vector<4x8x1xf32> -> vector<4x8x1xf32>
    %48 = vector.broadcast %47 : vector<4x8x1xf32> to vector<4x8x8xf32>
    %49 = arith.mulf %44, %48 : vector<4x8x8xf32>
    %50 = arith.truncf %49 : vector<4x8x8xf32> to vector<4x8x8xbf16>
    %51 = arith.truncf %27 : vector<4x8x8xf32> to vector<4x8x8xbf16>
    %cst_29 = arith.constant dense<0.000000e+00> : vector<4x8x8xf32>
    %52 = tpu.matmul %50, %51, %cst_29 {dimension_numbers = #tpu.dot_dimension_numbers<[2], [1], [1], [2], [0, 0, 0, 1, 1, 2], [0], [0]>} : vector<4x8x8xbf16>, vector<4x8x8xbf16>, vector<4x8x8xf32> -> vector<4x8x8xf32>
    %53 = arith.truncf %52 : vector<4x8x8xf32> to vector<4x8x8xbf16>
    %cst_30 = arith.constant dense<0.000000e+00> : vector<4x8x32xf32>
    %54 = tpu.matmul %53, %29, %cst_30 {dimension_numbers = #tpu.dot_dimension_numbers<[2], [1], [1], [2], [0, 0, 0, 1, 1, 2], [0], [0]>} : vector<4x8x8xbf16>, vector<4x8x32xbf16>, vector<4x8x32xf32> -> vector<4x8x32xf32>
    %55 = vector.extract_strided_slice %54 {offsets = [0, 0, 0], sizes = [1, 8, 32], strides = [1, 1, 1]} : vector<4x8x32xf32> to vector<1x8x32xf32>
    %56 = vector.shape_cast %55 : vector<1x8x32xf32> to vector<8x32xf32>
    %57 = vector.extract_strided_slice %54 {offsets = [1, 0, 0], sizes = [1, 8, 32], strides = [1, 1, 1]} : vector<4x8x32xf32> to vector<1x8x32xf32>
    %58 = vector.shape_cast %57 : vector<1x8x32xf32> to vector<8x32xf32>
    %59 = arith.addf %56, %58 : vector<8x32xf32>
    %60 = vector.extract_strided_slice %54 {offsets = [2, 0, 0], sizes = [1, 8, 32], strides = [1, 1, 1]} : vector<4x8x32xf32> to vector<1x8x32xf32>
    %61 = vector.shape_cast %60 : vector<1x8x32xf32> to vector<8x32xf32>
    %62 = arith.addf %59, %61 : vector<8x32xf32>
    %63 = vector.extract_strided_slice %54 {offsets = [3, 0, 0], sizes = [1, 8, 32], strides = [1, 1, 1]} : vector<4x8x32xf32> to vector<1x8x32xf32>
    %64 = vector.shape_cast %63 : vector<1x8x32xf32> to vector<8x32xf32>
    %65 = arith.addf %62, %64 : vector<8x32xf32>
    %66 = vector.broadcast %31 : vector<1x32xf32> to vector<8x32xf32>
    %67 = arith.addf %65, %66 : vector<8x32xf32>
    %68 = arith.addf %13, %67 : vector<8x32xf32>
    %c0_31 = arith.constant 0 : index
    %c0_32 = arith.constant 0 : index
    %c0_33 = arith.constant 0 : index
    %69 = vector.load %arg9[%c0_31, %c0_32, %c0_33] : memref<2x1x32xf32, #tpu.memory_space<vmem>>, vector<1x1x32xf32>
    %70 = vector.shape_cast %69 : vector<1x1x32xf32> to vector<1x32xf32>
    %c0_34 = arith.constant 0 : index
    %c0_35 = arith.constant 0 : index
    %c0_36 = arith.constant 0 : index
    %71 = vector.load %arg10[%c0_34, %c0_35, %c0_36] : memref<2x1x32xf32, #tpu.memory_space<vmem>>, vector<1x1x32xf32>
    %72 = vector.shape_cast %71 : vector<1x1x32xf32> to vector<1x32xf32>
    %cst_37 = arith.constant dense<0.000000e+00> : vector<8xf32>
    %73 = vector.multi_reduction <add>, %68, %cst_37 [1] : vector<8x32xf32> to vector<8xf32>
    %74 = vector.shape_cast %73 : vector<8xf32> to vector<8x1xf32>
    %cst_38 = arith.constant 3.200000e+01 : f32
    %75 = vector.broadcast %cst_38 : f32 to vector<8x1xf32>
    %76 = arith.divf %74, %75 : vector<8x1xf32>
    %77 = vector.broadcast %76 : vector<8x1xf32> to vector<8x32xf32>
    %78 = arith.subf %68, %77 : vector<8x32xf32>
    %79 = arith.mulf %78, %78 : vector<8x32xf32>
    %cst_39 = arith.constant dense<0.000000e+00> : vector<8xf32>
    %80 = vector.multi_reduction <add>, %79, %cst_39 [1] : vector<8x32xf32> to vector<8xf32>
    %81 = vector.shape_cast %80 : vector<8xf32> to vector<8x1xf32>
    %cst_40 = arith.constant 3.200000e+01 : f32
    %82 = vector.broadcast %cst_40 : f32 to vector<8x1xf32>
    %83 = arith.divf %81, %82 : vector<8x1xf32>
    %84 = vector.broadcast %76 : vector<8x1xf32> to vector<8x32xf32>
    %85 = arith.subf %68, %84 : vector<8x32xf32>
    %cst_41 = arith.constant 9.99999974E-6 : f32
    %86 = vector.broadcast %cst_41 : f32 to vector<8x1xf32>
    %87 = arith.addf %83, %86 : vector<8x1xf32>
    %88 = math.rsqrt %87 : vector<8x1xf32>
    %89 = vector.broadcast %88 : vector<8x1xf32> to vector<8x32xf32>
    %90 = arith.mulf %85, %89 : vector<8x32xf32>
    %91 = vector.broadcast %70 : vector<1x32xf32> to vector<8x32xf32>
    %92 = arith.mulf %90, %91 : vector<8x32xf32>
    %93 = vector.broadcast %72 : vector<1x32xf32> to vector<8x32xf32>
    %94 = arith.addf %92, %93 : vector<8x32xf32>
    %95 = arith.truncf %94 : vector<8x32xf32> to vector<8x32xbf16>
    %c0_42 = arith.constant 0 : index
    %c0_43 = arith.constant 0 : index
    %c0_44 = arith.constant 0 : index
    %96 = vector.load %arg11[%c0_42, %c0_43, %c0_44] : memref<2x32x64xbf16, #tpu.memory_space<vmem>>, vector<1x32x64xbf16>
    %97 = vector.shape_cast %96 : vector<1x32x64xbf16> to vector<32x64xbf16>
    %cst_45 = arith.constant dense<0.000000e+00> : vector<8x64xf32>
    %98 = tpu.matmul %95, %97, %cst_45 {dimension_numbers = #tpu.dot_dimension_numbers<[1], [0], [0], [1], [0, 0, 1, 1], [], []>} : vector<8x32xbf16>, vector<32x64xbf16>, vector<8x64xf32> -> vector<8x64xf32>
    %c0_46 = arith.constant 0 : index
    %c0_47 = arith.constant 0 : index
    %c0_48 = arith.constant 0 : index
    %99 = vector.load %arg12[%c0_46, %c0_47, %c0_48] : memref<2x1x64xf32, #tpu.memory_space<vmem>>, vector<1x1x64xf32>
    %100 = vector.shape_cast %99 : vector<1x1x64xf32> to vector<1x64xf32>
    %101 = vector.broadcast %100 : vector<1x64xf32> to vector<8x64xf32>
    %102 = arith.addf %98, %101 : vector<8x64xf32>
    %cst_49 = arith.constant 0.000000e+00 : f32
    %103 = vector.broadcast %cst_49 : f32 to vector<8x64xf32>
    %104 = arith.maximumf %102, %103 : vector<8x64xf32>
    %105 = arith.truncf %104 : vector<8x64xf32> to vector<8x64xbf16>
    %c0_50 = arith.constant 0 : index
    %c0_51 = arith.constant 0 : index
    %c0_52 = arith.constant 0 : index
    %106 = vector.load %arg13[%c0_50, %c0_51, %c0_52] : memref<2x64x32xbf16, #tpu.memory_space<vmem>>, vector<1x64x32xbf16>
    %107 = vector.shape_cast %106 : vector<1x64x32xbf16> to vector<64x32xbf16>
    %cst_53 = arith.constant dense<0.000000e+00> : vector<8x32xf32>
    %108 = tpu.matmul %105, %107, %cst_53 {dimension_numbers = #tpu.dot_dimension_numbers<[1], [0], [0], [1], [0, 0, 1, 1], [], []>} : vector<8x64xbf16>, vector<64x32xbf16>, vector<8x32xf32> -> vector<8x32xf32>
    %c0_54 = arith.constant 0 : index
    %c0_55 = arith.constant 0 : index
    %c0_56 = arith.constant 0 : index
    %109 = vector.load %arg14[%c0_54, %c0_55, %c0_56] : memref<2x1x32xf32, #tpu.memory_space<vmem>>, vector<1x1x32xf32>
    %110 = vector.shape_cast %109 : vector<1x1x32xf32> to vector<1x32xf32>
    %111 = vector.broadcast %110 : vector<1x32xf32> to vector<8x32xf32>
    %112 = arith.addf %108, %111 : vector<8x32xf32>
    %113 = arith.addf %94, %112 : vector<8x32xf32>
    %c0_57 = arith.constant 0 : index
    %c0_58 = arith.constant 0 : index
    %c0_59 = arith.constant 0 : index
    %114 = vector.load %arg15[%c0_57, %c0_58, %c0_59] : memref<2x1x32xf32, #tpu.memory_space<vmem>>, vector<1x1x32xf32>
    %115 = vector.shape_cast %114 : vector<1x1x32xf32> to vector<1x32xf32>
    %c0_60 = arith.constant 0 : index
    %c0_61 = arith.constant 0 : index
    %c0_62 = arith.constant 0 : index
    %116 = vector.load %arg16[%c0_60, %c0_61, %c0_62] : memref<2x1x32xf32, #tpu.memory_space<vmem>>, vector<1x1x32xf32>
    %117 = vector.shape_cast %116 : vector<1x1x32xf32> to vector<1x32xf32>
    %cst_63 = arith.constant dense<0.000000e+00> : vector<8xf32>
    %118 = vector.multi_reduction <add>, %113, %cst_63 [1] : vector<8x32xf32> to vector<8xf32>
    %119 = vector.shape_cast %118 : vector<8xf32> to vector<8x1xf32>
    %cst_64 = arith.constant 3.200000e+01 : f32
    %120 = vector.broadcast %cst_64 : f32 to vector<8x1xf32>
    %121 = arith.divf %119, %120 : vector<8x1xf32>
    %122 = vector.broadcast %121 : vector<8x1xf32> to vector<8x32xf32>
    %123 = arith.subf %113, %122 : vector<8x32xf32>
    %124 = arith.mulf %123, %123 : vector<8x32xf32>
    %cst_65 = arith.constant dense<0.000000e+00> : vector<8xf32>
    %125 = vector.multi_reduction <add>, %124, %cst_65 [1] : vector<8x32xf32> to vector<8xf32>
    %126 = vector.shape_cast %125 : vector<8xf32> to vector<8x1xf32>
    %cst_66 = arith.constant 3.200000e+01 : f32
    %127 = vector.broadcast %cst_66 : f32 to vector<8x1xf32>
    %128 = arith.divf %126, %127 : vector<8x1xf32>
    %129 = vector.broadcast %121 : vector<8x1xf32> to vector<8x32xf32>
    %130 = arith.subf %113, %129 : vector<8x32xf32>
    %cst_67 = arith.constant 9.99999974E-6 : f32
    %131 = vector.broadcast %cst_67 : f32 to vector<8x1xf32>
    %132 = arith.addf %128, %131 : vector<8x1xf32>
    %133 = math.rsqrt %132 : vector<8x1xf32>
    %134 = vector.broadcast %133 : vector<8x1xf32> to vector<8x32xf32>
    %135 = arith.mulf %130, %134 : vector<8x32xf32>
    %136 = vector.broadcast %115 : vector<1x32xf32> to vector<8x32xf32>
    %137 = arith.mulf %135, %136 : vector<8x32xf32>
    %138 = vector.broadcast %117 : vector<1x32xf32> to vector<8x32xf32>
    %139 = arith.addf %137, %138 : vector<8x32xf32>
    %140 = arith.truncf %139 : vector<8x32xf32> to vector<8x32xbf16>
    %c1 = arith.constant 1 : index
    %c0_68 = arith.constant 0 : index
    %c0_69 = arith.constant 0 : index
    %c0_70 = arith.constant 0 : index
    %141 = vector.load %arg5[%c1, %c0_68, %c0_69, %c0_70] : memref<2x12x32x8xbf16, #tpu.memory_space<vmem>>, vector<1x12x32x8xbf16>
    %142 = vector.shape_cast %141 : vector<1x12x32x8xbf16> to vector<12x32x8xbf16>
    %c1_71 = arith.constant 1 : index
    %c0_72 = arith.constant 0 : index
    %c0_73 = arith.constant 0 : index
    %c0_74 = arith.constant 0 : index
    %143 = vector.load %arg6[%c1_71, %c0_72, %c0_73, %c0_74] : memref<2x12x1x8xf32, #tpu.memory_space<vmem>>, vector<1x12x1x8xf32>
    %144 = vector.shape_cast %143 : vector<1x12x1x8xf32> to vector<12x1x8xf32>
    %145 = vector.shape_cast %140 : vector<8x32xbf16> to vector<1x8x32xbf16>
    %146 = vector.shape_cast %145 : vector<1x8x32xbf16> to vector<1x8x32xbf16>
    %147 = vector.broadcast %146 : vector<1x8x32xbf16> to vector<12x8x32xbf16>
    %cst_75 = arith.constant dense<0.000000e+00> : vector<12x8x8xf32>
    %148 = tpu.matmul %147, %142, %cst_75 {dimension_numbers = #tpu.dot_dimension_numbers<[2], [1], [1], [2], [0, 0, 0, 1, 1, 2], [0], [0]>} : vector<12x8x32xbf16>, vector<12x32x8xbf16>, vector<12x8x8xf32> -> vector<12x8x8xf32>
    %149 = vector.broadcast %144 : vector<12x1x8xf32> to vector<12x8x8xf32>
    %150 = arith.addf %148, %149 : vector<12x8x8xf32>
    %151 = vector.extract_strided_slice %150 {offsets = [0, 0, 0], sizes = [4, 8, 8], strides = [1, 1, 1]} : vector<12x8x8xf32> to vector<4x8x8xf32>
    %152 = vector.extract_strided_slice %150 {offsets = [4, 0, 0], sizes = [4, 8, 8], strides = [1, 1, 1]} : vector<12x8x8xf32> to vector<4x8x8xf32>
    %153 = vector.extract_strided_slice %150 {offsets = [8, 0, 0], sizes = [4, 8, 8], strides = [1, 1, 1]} : vector<12x8x8xf32> to vector<4x8x8xf32>
    %c1_76 = arith.constant 1 : index
    %c0_77 = arith.constant 0 : index
    %c0_78 = arith.constant 0 : index
    %c0_79 = arith.constant 0 : index
    %154 = vector.load %arg7[%c1_76, %c0_77, %c0_78, %c0_79] : memref<2x4x8x32xbf16, #tpu.memory_space<vmem>>, vector<1x4x8x32xbf16>
    %155 = vector.shape_cast %154 : vector<1x4x8x32xbf16> to vector<4x8x32xbf16>
    %c1_80 = arith.constant 1 : index
    %c0_81 = arith.constant 0 : index
    %c0_82 = arith.constant 0 : index
    %156 = vector.load %arg8[%c1_80, %c0_81, %c0_82] : memref<2x1x32xf32, #tpu.memory_space<vmem>>, vector<1x1x32xf32>
    %157 = vector.shape_cast %156 : vector<1x1x32xf32> to vector<1x32xf32>
    %158 = arith.truncf %151 : vector<4x8x8xf32> to vector<4x8x8xbf16>
    %159 = arith.truncf %152 : vector<4x8x8xf32> to vector<4x8x8xbf16>
    %cst_83 = arith.constant dense<0.000000e+00> : vector<4x8x8xf32>
    %160 = tpu.matmul %158, %159, %cst_83 {dimension_numbers = #tpu.dot_dimension_numbers<[2], [2], [1], [1], [0, 0, 0, 1, 1, 1], [0], [0]>} : vector<4x8x8xbf16>, vector<4x8x8xbf16>, vector<4x8x8xf32> -> vector<4x8x8xf32>
    %cst_84 = arith.constant 0.353553385 : f32
    %161 = vector.broadcast %cst_84 : f32 to vector<4x8x8xf32>
    %162 = arith.mulf %160, %161 : vector<4x8x8xf32>
    %163 = vector.shape_cast %1 : vector<1x8xf32> to vector<1x1x8xf32>
    %164 = vector.broadcast %163 : vector<1x1x8xf32> to vector<4x8x8xf32>
    %165 = arith.addf %162, %164 : vector<4x8x8xf32>
    %cst_85 = arith.constant dense<0xFF800000> : vector<4x8xf32>
    %166 = vector.multi_reduction <maximumf>, %165, %cst_85 [2] : vector<4x8x8xf32> to vector<4x8xf32>
    %167 = vector.shape_cast %166 : vector<4x8xf32> to vector<4x8x1xf32>
    %168 = vector.broadcast %167 : vector<4x8x1xf32> to vector<4x8x8xf32>
    %169 = arith.subf %165, %168 : vector<4x8x8xf32>
    %170 = math.exp %169 : vector<4x8x8xf32>
    %cst_86 = arith.constant dense<0.000000e+00> : vector<4x8xf32>
    %171 = vector.multi_reduction <add>, %170, %cst_86 [2] : vector<4x8x8xf32> to vector<4x8xf32>
    %172 = vector.shape_cast %171 : vector<4x8xf32> to vector<4x8x1xf32>
    %173 = tpu.reciprocal %172 {approx = true} : vector<4x8x1xf32> -> vector<4x8x1xf32>
    %174 = vector.broadcast %173 : vector<4x8x1xf32> to vector<4x8x8xf32>
    %175 = arith.mulf %170, %174 : vector<4x8x8xf32>
    %176 = arith.truncf %175 : vector<4x8x8xf32> to vector<4x8x8xbf16>
    %177 = arith.truncf %153 : vector<4x8x8xf32> to vector<4x8x8xbf16>
    %cst_87 = arith.constant dense<0.000000e+00> : vector<4x8x8xf32>
    %178 = tpu.matmul %176, %177, %cst_87 {dimension_numbers = #tpu.dot_dimension_numbers<[2], [1], [1], [2], [0, 0, 0, 1, 1, 2], [0], [0]>} : vector<4x8x8xbf16>, vector<4x8x8xbf16>, vector<4x8x8xf32> -> vector<4x8x8xf32>
    %179 = arith.truncf %178 : vector<4x8x8xf32> to vector<4x8x8xbf16>
    %cst_88 = arith.constant dense<0.000000e+00> : vector<4x8x32xf32>
    %180 = tpu.matmul %179, %155, %cst_88 {dimension_numbers = #tpu.dot_dimension_numbers<[2], [1], [1], [2], [0, 0, 0, 1, 1, 2], [0], [0]>} : vector<4x8x8xbf16>, vector<4x8x32xbf16>, vector<4x8x32xf32> -> vector<4x8x32xf32>
    %181 = vector.extract_strided_slice %180 {offsets = [0, 0, 0], sizes = [1, 8, 32], strides = [1, 1, 1]} : vector<4x8x32xf32> to vector<1x8x32xf32>
    %182 = vector.shape_cast %181 : vector<1x8x32xf32> to vector<8x32xf32>
    %183 = vector.extract_strided_slice %180 {offsets = [1, 0, 0], sizes = [1, 8, 32], strides = [1, 1, 1]} : vector<4x8x32xf32> to vector<1x8x32xf32>
    %184 = vector.shape_cast %183 : vector<1x8x32xf32> to vector<8x32xf32>
    %185 = arith.addf %182, %184 : vector<8x32xf32>
    %186 = vector.extract_strided_slice %180 {offsets = [2, 0, 0], sizes = [1, 8, 32], strides = [1, 1, 1]} : vector<4x8x32xf32> to vector<1x8x32xf32>
    %187 = vector.shape_cast %186 : vector<1x8x32xf32> to vector<8x32xf32>
    %188 = arith.addf %185, %187 : vector<8x32xf32>
    %189 = vector.extract_strided_slice %180 {offsets = [3, 0, 0], sizes = [1, 8, 32], strides = [1, 1, 1]} : vector<4x8x32xf32> to vector<1x8x32xf32>
    %190 = vector.shape_cast %189 : vector<1x8x32xf32> to vector<8x32xf32>
    %191 = arith.addf %188, %190 : vector<8x32xf32>
    %192 = vector.broadcast %157 : vector<1x32xf32> to vector<8x32xf32>
    %193 = arith.addf %191, %192 : vector<8x32xf32>
    %194 = arith.addf %139, %193 : vector<8x32xf32>
    %c1_89 = arith.constant 1 : index
    %c0_90 = arith.constant 0 : index
    %c0_91 = arith.constant 0 : index
    %195 = vector.load %arg9[%c1_89, %c0_90, %c0_91] : memref<2x1x32xf32, #tpu.memory_space<vmem>>, vector<1x1x32xf32>
    %196 = vector.shape_cast %195 : vector<1x1x32xf32> to vector<1x32xf32>
    %c1_92 = arith.constant 1 : index
    %c0_93 = arith.constant 0 : index
    %c0_94 = arith.constant 0 : index
    %197 = vector.load %arg10[%c1_92, %c0_93, %c0_94] : memref<2x1x32xf32, #tpu.memory_space<vmem>>, vector<1x1x32xf32>
    %198 = vector.shape_cast %197 : vector<1x1x32xf32> to vector<1x32xf32>
    %cst_95 = arith.constant dense<0.000000e+00> : vector<8xf32>
    %199 = vector.multi_reduction <add>, %194, %cst_95 [1] : vector<8x32xf32> to vector<8xf32>
    %200 = vector.shape_cast %199 : vector<8xf32> to vector<8x1xf32>
    %cst_96 = arith.constant 3.200000e+01 : f32
    %201 = vector.broadcast %cst_96 : f32 to vector<8x1xf32>
    %202 = arith.divf %200, %201 : vector<8x1xf32>
    %203 = vector.broadcast %202 : vector<8x1xf32> to vector<8x32xf32>
    %204 = arith.subf %194, %203 : vector<8x32xf32>
    %205 = arith.mulf %204, %204 : vector<8x32xf32>
    %cst_97 = arith.constant dense<0.000000e+00> : vector<8xf32>
    %206 = vector.multi_reduction <add>, %205, %cst_97 [1] : vector<8x32xf32> to vector<8xf32>
    %207 = vector.shape_cast %206 : vector<8xf32> to vector<8x1xf32>
    %cst_98 = arith.constant 3.200000e+01 : f32
    %208 = vector.broadcast %cst_98 : f32 to vector<8x1xf32>
    %209 = arith.divf %207, %208 : vector<8x1xf32>
    %210 = vector.broadcast %202 : vector<8x1xf32> to vector<8x32xf32>
    %211 = arith.subf %194, %210 : vector<8x32xf32>
    %cst_99 = arith.constant 9.99999974E-6 : f32
    %212 = vector.broadcast %cst_99 : f32 to vector<8x1xf32>
    %213 = arith.addf %209, %212 : vector<8x1xf32>
    %214 = math.rsqrt %213 : vector<8x1xf32>
    %215 = vector.broadcast %214 : vector<8x1xf32> to vector<8x32xf32>
    %216 = arith.mulf %211, %215 : vector<8x32xf32>
    %217 = vector.broadcast %196 : vector<1x32xf32> to vector<8x32xf32>
    %218 = arith.mulf %216, %217 : vector<8x32xf32>
    %219 = vector.broadcast %198 : vector<1x32xf32> to vector<8x32xf32>
    %220 = arith.addf %218, %219 : vector<8x32xf32>
    %221 = arith.truncf %220 : vector<8x32xf32> to vector<8x32xbf16>
    %c1_100 = arith.constant 1 : index
    %c0_101 = arith.constant 0 : index
    %c0_102 = arith.constant 0 : index
    %222 = vector.load %arg11[%c1_100, %c0_101, %c0_102] : memref<2x32x64xbf16, #tpu.memory_space<vmem>>, vector<1x32x64xbf16>
    %223 = vector.shape_cast %222 : vector<1x32x64xbf16> to vector<32x64xbf16>
    %cst_103 = arith.constant dense<0.000000e+00> : vector<8x64xf32>
    %224 = tpu.matmul %221, %223, %cst_103 {dimension_numbers = #tpu.dot_dimension_numbers<[1], [0], [0], [1], [0, 0, 1, 1], [], []>} : vector<8x32xbf16>, vector<32x64xbf16>, vector<8x64xf32> -> vector<8x64xf32>
    %c1_104 = arith.constant 1 : index
    %c0_105 = arith.constant 0 : index
    %c0_106 = arith.constant 0 : index
    %225 = vector.load %arg12[%c1_104, %c0_105, %c0_106] : memref<2x1x64xf32, #tpu.memory_space<vmem>>, vector<1x1x64xf32>
    %226 = vector.shape_cast %225 : vector<1x1x64xf32> to vector<1x64xf32>
    %227 = vector.broadcast %226 : vector<1x64xf32> to vector<8x64xf32>
    %228 = arith.addf %224, %227 : vector<8x64xf32>
    %cst_107 = arith.constant 0.000000e+00 : f32
    %229 = vector.broadcast %cst_107 : f32 to vector<8x64xf32>
    %230 = arith.maximumf %228, %229 : vector<8x64xf32>
    %231 = arith.truncf %230 : vector<8x64xf32> to vector<8x64xbf16>
    %c1_108 = arith.constant 1 : index
    %c0_109 = arith.constant 0 : index
    %c0_110 = arith.constant 0 : index
    %232 = vector.load %arg13[%c1_108, %c0_109, %c0_110] : memref<2x64x32xbf16, #tpu.memory_space<vmem>>, vector<1x64x32xbf16>
    %233 = vector.shape_cast %232 : vector<1x64x32xbf16> to vector<64x32xbf16>
    %cst_111 = arith.constant dense<0.000000e+00> : vector<8x32xf32>
    %234 = tpu.matmul %231, %233, %cst_111 {dimension_numbers = #tpu.dot_dimension_numbers<[1], [0], [0], [1], [0, 0, 1, 1], [], []>} : vector<8x64xbf16>, vector<64x32xbf16>, vector<8x32xf32> -> vector<8x32xf32>
    %c1_112 = arith.constant 1 : index
    %c0_113 = arith.constant 0 : index
    %c0_114 = arith.constant 0 : index
    %235 = vector.load %arg14[%c1_112, %c0_113, %c0_114] : memref<2x1x32xf32, #tpu.memory_space<vmem>>, vector<1x1x32xf32>
    %236 = vector.shape_cast %235 : vector<1x1x32xf32> to vector<1x32xf32>
    %237 = vector.broadcast %236 : vector<1x32xf32> to vector<8x32xf32>
    %238 = arith.addf %234, %237 : vector<8x32xf32>
    %239 = arith.addf %220, %238 : vector<8x32xf32>
    %c1_115 = arith.constant 1 : index
    %c0_116 = arith.constant 0 : index
    %c0_117 = arith.constant 0 : index
    %240 = vector.load %arg15[%c1_115, %c0_116, %c0_117] : memref<2x1x32xf32, #tpu.memory_space<vmem>>, vector<1x1x32xf32>
    %241 = vector.shape_cast %240 : vector<1x1x32xf32> to vector<1x32xf32>
    %c1_118 = arith.constant 1 : index
    %c0_119 = arith.constant 0 : index
    %c0_120 = arith.constant 0 : index
    %242 = vector.load %arg16[%c1_118, %c0_119, %c0_120] : memref<2x1x32xf32, #tpu.memory_space<vmem>>, vector<1x1x32xf32>
    %243 = vector.shape_cast %242 : vector<1x1x32xf32> to vector<1x32xf32>
    %cst_121 = arith.constant dense<0.000000e+00> : vector<8xf32>
    %244 = vector.multi_reduction <add>, %239, %cst_121 [1] : vector<8x32xf32> to vector<8xf32>
    %245 = vector.shape_cast %244 : vector<8xf32> to vector<8x1xf32>
    %cst_122 = arith.constant 3.200000e+01 : f32
    %246 = vector.broadcast %cst_122 : f32 to vector<8x1xf32>
    %247 = arith.divf %245, %246 : vector<8x1xf32>
    %248 = vector.broadcast %247 : vector<8x1xf32> to vector<8x32xf32>
    %249 = arith.subf %239, %248 : vector<8x32xf32>
    %250 = arith.mulf %249, %249 : vector<8x32xf32>
    %cst_123 = arith.constant dense<0.000000e+00> : vector<8xf32>
    %251 = vector.multi_reduction <add>, %250, %cst_123 [1] : vector<8x32xf32> to vector<8xf32>
    %252 = vector.shape_cast %251 : vector<8xf32> to vector<8x1xf32>
    %cst_124 = arith.constant 3.200000e+01 : f32
    %253 = vector.broadcast %cst_124 : f32 to vector<8x1xf32>
    %254 = arith.divf %252, %253 : vector<8x1xf32>
    %255 = vector.broadcast %247 : vector<8x1xf32> to vector<8x32xf32>
    %256 = arith.subf %239, %255 : vector<8x32xf32>
    %cst_125 = arith.constant 9.99999974E-6 : f32
    %257 = vector.broadcast %cst_125 : f32 to vector<8x1xf32>
    %258 = arith.addf %254, %257 : vector<8x1xf32>
    %259 = math.rsqrt %258 : vector<8x1xf32>
    %260 = vector.broadcast %259 : vector<8x1xf32> to vector<8x32xf32>
    %261 = arith.mulf %256, %260 : vector<8x32xf32>
    %262 = vector.broadcast %241 : vector<1x32xf32> to vector<8x32xf32>
    %263 = arith.mulf %261, %262 : vector<8x32xf32>
    %264 = vector.broadcast %243 : vector<1x32xf32> to vector<8x32xf32>
    %265 = arith.addf %263, %264 : vector<8x32xf32>
    %266 = arith.truncf %265 : vector<8x32xf32> to vector<8x32xbf16>
    %c0_126 = arith.constant 0 : index
    %c0_127 = arith.constant 0 : index
    %c0_128 = arith.constant 0 : index
    %267 = vector.load %arg2[%c0_126, %c0_127, %c0_128] : memref<1x8x32xf32, #tpu.memory_space<vmem>>, vector<1x8x32xf32>
    %268 = vector.shape_cast %267 : vector<1x8x32xf32> to vector<8x32xf32>
    %269 = arith.truncf %268 : vector<8x32xf32> to vector<8x32xbf16>
    %c0_129 = arith.constant 0 : index
    %c0_130 = arith.constant 0 : index
    %c0_131 = arith.constant 0 : index
    %c0_132 = arith.constant 0 : index
    %270 = vector.load %arg17[%c0_129, %c0_130, %c0_131, %c0_132] : memref<2x12x32x8xbf16, #tpu.memory_space<vmem>>, vector<1x12x32x8xbf16>
    %271 = vector.shape_cast %270 : vector<1x12x32x8xbf16> to vector<12x32x8xbf16>
    %c0_133 = arith.constant 0 : index
    %c0_134 = arith.constant 0 : index
    %c0_135 = arith.constant 0 : index
    %c0_136 = arith.constant 0 : index
    %272 = vector.load %arg18[%c0_133, %c0_134, %c0_135, %c0_136] : memref<2x12x1x8xf32, #tpu.memory_space<vmem>>, vector<1x12x1x8xf32>
    %273 = vector.shape_cast %272 : vector<1x12x1x8xf32> to vector<12x1x8xf32>
    %274 = vector.shape_cast %269 : vector<8x32xbf16> to vector<1x8x32xbf16>
    %275 = vector.shape_cast %274 : vector<1x8x32xbf16> to vector<1x8x32xbf16>
    %276 = vector.broadcast %275 : vector<1x8x32xbf16> to vector<12x8x32xbf16>
    %cst_137 = arith.constant dense<0.000000e+00> : vector<12x8x8xf32>
    %277 = tpu.matmul %276, %271, %cst_137 {dimension_numbers = #tpu.dot_dimension_numbers<[2], [1], [1], [2], [0, 0, 0, 1, 1, 2], [0], [0]>} : vector<12x8x32xbf16>, vector<12x32x8xbf16>, vector<12x8x8xf32> -> vector<12x8x8xf32>
    %278 = vector.broadcast %273 : vector<12x1x8xf32> to vector<12x8x8xf32>
    %279 = arith.addf %277, %278 : vector<12x8x8xf32>
    %280 = vector.extract_strided_slice %279 {offsets = [0, 0, 0], sizes = [4, 8, 8], strides = [1, 1, 1]} : vector<12x8x8xf32> to vector<4x8x8xf32>
    %281 = vector.extract_strided_slice %279 {offsets = [4, 0, 0], sizes = [4, 8, 8], strides = [1, 1, 1]} : vector<12x8x8xf32> to vector<4x8x8xf32>
    %282 = vector.extract_strided_slice %279 {offsets = [8, 0, 0], sizes = [4, 8, 8], strides = [1, 1, 1]} : vector<12x8x8xf32> to vector<4x8x8xf32>
    %c0_138 = arith.constant 0 : index
    %c0_139 = arith.constant 0 : index
    %c0_140 = arith.constant 0 : index
    %c0_141 = arith.constant 0 : index
    %283 = vector.load %arg19[%c0_138, %c0_139, %c0_140, %c0_141] : memref<2x4x8x32xbf16, #tpu.memory_space<vmem>>, vector<1x4x8x32xbf16>
    %284 = vector.shape_cast %283 : vector<1x4x8x32xbf16> to vector<4x8x32xbf16>
    %c0_142 = arith.constant 0 : index
    %c0_143 = arith.constant 0 : index
    %c0_144 = arith.constant 0 : index
    %285 = vector.load %arg20[%c0_142, %c0_143, %c0_144] : memref<2x1x32xf32, #tpu.memory_space<vmem>>, vector<1x1x32xf32>
    %286 = vector.shape_cast %285 : vector<1x1x32xf32> to vector<1x32xf32>
    %287 = arith.truncf %280 : vector<4x8x8xf32> to vector<4x8x8xbf16>
    %288 = arith.truncf %281 : vector<4x8x8xf32> to vector<4x8x8xbf16>
    %cst_145 = arith.constant dense<0.000000e+00> : vector<4x8x8xf32>
    %289 = tpu.matmul %287, %288, %cst_145 {dimension_numbers = #tpu.dot_dimension_numbers<[2], [2], [1], [1], [0, 0, 0, 1, 1, 1], [0], [0]>} : vector<4x8x8xbf16>, vector<4x8x8xbf16>, vector<4x8x8xf32> -> vector<4x8x8xf32>
    %cst_146 = arith.constant 0.353553385 : f32
    %290 = vector.broadcast %cst_146 : f32 to vector<4x8x8xf32>
    %291 = arith.mulf %289, %290 : vector<4x8x8xf32>
    %292 = vector.shape_cast %11 : vector<8x8xf32> to vector<1x8x8xf32>
    %293 = vector.broadcast %292 : vector<1x8x8xf32> to vector<4x8x8xf32>
    %294 = arith.addf %291, %293 : vector<4x8x8xf32>
    %cst_147 = arith.constant dense<0xFF800000> : vector<4x8xf32>
    %295 = vector.multi_reduction <maximumf>, %294, %cst_147 [2] : vector<4x8x8xf32> to vector<4x8xf32>
    %296 = vector.shape_cast %295 : vector<4x8xf32> to vector<4x8x1xf32>
    %297 = vector.broadcast %296 : vector<4x8x1xf32> to vector<4x8x8xf32>
    %298 = arith.subf %294, %297 : vector<4x8x8xf32>
    %299 = math.exp %298 : vector<4x8x8xf32>
    %cst_148 = arith.constant dense<0.000000e+00> : vector<4x8xf32>
    %300 = vector.multi_reduction <add>, %299, %cst_148 [2] : vector<4x8x8xf32> to vector<4x8xf32>
    %301 = vector.shape_cast %300 : vector<4x8xf32> to vector<4x8x1xf32>
    %302 = tpu.reciprocal %301 {approx = true} : vector<4x8x1xf32> -> vector<4x8x1xf32>
    %303 = vector.broadcast %302 : vector<4x8x1xf32> to vector<4x8x8xf32>
    %304 = arith.mulf %299, %303 : vector<4x8x8xf32>
    %305 = arith.truncf %304 : vector<4x8x8xf32> to vector<4x8x8xbf16>
    %306 = arith.truncf %282 : vector<4x8x8xf32> to vector<4x8x8xbf16>
    %cst_149 = arith.constant dense<0.000000e+00> : vector<4x8x8xf32>
    %307 = tpu.matmul %305, %306, %cst_149 {dimension_numbers = #tpu.dot_dimension_numbers<[2], [1], [1], [2], [0, 0, 0, 1, 1, 2], [0], [0]>} : vector<4x8x8xbf16>, vector<4x8x8xbf16>, vector<4x8x8xf32> -> vector<4x8x8xf32>
    %308 = arith.truncf %307 : vector<4x8x8xf32> to vector<4x8x8xbf16>
    %cst_150 = arith.constant dense<0.000000e+00> : vector<4x8x32xf32>
    %309 = tpu.matmul %308, %284, %cst_150 {dimension_numbers = #tpu.dot_dimension_numbers<[2], [1], [1], [2], [0, 0, 0, 1, 1, 2], [0], [0]>} : vector<4x8x8xbf16>, vector<4x8x32xbf16>, vector<4x8x32xf32> -> vector<4x8x32xf32>
    %310 = vector.extract_strided_slice %309 {offsets = [0, 0, 0], sizes = [1, 8, 32], strides = [1, 1, 1]} : vector<4x8x32xf32> to vector<1x8x32xf32>
    %311 = vector.shape_cast %310 : vector<1x8x32xf32> to vector<8x32xf32>
    %312 = vector.extract_strided_slice %309 {offsets = [1, 0, 0], sizes = [1, 8, 32], strides = [1, 1, 1]} : vector<4x8x32xf32> to vector<1x8x32xf32>
    %313 = vector.shape_cast %312 : vector<1x8x32xf32> to vector<8x32xf32>
    %314 = arith.addf %311, %313 : vector<8x32xf32>
    %315 = vector.extract_strided_slice %309 {offsets = [2, 0, 0], sizes = [1, 8, 32], strides = [1, 1, 1]} : vector<4x8x32xf32> to vector<1x8x32xf32>
    %316 = vector.shape_cast %315 : vector<1x8x32xf32> to vector<8x32xf32>
    %317 = arith.addf %314, %316 : vector<8x32xf32>
    %318 = vector.extract_strided_slice %309 {offsets = [3, 0, 0], sizes = [1, 8, 32], strides = [1, 1, 1]} : vector<4x8x32xf32> to vector<1x8x32xf32>
    %319 = vector.shape_cast %318 : vector<1x8x32xf32> to vector<8x32xf32>
    %320 = arith.addf %317, %319 : vector<8x32xf32>
    %321 = vector.broadcast %286 : vector<1x32xf32> to vector<8x32xf32>
    %322 = arith.addf %320, %321 : vector<8x32xf32>
    %323 = arith.addf %268, %322 : vector<8x32xf32>
    %c0_151 = arith.constant 0 : index
    %c0_152 = arith.constant 0 : index
    %c0_153 = arith.constant 0 : index
    %324 = vector.load %arg21[%c0_151, %c0_152, %c0_153] : memref<2x1x32xf32, #tpu.memory_space<vmem>>, vector<1x1x32xf32>
    %325 = vector.shape_cast %324 : vector<1x1x32xf32> to vector<1x32xf32>
    %c0_154 = arith.constant 0 : index
    %c0_155 = arith.constant 0 : index
    %c0_156 = arith.constant 0 : index
    %326 = vector.load %arg22[%c0_154, %c0_155, %c0_156] : memref<2x1x32xf32, #tpu.memory_space<vmem>>, vector<1x1x32xf32>
    %327 = vector.shape_cast %326 : vector<1x1x32xf32> to vector<1x32xf32>
    %cst_157 = arith.constant dense<0.000000e+00> : vector<8xf32>
    %328 = vector.multi_reduction <add>, %323, %cst_157 [1] : vector<8x32xf32> to vector<8xf32>
    %329 = vector.shape_cast %328 : vector<8xf32> to vector<8x1xf32>
    %cst_158 = arith.constant 3.200000e+01 : f32
    %330 = vector.broadcast %cst_158 : f32 to vector<8x1xf32>
    %331 = arith.divf %329, %330 : vector<8x1xf32>
    %332 = vector.broadcast %331 : vector<8x1xf32> to vector<8x32xf32>
    %333 = arith.subf %323, %332 : vector<8x32xf32>
    %334 = arith.mulf %333, %333 : vector<8x32xf32>
    %cst_159 = arith.constant dense<0.000000e+00> : vector<8xf32>
    %335 = vector.multi_reduction <add>, %334, %cst_159 [1] : vector<8x32xf32> to vector<8xf32>
    %336 = vector.shape_cast %335 : vector<8xf32> to vector<8x1xf32>
    %cst_160 = arith.constant 3.200000e+01 : f32
    %337 = vector.broadcast %cst_160 : f32 to vector<8x1xf32>
    %338 = arith.divf %336, %337 : vector<8x1xf32>
    %339 = vector.broadcast %331 : vector<8x1xf32> to vector<8x32xf32>
    %340 = arith.subf %323, %339 : vector<8x32xf32>
    %cst_161 = arith.constant 9.99999974E-6 : f32
    %341 = vector.broadcast %cst_161 : f32 to vector<8x1xf32>
    %342 = arith.addf %338, %341 : vector<8x1xf32>
    %343 = math.rsqrt %342 : vector<8x1xf32>
    %344 = vector.broadcast %343 : vector<8x1xf32> to vector<8x32xf32>
    %345 = arith.mulf %340, %344 : vector<8x32xf32>
    %346 = vector.broadcast %325 : vector<1x32xf32> to vector<8x32xf32>
    %347 = arith.mulf %345, %346 : vector<8x32xf32>
    %348 = vector.broadcast %327 : vector<1x32xf32> to vector<8x32xf32>
    %349 = arith.addf %347, %348 : vector<8x32xf32>
    %350 = arith.truncf %349 : vector<8x32xf32> to vector<8x32xbf16>
    %c0_162 = arith.constant 0 : index
    %c0_163 = arith.constant 0 : index
    %c0_164 = arith.constant 0 : index
    %c0_165 = arith.constant 0 : index
    %351 = vector.load %arg23[%c0_162, %c0_163, %c0_164, %c0_165] : memref<2x4x32x8xbf16, #tpu.memory_space<vmem>>, vector<1x4x32x8xbf16>
    %352 = vector.shape_cast %351 : vector<1x4x32x8xbf16> to vector<4x32x8xbf16>
    %c0_166 = arith.constant 0 : index
    %c0_167 = arith.constant 0 : index
    %c0_168 = arith.constant 0 : index
    %c0_169 = arith.constant 0 : index
    %353 = vector.load %arg24[%c0_166, %c0_167, %c0_168, %c0_169] : memref<2x4x1x8xf32, #tpu.memory_space<vmem>>, vector<1x4x1x8xf32>
    %354 = vector.shape_cast %353 : vector<1x4x1x8xf32> to vector<4x1x8xf32>
    %355 = vector.shape_cast %350 : vector<8x32xbf16> to vector<1x8x32xbf16>
    %356 = vector.shape_cast %355 : vector<1x8x32xbf16> to vector<1x8x32xbf16>
    %357 = vector.broadcast %356 : vector<1x8x32xbf16> to vector<4x8x32xbf16>
    %cst_170 = arith.constant dense<0.000000e+00> : vector<4x8x8xf32>
    %358 = tpu.matmul %357, %352, %cst_170 {dimension_numbers = #tpu.dot_dimension_numbers<[2], [1], [1], [2], [0, 0, 0, 1, 1, 2], [0], [0]>} : vector<4x8x32xbf16>, vector<4x32x8xbf16>, vector<4x8x8xf32> -> vector<4x8x8xf32>
    %359 = vector.broadcast %354 : vector<4x1x8xf32> to vector<4x8x8xf32>
    %360 = arith.addf %358, %359 : vector<4x8x8xf32>
    %c0_171 = arith.constant 0 : index
    %c0_172 = arith.constant 0 : index
    %c0_173 = arith.constant 0 : index
    %c0_174 = arith.constant 0 : index
    %361 = vector.load %arg25[%c0_171, %c0_172, %c0_173, %c0_174] : memref<2x8x32x8xbf16, #tpu.memory_space<vmem>>, vector<1x8x32x8xbf16>
    %362 = vector.shape_cast %361 : vector<1x8x32x8xbf16> to vector<8x32x8xbf16>
    %c0_175 = arith.constant 0 : index
    %c0_176 = arith.constant 0 : index
    %c0_177 = arith.constant 0 : index
    %c0_178 = arith.constant 0 : index
    %363 = vector.load %arg26[%c0_175, %c0_176, %c0_177, %c0_178] : memref<2x8x1x8xf32, #tpu.memory_space<vmem>>, vector<1x8x1x8xf32>
    %364 = vector.shape_cast %363 : vector<1x8x1x8xf32> to vector<8x1x8xf32>
    %365 = vector.shape_cast %266 : vector<8x32xbf16> to vector<1x8x32xbf16>
    %366 = vector.shape_cast %365 : vector<1x8x32xbf16> to vector<1x8x32xbf16>
    %367 = vector.broadcast %366 : vector<1x8x32xbf16> to vector<8x8x32xbf16>
    %cst_179 = arith.constant dense<0.000000e+00> : vector<8x8x8xf32>
    %368 = tpu.matmul %367, %362, %cst_179 {dimension_numbers = #tpu.dot_dimension_numbers<[2], [1], [1], [2], [0, 0, 0, 1, 1, 2], [0], [0]>} : vector<8x8x32xbf16>, vector<8x32x8xbf16>, vector<8x8x8xf32> -> vector<8x8x8xf32>
    %369 = vector.broadcast %364 : vector<8x1x8xf32> to vector<8x8x8xf32>
    %370 = arith.addf %368, %369 : vector<8x8x8xf32>
    %371 = vector.extract_strided_slice %370 {offsets = [0, 0, 0], sizes = [4, 8, 8], strides = [1, 1, 1]} : vector<8x8x8xf32> to vector<4x8x8xf32>
    %372 = vector.extract_strided_slice %370 {offsets = [4, 0, 0], sizes = [4, 8, 8], strides = [1, 1, 1]} : vector<8x8x8xf32> to vector<4x8x8xf32>
    %c0_180 = arith.constant 0 : index
    %c0_181 = arith.constant 0 : index
    %c0_182 = arith.constant 0 : index
    %c0_183 = arith.constant 0 : index
    %373 = vector.load %arg27[%c0_180, %c0_181, %c0_182, %c0_183] : memref<2x4x8x32xbf16, #tpu.memory_space<vmem>>, vector<1x4x8x32xbf16>
    %374 = vector.shape_cast %373 : vector<1x4x8x32xbf16> to vector<4x8x32xbf16>
    %c0_184 = arith.constant 0 : index
    %c0_185 = arith.constant 0 : index
    %c0_186 = arith.constant 0 : index
    %375 = vector.load %arg28[%c0_184, %c0_185, %c0_186] : memref<2x1x32xf32, #tpu.memory_space<vmem>>, vector<1x1x32xf32>
    %376 = vector.shape_cast %375 : vector<1x1x32xf32> to vector<1x32xf32>
    %377 = arith.truncf %360 : vector<4x8x8xf32> to vector<4x8x8xbf16>
    %378 = arith.truncf %371 : vector<4x8x8xf32> to vector<4x8x8xbf16>
    %cst_187 = arith.constant dense<0.000000e+00> : vector<4x8x8xf32>
    %379 = tpu.matmul %377, %378, %cst_187 {dimension_numbers = #tpu.dot_dimension_numbers<[2], [2], [1], [1], [0, 0, 0, 1, 1, 1], [0], [0]>} : vector<4x8x8xbf16>, vector<4x8x8xbf16>, vector<4x8x8xf32> -> vector<4x8x8xf32>
    %cst_188 = arith.constant 0.353553385 : f32
    %380 = vector.broadcast %cst_188 : f32 to vector<4x8x8xf32>
    %381 = arith.mulf %379, %380 : vector<4x8x8xf32>
    %382 = vector.shape_cast %1 : vector<1x8xf32> to vector<1x1x8xf32>
    %383 = vector.broadcast %382 : vector<1x1x8xf32> to vector<4x8x8xf32>
    %384 = arith.addf %381, %383 : vector<4x8x8xf32>
    %cst_189 = arith.constant dense<0xFF800000> : vector<4x8xf32>
    %385 = vector.multi_reduction <maximumf>, %384, %cst_189 [2] : vector<4x8x8xf32> to vector<4x8xf32>
    %386 = vector.shape_cast %385 : vector<4x8xf32> to vector<4x8x1xf32>
    %387 = vector.broadcast %386 : vector<4x8x1xf32> to vector<4x8x8xf32>
    %388 = arith.subf %384, %387 : vector<4x8x8xf32>
    %389 = math.exp %388 : vector<4x8x8xf32>
    %cst_190 = arith.constant dense<0.000000e+00> : vector<4x8xf32>
    %390 = vector.multi_reduction <add>, %389, %cst_190 [2] : vector<4x8x8xf32> to vector<4x8xf32>
    %391 = vector.shape_cast %390 : vector<4x8xf32> to vector<4x8x1xf32>
    %392 = tpu.reciprocal %391 {approx = true} : vector<4x8x1xf32> -> vector<4x8x1xf32>
    %393 = vector.broadcast %392 : vector<4x8x1xf32> to vector<4x8x8xf32>
    %394 = arith.mulf %389, %393 : vector<4x8x8xf32>
    %395 = arith.truncf %394 : vector<4x8x8xf32> to vector<4x8x8xbf16>
    %396 = arith.truncf %372 : vector<4x8x8xf32> to vector<4x8x8xbf16>
    %cst_191 = arith.constant dense<0.000000e+00> : vector<4x8x8xf32>
    %397 = tpu.matmul %395, %396, %cst_191 {dimension_numbers = #tpu.dot_dimension_numbers<[2], [1], [1], [2], [0, 0, 0, 1, 1, 2], [0], [0]>} : vector<4x8x8xbf16>, vector<4x8x8xbf16>, vector<4x8x8xf32> -> vector<4x8x8xf32>
    %398 = arith.truncf %397 : vector<4x8x8xf32> to vector<4x8x8xbf16>
    %cst_192 = arith.constant dense<0.000000e+00> : vector<4x8x32xf32>
    %399 = tpu.matmul %398, %374, %cst_192 {dimension_numbers = #tpu.dot_dimension_numbers<[2], [1], [1], [2], [0, 0, 0, 1, 1, 2], [0], [0]>} : vector<4x8x8xbf16>, vector<4x8x32xbf16>, vector<4x8x32xf32> -> vector<4x8x32xf32>
    %400 = vector.extract_strided_slice %399 {offsets = [0, 0, 0], sizes = [1, 8, 32], strides = [1, 1, 1]} : vector<4x8x32xf32> to vector<1x8x32xf32>
    %401 = vector.shape_cast %400 : vector<1x8x32xf32> to vector<8x32xf32>
    %402 = vector.extract_strided_slice %399 {offsets = [1, 0, 0], sizes = [1, 8, 32], strides = [1, 1, 1]} : vector<4x8x32xf32> to vector<1x8x32xf32>
    %403 = vector.shape_cast %402 : vector<1x8x32xf32> to vector<8x32xf32>
    %404 = arith.addf %401, %403 : vector<8x32xf32>
    %405 = vector.extract_strided_slice %399 {offsets = [2, 0, 0], sizes = [1, 8, 32], strides = [1, 1, 1]} : vector<4x8x32xf32> to vector<1x8x32xf32>
    %406 = vector.shape_cast %405 : vector<1x8x32xf32> to vector<8x32xf32>
    %407 = arith.addf %404, %406 : vector<8x32xf32>
    %408 = vector.extract_strided_slice %399 {offsets = [3, 0, 0], sizes = [1, 8, 32], strides = [1, 1, 1]} : vector<4x8x32xf32> to vector<1x8x32xf32>
    %409 = vector.shape_cast %408 : vector<1x8x32xf32> to vector<8x32xf32>
    %410 = arith.addf %407, %409 : vector<8x32xf32>
    %411 = vector.broadcast %376 : vector<1x32xf32> to vector<8x32xf32>
    %412 = arith.addf %410, %411 : vector<8x32xf32>
    %413 = arith.addf %349, %412 : vector<8x32xf32>
    %c0_193 = arith.constant 0 : index
    %c0_194 = arith.constant 0 : index
    %c0_195 = arith.constant 0 : index
    %414 = vector.load %arg29[%c0_193, %c0_194, %c0_195] : memref<2x1x32xf32, #tpu.memory_space<vmem>>, vector<1x1x32xf32>
    %415 = vector.shape_cast %414 : vector<1x1x32xf32> to vector<1x32xf32>
    %c0_196 = arith.constant 0 : index
    %c0_197 = arith.constant 0 : index
    %c0_198 = arith.constant 0 : index
    %416 = vector.load %arg30[%c0_196, %c0_197, %c0_198] : memref<2x1x32xf32, #tpu.memory_space<vmem>>, vector<1x1x32xf32>
    %417 = vector.shape_cast %416 : vector<1x1x32xf32> to vector<1x32xf32>
    %cst_199 = arith.constant dense<0.000000e+00> : vector<8xf32>
    %418 = vector.multi_reduction <add>, %413, %cst_199 [1] : vector<8x32xf32> to vector<8xf32>
    %419 = vector.shape_cast %418 : vector<8xf32> to vector<8x1xf32>
    %cst_200 = arith.constant 3.200000e+01 : f32
    %420 = vector.broadcast %cst_200 : f32 to vector<8x1xf32>
    %421 = arith.divf %419, %420 : vector<8x1xf32>
    %422 = vector.broadcast %421 : vector<8x1xf32> to vector<8x32xf32>
    %423 = arith.subf %413, %422 : vector<8x32xf32>
    %424 = arith.mulf %423, %423 : vector<8x32xf32>
    %cst_201 = arith.constant dense<0.000000e+00> : vector<8xf32>
    %425 = vector.multi_reduction <add>, %424, %cst_201 [1] : vector<8x32xf32> to vector<8xf32>
    %426 = vector.shape_cast %425 : vector<8xf32> to vector<8x1xf32>
    %cst_202 = arith.constant 3.200000e+01 : f32
    %427 = vector.broadcast %cst_202 : f32 to vector<8x1xf32>
    %428 = arith.divf %426, %427 : vector<8x1xf32>
    %429 = vector.broadcast %421 : vector<8x1xf32> to vector<8x32xf32>
    %430 = arith.subf %413, %429 : vector<8x32xf32>
    %cst_203 = arith.constant 9.99999974E-6 : f32
    %431 = vector.broadcast %cst_203 : f32 to vector<8x1xf32>
    %432 = arith.addf %428, %431 : vector<8x1xf32>
    %433 = math.rsqrt %432 : vector<8x1xf32>
    %434 = vector.broadcast %433 : vector<8x1xf32> to vector<8x32xf32>
    %435 = arith.mulf %430, %434 : vector<8x32xf32>
    %436 = vector.broadcast %415 : vector<1x32xf32> to vector<8x32xf32>
    %437 = arith.mulf %435, %436 : vector<8x32xf32>
    %438 = vector.broadcast %417 : vector<1x32xf32> to vector<8x32xf32>
    %439 = arith.addf %437, %438 : vector<8x32xf32>
    %440 = arith.truncf %439 : vector<8x32xf32> to vector<8x32xbf16>
    %c0_204 = arith.constant 0 : index
    %c0_205 = arith.constant 0 : index
    %c0_206 = arith.constant 0 : index
    %441 = vector.load %arg31[%c0_204, %c0_205, %c0_206] : memref<2x32x64xbf16, #tpu.memory_space<vmem>>, vector<1x32x64xbf16>
    %442 = vector.shape_cast %441 : vector<1x32x64xbf16> to vector<32x64xbf16>
    %cst_207 = arith.constant dense<0.000000e+00> : vector<8x64xf32>
    %443 = tpu.matmul %440, %442, %cst_207 {dimension_numbers = #tpu.dot_dimension_numbers<[1], [0], [0], [1], [0, 0, 1, 1], [], []>} : vector<8x32xbf16>, vector<32x64xbf16>, vector<8x64xf32> -> vector<8x64xf32>
    %c0_208 = arith.constant 0 : index
    %c0_209 = arith.constant 0 : index
    %c0_210 = arith.constant 0 : index
    %444 = vector.load %arg32[%c0_208, %c0_209, %c0_210] : memref<2x1x64xf32, #tpu.memory_space<vmem>>, vector<1x1x64xf32>
    %445 = vector.shape_cast %444 : vector<1x1x64xf32> to vector<1x64xf32>
    %446 = vector.broadcast %445 : vector<1x64xf32> to vector<8x64xf32>
    %447 = arith.addf %443, %446 : vector<8x64xf32>
    %cst_211 = arith.constant 0.000000e+00 : f32
    %448 = vector.broadcast %cst_211 : f32 to vector<8x64xf32>
    %449 = arith.maximumf %447, %448 : vector<8x64xf32>
    %450 = arith.truncf %449 : vector<8x64xf32> to vector<8x64xbf16>
    %c0_212 = arith.constant 0 : index
    %c0_213 = arith.constant 0 : index
    %c0_214 = arith.constant 0 : index
    %451 = vector.load %arg33[%c0_212, %c0_213, %c0_214] : memref<2x64x32xbf16, #tpu.memory_space<vmem>>, vector<1x64x32xbf16>
    %452 = vector.shape_cast %451 : vector<1x64x32xbf16> to vector<64x32xbf16>
    %cst_215 = arith.constant dense<0.000000e+00> : vector<8x32xf32>
    %453 = tpu.matmul %450, %452, %cst_215 {dimension_numbers = #tpu.dot_dimension_numbers<[1], [0], [0], [1], [0, 0, 1, 1], [], []>} : vector<8x64xbf16>, vector<64x32xbf16>, vector<8x32xf32> -> vector<8x32xf32>
    %c0_216 = arith.constant 0 : index
    %c0_217 = arith.constant 0 : index
    %c0_218 = arith.constant 0 : index
    %454 = vector.load %arg34[%c0_216, %c0_217, %c0_218] : memref<2x1x32xf32, #tpu.memory_space<vmem>>, vector<1x1x32xf32>
    %455 = vector.shape_cast %454 : vector<1x1x32xf32> to vector<1x32xf32>
    %456 = vector.broadcast %455 : vector<1x32xf32> to vector<8x32xf32>
    %457 = arith.addf %453, %456 : vector<8x32xf32>
    %458 = arith.addf %439, %457 : vector<8x32xf32>
    %c0_219 = arith.constant 0 : index
    %c0_220 = arith.constant 0 : index
    %c0_221 = arith.constant 0 : index
    %459 = vector.load %arg35[%c0_219, %c0_220, %c0_221] : memref<2x1x32xf32, #tpu.memory_space<vmem>>, vector<1x1x32xf32>
    %460 = vector.shape_cast %459 : vector<1x1x32xf32> to vector<1x32xf32>
    %c0_222 = arith.constant 0 : index
    %c0_223 = arith.constant 0 : index
    %c0_224 = arith.constant 0 : index
    %461 = vector.load %arg36[%c0_222, %c0_223, %c0_224] : memref<2x1x32xf32, #tpu.memory_space<vmem>>, vector<1x1x32xf32>
    %462 = vector.shape_cast %461 : vector<1x1x32xf32> to vector<1x32xf32>
    %cst_225 = arith.constant dense<0.000000e+00> : vector<8xf32>
    %463 = vector.multi_reduction <add>, %458, %cst_225 [1] : vector<8x32xf32> to vector<8xf32>
    %464 = vector.shape_cast %463 : vector<8xf32> to vector<8x1xf32>
    %cst_226 = arith.constant 3.200000e+01 : f32
    %465 = vector.broadcast %cst_226 : f32 to vector<8x1xf32>
    %466 = arith.divf %464, %465 : vector<8x1xf32>
    %467 = vector.broadcast %466 : vector<8x1xf32> to vector<8x32xf32>
    %468 = arith.subf %458, %467 : vector<8x32xf32>
    %469 = arith.mulf %468, %468 : vector<8x32xf32>
    %cst_227 = arith.constant dense<0.000000e+00> : vector<8xf32>
    %470 = vector.multi_reduction <add>, %469, %cst_227 [1] : vector<8x32xf32> to vector<8xf32>
    %471 = vector.shape_cast %470 : vector<8xf32> to vector<8x1xf32>
    %cst_228 = arith.constant 3.200000e+01 : f32
    %472 = vector.broadcast %cst_228 : f32 to vector<8x1xf32>
    %473 = arith.divf %471, %472 : vector<8x1xf32>
    %474 = vector.broadcast %466 : vector<8x1xf32> to vector<8x32xf32>
    %475 = arith.subf %458, %474 : vector<8x32xf32>
    %cst_229 = arith.constant 9.99999974E-6 : f32
    %476 = vector.broadcast %cst_229 : f32 to vector<8x1xf32>
    %477 = arith.addf %473, %476 : vector<8x1xf32>
    %478 = math.rsqrt %477 : vector<8x1xf32>
    %479 = vector.broadcast %478 : vector<8x1xf32> to vector<8x32xf32>
    %480 = arith.mulf %475, %479 : vector<8x32xf32>
    %481 = vector.broadcast %460 : vector<1x32xf32> to vector<8x32xf32>
    %482 = arith.mulf %480, %481 : vector<8x32xf32>
    %483 = vector.broadcast %462 : vector<1x32xf32> to vector<8x32xf32>
    %484 = arith.addf %482, %483 : vector<8x32xf32>
    %485 = arith.truncf %484 : vector<8x32xf32> to vector<8x32xbf16>
    %c1_230 = arith.constant 1 : index
    %c0_231 = arith.constant 0 : index
    %c0_232 = arith.constant 0 : index
    %c0_233 = arith.constant 0 : index
    %486 = vector.load %arg17[%c1_230, %c0_231, %c0_232, %c0_233] : memref<2x12x32x8xbf16, #tpu.memory_space<vmem>>, vector<1x12x32x8xbf16>
    %487 = vector.shape_cast %486 : vector<1x12x32x8xbf16> to vector<12x32x8xbf16>
    %c1_234 = arith.constant 1 : index
    %c0_235 = arith.constant 0 : index
    %c0_236 = arith.constant 0 : index
    %c0_237 = arith.constant 0 : index
    %488 = vector.load %arg18[%c1_234, %c0_235, %c0_236, %c0_237] : memref<2x12x1x8xf32, #tpu.memory_space<vmem>>, vector<1x12x1x8xf32>
    %489 = vector.shape_cast %488 : vector<1x12x1x8xf32> to vector<12x1x8xf32>
    %490 = vector.shape_cast %485 : vector<8x32xbf16> to vector<1x8x32xbf16>
    %491 = vector.shape_cast %490 : vector<1x8x32xbf16> to vector<1x8x32xbf16>
    %492 = vector.broadcast %491 : vector<1x8x32xbf16> to vector<12x8x32xbf16>
    %cst_238 = arith.constant dense<0.000000e+00> : vector<12x8x8xf32>
    %493 = tpu.matmul %492, %487, %cst_238 {dimension_numbers = #tpu.dot_dimension_numbers<[2], [1], [1], [2], [0, 0, 0, 1, 1, 2], [0], [0]>} : vector<12x8x32xbf16>, vector<12x32x8xbf16>, vector<12x8x8xf32> -> vector<12x8x8xf32>
    %494 = vector.broadcast %489 : vector<12x1x8xf32> to vector<12x8x8xf32>
    %495 = arith.addf %493, %494 : vector<12x8x8xf32>
    %496 = vector.extract_strided_slice %495 {offsets = [0, 0, 0], sizes = [4, 8, 8], strides = [1, 1, 1]} : vector<12x8x8xf32> to vector<4x8x8xf32>
    %497 = vector.extract_strided_slice %495 {offsets = [4, 0, 0], sizes = [4, 8, 8], strides = [1, 1, 1]} : vector<12x8x8xf32> to vector<4x8x8xf32>
    %498 = vector.extract_strided_slice %495 {offsets = [8, 0, 0], sizes = [4, 8, 8], strides = [1, 1, 1]} : vector<12x8x8xf32> to vector<4x8x8xf32>
    %c1_239 = arith.constant 1 : index
    %c0_240 = arith.constant 0 : index
    %c0_241 = arith.constant 0 : index
    %c0_242 = arith.constant 0 : index
    %499 = vector.load %arg19[%c1_239, %c0_240, %c0_241, %c0_242] : memref<2x4x8x32xbf16, #tpu.memory_space<vmem>>, vector<1x4x8x32xbf16>
    %500 = vector.shape_cast %499 : vector<1x4x8x32xbf16> to vector<4x8x32xbf16>
    %c1_243 = arith.constant 1 : index
    %c0_244 = arith.constant 0 : index
    %c0_245 = arith.constant 0 : index
    %501 = vector.load %arg20[%c1_243, %c0_244, %c0_245] : memref<2x1x32xf32, #tpu.memory_space<vmem>>, vector<1x1x32xf32>
    %502 = vector.shape_cast %501 : vector<1x1x32xf32> to vector<1x32xf32>
    %503 = arith.truncf %496 : vector<4x8x8xf32> to vector<4x8x8xbf16>
    %504 = arith.truncf %497 : vector<4x8x8xf32> to vector<4x8x8xbf16>
    %cst_246 = arith.constant dense<0.000000e+00> : vector<4x8x8xf32>
    %505 = tpu.matmul %503, %504, %cst_246 {dimension_numbers = #tpu.dot_dimension_numbers<[2], [2], [1], [1], [0, 0, 0, 1, 1, 1], [0], [0]>} : vector<4x8x8xbf16>, vector<4x8x8xbf16>, vector<4x8x8xf32> -> vector<4x8x8xf32>
    %cst_247 = arith.constant 0.353553385 : f32
    %506 = vector.broadcast %cst_247 : f32 to vector<4x8x8xf32>
    %507 = arith.mulf %505, %506 : vector<4x8x8xf32>
    %508 = vector.shape_cast %11 : vector<8x8xf32> to vector<1x8x8xf32>
    %509 = vector.broadcast %508 : vector<1x8x8xf32> to vector<4x8x8xf32>
    %510 = arith.addf %507, %509 : vector<4x8x8xf32>
    %cst_248 = arith.constant dense<0xFF800000> : vector<4x8xf32>
    %511 = vector.multi_reduction <maximumf>, %510, %cst_248 [2] : vector<4x8x8xf32> to vector<4x8xf32>
    %512 = vector.shape_cast %511 : vector<4x8xf32> to vector<4x8x1xf32>
    %513 = vector.broadcast %512 : vector<4x8x1xf32> to vector<4x8x8xf32>
    %514 = arith.subf %510, %513 : vector<4x8x8xf32>
    %515 = math.exp %514 : vector<4x8x8xf32>
    %cst_249 = arith.constant dense<0.000000e+00> : vector<4x8xf32>
    %516 = vector.multi_reduction <add>, %515, %cst_249 [2] : vector<4x8x8xf32> to vector<4x8xf32>
    %517 = vector.shape_cast %516 : vector<4x8xf32> to vector<4x8x1xf32>
    %518 = tpu.reciprocal %517 {approx = true} : vector<4x8x1xf32> -> vector<4x8x1xf32>
    %519 = vector.broadcast %518 : vector<4x8x1xf32> to vector<4x8x8xf32>
    %520 = arith.mulf %515, %519 : vector<4x8x8xf32>
    %521 = arith.truncf %520 : vector<4x8x8xf32> to vector<4x8x8xbf16>
    %522 = arith.truncf %498 : vector<4x8x8xf32> to vector<4x8x8xbf16>
    %cst_250 = arith.constant dense<0.000000e+00> : vector<4x8x8xf32>
    %523 = tpu.matmul %521, %522, %cst_250 {dimension_numbers = #tpu.dot_dimension_numbers<[2], [1], [1], [2], [0, 0, 0, 1, 1, 2], [0], [0]>} : vector<4x8x8xbf16>, vector<4x8x8xbf16>, vector<4x8x8xf32> -> vector<4x8x8xf32>
    %524 = arith.truncf %523 : vector<4x8x8xf32> to vector<4x8x8xbf16>
    %cst_251 = arith.constant dense<0.000000e+00> : vector<4x8x32xf32>
    %525 = tpu.matmul %524, %500, %cst_251 {dimension_numbers = #tpu.dot_dimension_numbers<[2], [1], [1], [2], [0, 0, 0, 1, 1, 2], [0], [0]>} : vector<4x8x8xbf16>, vector<4x8x32xbf16>, vector<4x8x32xf32> -> vector<4x8x32xf32>
    %526 = vector.extract_strided_slice %525 {offsets = [0, 0, 0], sizes = [1, 8, 32], strides = [1, 1, 1]} : vector<4x8x32xf32> to vector<1x8x32xf32>
    %527 = vector.shape_cast %526 : vector<1x8x32xf32> to vector<8x32xf32>
    %528 = vector.extract_strided_slice %525 {offsets = [1, 0, 0], sizes = [1, 8, 32], strides = [1, 1, 1]} : vector<4x8x32xf32> to vector<1x8x32xf32>
    %529 = vector.shape_cast %528 : vector<1x8x32xf32> to vector<8x32xf32>
    %530 = arith.addf %527, %529 : vector<8x32xf32>
    %531 = vector.extract_strided_slice %525 {offsets = [2, 0, 0], sizes = [1, 8, 32], strides = [1, 1, 1]} : vector<4x8x32xf32> to vector<1x8x32xf32>
    %532 = vector.shape_cast %531 : vector<1x8x32xf32> to vector<8x32xf32>
    %533 = arith.addf %530, %532 : vector<8x32xf32>
    %534 = vector.extract_strided_slice %525 {offsets = [3, 0, 0], sizes = [1, 8, 32], strides = [1, 1, 1]} : vector<4x8x32xf32> to vector<1x8x32xf32>
    %535 = vector.shape_cast %534 : vector<1x8x32xf32> to vector<8x32xf32>
    %536 = arith.addf %533, %535 : vector<8x32xf32>
    %537 = vector.broadcast %502 : vector<1x32xf32> to vector<8x32xf32>
    %538 = arith.addf %536, %537 : vector<8x32xf32>
    %539 = arith.addf %484, %538 : vector<8x32xf32>
    %c1_252 = arith.constant 1 : index
    %c0_253 = arith.constant 0 : index
    %c0_254 = arith.constant 0 : index
    %540 = vector.load %arg21[%c1_252, %c0_253, %c0_254] : memref<2x1x32xf32, #tpu.memory_space<vmem>>, vector<1x1x32xf32>
    %541 = vector.shape_cast %540 : vector<1x1x32xf32> to vector<1x32xf32>
    %c1_255 = arith.constant 1 : index
    %c0_256 = arith.constant 0 : index
    %c0_257 = arith.constant 0 : index
    %542 = vector.load %arg22[%c1_255, %c0_256, %c0_257] : memref<2x1x32xf32, #tpu.memory_space<vmem>>, vector<1x1x32xf32>
    %543 = vector.shape_cast %542 : vector<1x1x32xf32> to vector<1x32xf32>
    %cst_258 = arith.constant dense<0.000000e+00> : vector<8xf32>
    %544 = vector.multi_reduction <add>, %539, %cst_258 [1] : vector<8x32xf32> to vector<8xf32>
    %545 = vector.shape_cast %544 : vector<8xf32> to vector<8x1xf32>
    %cst_259 = arith.constant 3.200000e+01 : f32
    %546 = vector.broadcast %cst_259 : f32 to vector<8x1xf32>
    %547 = arith.divf %545, %546 : vector<8x1xf32>
    %548 = vector.broadcast %547 : vector<8x1xf32> to vector<8x32xf32>
    %549 = arith.subf %539, %548 : vector<8x32xf32>
    %550 = arith.mulf %549, %549 : vector<8x32xf32>
    %cst_260 = arith.constant dense<0.000000e+00> : vector<8xf32>
    %551 = vector.multi_reduction <add>, %550, %cst_260 [1] : vector<8x32xf32> to vector<8xf32>
    %552 = vector.shape_cast %551 : vector<8xf32> to vector<8x1xf32>
    %cst_261 = arith.constant 3.200000e+01 : f32
    %553 = vector.broadcast %cst_261 : f32 to vector<8x1xf32>
    %554 = arith.divf %552, %553 : vector<8x1xf32>
    %555 = vector.broadcast %547 : vector<8x1xf32> to vector<8x32xf32>
    %556 = arith.subf %539, %555 : vector<8x32xf32>
    %cst_262 = arith.constant 9.99999974E-6 : f32
    %557 = vector.broadcast %cst_262 : f32 to vector<8x1xf32>
    %558 = arith.addf %554, %557 : vector<8x1xf32>
    %559 = math.rsqrt %558 : vector<8x1xf32>
    %560 = vector.broadcast %559 : vector<8x1xf32> to vector<8x32xf32>
    %561 = arith.mulf %556, %560 : vector<8x32xf32>
    %562 = vector.broadcast %541 : vector<1x32xf32> to vector<8x32xf32>
    %563 = arith.mulf %561, %562 : vector<8x32xf32>
    %564 = vector.broadcast %543 : vector<1x32xf32> to vector<8x32xf32>
    %565 = arith.addf %563, %564 : vector<8x32xf32>
    %566 = arith.truncf %565 : vector<8x32xf32> to vector<8x32xbf16>
    %c1_263 = arith.constant 1 : index
    %c0_264 = arith.constant 0 : index
    %c0_265 = arith.constant 0 : index
    %c0_266 = arith.constant 0 : index
    %567 = vector.load %arg23[%c1_263, %c0_264, %c0_265, %c0_266] : memref<2x4x32x8xbf16, #tpu.memory_space<vmem>>, vector<1x4x32x8xbf16>
    %568 = vector.shape_cast %567 : vector<1x4x32x8xbf16> to vector<4x32x8xbf16>
    %c1_267 = arith.constant 1 : index
    %c0_268 = arith.constant 0 : index
    %c0_269 = arith.constant 0 : index
    %c0_270 = arith.constant 0 : index
    %569 = vector.load %arg24[%c1_267, %c0_268, %c0_269, %c0_270] : memref<2x4x1x8xf32, #tpu.memory_space<vmem>>, vector<1x4x1x8xf32>
    %570 = vector.shape_cast %569 : vector<1x4x1x8xf32> to vector<4x1x8xf32>
    %571 = vector.shape_cast %566 : vector<8x32xbf16> to vector<1x8x32xbf16>
    %572 = vector.shape_cast %571 : vector<1x8x32xbf16> to vector<1x8x32xbf16>
    %573 = vector.broadcast %572 : vector<1x8x32xbf16> to vector<4x8x32xbf16>
    %cst_271 = arith.constant dense<0.000000e+00> : vector<4x8x8xf32>
    %574 = tpu.matmul %573, %568, %cst_271 {dimension_numbers = #tpu.dot_dimension_numbers<[2], [1], [1], [2], [0, 0, 0, 1, 1, 2], [0], [0]>} : vector<4x8x32xbf16>, vector<4x32x8xbf16>, vector<4x8x8xf32> -> vector<4x8x8xf32>
    %575 = vector.broadcast %570 : vector<4x1x8xf32> to vector<4x8x8xf32>
    %576 = arith.addf %574, %575 : vector<4x8x8xf32>
    %c1_272 = arith.constant 1 : index
    %c0_273 = arith.constant 0 : index
    %c0_274 = arith.constant 0 : index
    %c0_275 = arith.constant 0 : index
    %577 = vector.load %arg25[%c1_272, %c0_273, %c0_274, %c0_275] : memref<2x8x32x8xbf16, #tpu.memory_space<vmem>>, vector<1x8x32x8xbf16>
    %578 = vector.shape_cast %577 : vector<1x8x32x8xbf16> to vector<8x32x8xbf16>
    %c1_276 = arith.constant 1 : index
    %c0_277 = arith.constant 0 : index
    %c0_278 = arith.constant 0 : index
    %c0_279 = arith.constant 0 : index
    %579 = vector.load %arg26[%c1_276, %c0_277, %c0_278, %c0_279] : memref<2x8x1x8xf32, #tpu.memory_space<vmem>>, vector<1x8x1x8xf32>
    %580 = vector.shape_cast %579 : vector<1x8x1x8xf32> to vector<8x1x8xf32>
    %581 = vector.shape_cast %266 : vector<8x32xbf16> to vector<1x8x32xbf16>
    %582 = vector.shape_cast %581 : vector<1x8x32xbf16> to vector<1x8x32xbf16>
    %583 = vector.broadcast %582 : vector<1x8x32xbf16> to vector<8x8x32xbf16>
    %cst_280 = arith.constant dense<0.000000e+00> : vector<8x8x8xf32>
    %584 = tpu.matmul %583, %578, %cst_280 {dimension_numbers = #tpu.dot_dimension_numbers<[2], [1], [1], [2], [0, 0, 0, 1, 1, 2], [0], [0]>} : vector<8x8x32xbf16>, vector<8x32x8xbf16>, vector<8x8x8xf32> -> vector<8x8x8xf32>
    %585 = vector.broadcast %580 : vector<8x1x8xf32> to vector<8x8x8xf32>
    %586 = arith.addf %584, %585 : vector<8x8x8xf32>
    %587 = vector.extract_strided_slice %586 {offsets = [0, 0, 0], sizes = [4, 8, 8], strides = [1, 1, 1]} : vector<8x8x8xf32> to vector<4x8x8xf32>
    %588 = vector.extract_strided_slice %586 {offsets = [4, 0, 0], sizes = [4, 8, 8], strides = [1, 1, 1]} : vector<8x8x8xf32> to vector<4x8x8xf32>
    %c1_281 = arith.constant 1 : index
    %c0_282 = arith.constant 0 : index
    %c0_283 = arith.constant 0 : index
    %c0_284 = arith.constant 0 : index
    %589 = vector.load %arg27[%c1_281, %c0_282, %c0_283, %c0_284] : memref<2x4x8x32xbf16, #tpu.memory_space<vmem>>, vector<1x4x8x32xbf16>
    %590 = vector.shape_cast %589 : vector<1x4x8x32xbf16> to vector<4x8x32xbf16>
    %c1_285 = arith.constant 1 : index
    %c0_286 = arith.constant 0 : index
    %c0_287 = arith.constant 0 : index
    %591 = vector.load %arg28[%c1_285, %c0_286, %c0_287] : memref<2x1x32xf32, #tpu.memory_space<vmem>>, vector<1x1x32xf32>
    %592 = vector.shape_cast %591 : vector<1x1x32xf32> to vector<1x32xf32>
    %593 = arith.truncf %576 : vector<4x8x8xf32> to vector<4x8x8xbf16>
    %594 = arith.truncf %587 : vector<4x8x8xf32> to vector<4x8x8xbf16>
    %cst_288 = arith.constant dense<0.000000e+00> : vector<4x8x8xf32>
    %595 = tpu.matmul %593, %594, %cst_288 {dimension_numbers = #tpu.dot_dimension_numbers<[2], [2], [1], [1], [0, 0, 0, 1, 1, 1], [0], [0]>} : vector<4x8x8xbf16>, vector<4x8x8xbf16>, vector<4x8x8xf32> -> vector<4x8x8xf32>
    %cst_289 = arith.constant 0.353553385 : f32
    %596 = vector.broadcast %cst_289 : f32 to vector<4x8x8xf32>
    %597 = arith.mulf %595, %596 : vector<4x8x8xf32>
    %598 = vector.shape_cast %1 : vector<1x8xf32> to vector<1x1x8xf32>
    %599 = vector.broadcast %598 : vector<1x1x8xf32> to vector<4x8x8xf32>
    %600 = arith.addf %597, %599 : vector<4x8x8xf32>
    %cst_290 = arith.constant dense<0xFF800000> : vector<4x8xf32>
    %601 = vector.multi_reduction <maximumf>, %600, %cst_290 [2] : vector<4x8x8xf32> to vector<4x8xf32>
    %602 = vector.shape_cast %601 : vector<4x8xf32> to vector<4x8x1xf32>
    %603 = vector.broadcast %602 : vector<4x8x1xf32> to vector<4x8x8xf32>
    %604 = arith.subf %600, %603 : vector<4x8x8xf32>
    %605 = math.exp %604 : vector<4x8x8xf32>
    %cst_291 = arith.constant dense<0.000000e+00> : vector<4x8xf32>
    %606 = vector.multi_reduction <add>, %605, %cst_291 [2] : vector<4x8x8xf32> to vector<4x8xf32>
    %607 = vector.shape_cast %606 : vector<4x8xf32> to vector<4x8x1xf32>
    %608 = tpu.reciprocal %607 {approx = true} : vector<4x8x1xf32> -> vector<4x8x1xf32>
    %609 = vector.broadcast %608 : vector<4x8x1xf32> to vector<4x8x8xf32>
    %610 = arith.mulf %605, %609 : vector<4x8x8xf32>
    %611 = arith.truncf %610 : vector<4x8x8xf32> to vector<4x8x8xbf16>
    %612 = arith.truncf %588 : vector<4x8x8xf32> to vector<4x8x8xbf16>
    %cst_292 = arith.constant dense<0.000000e+00> : vector<4x8x8xf32>
    %613 = tpu.matmul %611, %612, %cst_292 {dimension_numbers = #tpu.dot_dimension_numbers<[2], [1], [1], [2], [0, 0, 0, 1, 1, 2], [0], [0]>} : vector<4x8x8xbf16>, vector<4x8x8xbf16>, vector<4x8x8xf32> -> vector<4x8x8xf32>
    %614 = arith.truncf %613 : vector<4x8x8xf32> to vector<4x8x8xbf16>
    %cst_293 = arith.constant dense<0.000000e+00> : vector<4x8x32xf32>
    %615 = tpu.matmul %614, %590, %cst_293 {dimension_numbers = #tpu.dot_dimension_numbers<[2], [1], [1], [2], [0, 0, 0, 1, 1, 2], [0], [0]>} : vector<4x8x8xbf16>, vector<4x8x32xbf16>, vector<4x8x32xf32> -> vector<4x8x32xf32>
    %616 = vector.extract_strided_slice %615 {offsets = [0, 0, 0], sizes = [1, 8, 32], strides = [1, 1, 1]} : vector<4x8x32xf32> to vector<1x8x32xf32>
    %617 = vector.shape_cast %616 : vector<1x8x32xf32> to vector<8x32xf32>
    %618 = vector.extract_strided_slice %615 {offsets = [1, 0, 0], sizes = [1, 8, 32], strides = [1, 1, 1]} : vector<4x8x32xf32> to vector<1x8x32xf32>
    %619 = vector.shape_cast %618 : vector<1x8x32xf32> to vector<8x32xf32>
    %620 = arith.addf %617, %619 : vector<8x32xf32>
    %621 = vector.extract_strided_slice %615 {offsets = [2, 0, 0], sizes = [1, 8, 32], strides = [1, 1, 1]} : vector<4x8x32xf32> to vector<1x8x32xf32>
    %622 = vector.shape_cast %621 : vector<1x8x32xf32> to vector<8x32xf32>
    %623 = arith.addf %620, %622 : vector<8x32xf32>
    %624 = vector.extract_strided_slice %615 {offsets = [3, 0, 0], sizes = [1, 8, 32], strides = [1, 1, 1]} : vector<4x8x32xf32> to vector<1x8x32xf32>
    %625 = vector.shape_cast %624 : vector<1x8x32xf32> to vector<8x32xf32>
    %626 = arith.addf %623, %625 : vector<8x32xf32>
    %627 = vector.broadcast %592 : vector<1x32xf32> to vector<8x32xf32>
    %628 = arith.addf %626, %627 : vector<8x32xf32>
    %629 = arith.addf %565, %628 : vector<8x32xf32>
    %c1_294 = arith.constant 1 : index
    %c0_295 = arith.constant 0 : index
    %c0_296 = arith.constant 0 : index
    %630 = vector.load %arg29[%c1_294, %c0_295, %c0_296] : memref<2x1x32xf32, #tpu.memory_space<vmem>>, vector<1x1x32xf32>
    %631 = vector.shape_cast %630 : vector<1x1x32xf32> to vector<1x32xf32>
    %c1_297 = arith.constant 1 : index
    %c0_298 = arith.constant 0 : index
    %c0_299 = arith.constant 0 : index
    %632 = vector.load %arg30[%c1_297, %c0_298, %c0_299] : memref<2x1x32xf32, #tpu.memory_space<vmem>>, vector<1x1x32xf32>
    %633 = vector.shape_cast %632 : vector<1x1x32xf32> to vector<1x32xf32>
    %cst_300 = arith.constant dense<0.000000e+00> : vector<8xf32>
    %634 = vector.multi_reduction <add>, %629, %cst_300 [1] : vector<8x32xf32> to vector<8xf32>
    %635 = vector.shape_cast %634 : vector<8xf32> to vector<8x1xf32>
    %cst_301 = arith.constant 3.200000e+01 : f32
    %636 = vector.broadcast %cst_301 : f32 to vector<8x1xf32>
    %637 = arith.divf %635, %636 : vector<8x1xf32>
    %638 = vector.broadcast %637 : vector<8x1xf32> to vector<8x32xf32>
    %639 = arith.subf %629, %638 : vector<8x32xf32>
    %640 = arith.mulf %639, %639 : vector<8x32xf32>
    %cst_302 = arith.constant dense<0.000000e+00> : vector<8xf32>
    %641 = vector.multi_reduction <add>, %640, %cst_302 [1] : vector<8x32xf32> to vector<8xf32>
    %642 = vector.shape_cast %641 : vector<8xf32> to vector<8x1xf32>
    %cst_303 = arith.constant 3.200000e+01 : f32
    %643 = vector.broadcast %cst_303 : f32 to vector<8x1xf32>
    %644 = arith.divf %642, %643 : vector<8x1xf32>
    %645 = vector.broadcast %637 : vector<8x1xf32> to vector<8x32xf32>
    %646 = arith.subf %629, %645 : vector<8x32xf32>
    %cst_304 = arith.constant 9.99999974E-6 : f32
    %647 = vector.broadcast %cst_304 : f32 to vector<8x1xf32>
    %648 = arith.addf %644, %647 : vector<8x1xf32>
    %649 = math.rsqrt %648 : vector<8x1xf32>
    %650 = vector.broadcast %649 : vector<8x1xf32> to vector<8x32xf32>
    %651 = arith.mulf %646, %650 : vector<8x32xf32>
    %652 = vector.broadcast %631 : vector<1x32xf32> to vector<8x32xf32>
    %653 = arith.mulf %651, %652 : vector<8x32xf32>
    %654 = vector.broadcast %633 : vector<1x32xf32> to vector<8x32xf32>
    %655 = arith.addf %653, %654 : vector<8x32xf32>
    %656 = arith.truncf %655 : vector<8x32xf32> to vector<8x32xbf16>
    %c1_305 = arith.constant 1 : index
    %c0_306 = arith.constant 0 : index
    %c0_307 = arith.constant 0 : index
    %657 = vector.load %arg31[%c1_305, %c0_306, %c0_307] : memref<2x32x64xbf16, #tpu.memory_space<vmem>>, vector<1x32x64xbf16>
    %658 = vector.shape_cast %657 : vector<1x32x64xbf16> to vector<32x64xbf16>
    %cst_308 = arith.constant dense<0.000000e+00> : vector<8x64xf32>
    %659 = tpu.matmul %656, %658, %cst_308 {dimension_numbers = #tpu.dot_dimension_numbers<[1], [0], [0], [1], [0, 0, 1, 1], [], []>} : vector<8x32xbf16>, vector<32x64xbf16>, vector<8x64xf32> -> vector<8x64xf32>
    %c1_309 = arith.constant 1 : index
    %c0_310 = arith.constant 0 : index
    %c0_311 = arith.constant 0 : index
    %660 = vector.load %arg32[%c1_309, %c0_310, %c0_311] : memref<2x1x64xf32, #tpu.memory_space<vmem>>, vector<1x1x64xf32>
    %661 = vector.shape_cast %660 : vector<1x1x64xf32> to vector<1x64xf32>
    %662 = vector.broadcast %661 : vector<1x64xf32> to vector<8x64xf32>
    %663 = arith.addf %659, %662 : vector<8x64xf32>
    %cst_312 = arith.constant 0.000000e+00 : f32
    %664 = vector.broadcast %cst_312 : f32 to vector<8x64xf32>
    %665 = arith.maximumf %663, %664 : vector<8x64xf32>
    %666 = arith.truncf %665 : vector<8x64xf32> to vector<8x64xbf16>
    %c1_313 = arith.constant 1 : index
    %c0_314 = arith.constant 0 : index
    %c0_315 = arith.constant 0 : index
    %667 = vector.load %arg33[%c1_313, %c0_314, %c0_315] : memref<2x64x32xbf16, #tpu.memory_space<vmem>>, vector<1x64x32xbf16>
    %668 = vector.shape_cast %667 : vector<1x64x32xbf16> to vector<64x32xbf16>
    %cst_316 = arith.constant dense<0.000000e+00> : vector<8x32xf32>
    %669 = tpu.matmul %666, %668, %cst_316 {dimension_numbers = #tpu.dot_dimension_numbers<[1], [0], [0], [1], [0, 0, 1, 1], [], []>} : vector<8x64xbf16>, vector<64x32xbf16>, vector<8x32xf32> -> vector<8x32xf32>
    %c1_317 = arith.constant 1 : index
    %c0_318 = arith.constant 0 : index
    %c0_319 = arith.constant 0 : index
    %670 = vector.load %arg34[%c1_317, %c0_318, %c0_319] : memref<2x1x32xf32, #tpu.memory_space<vmem>>, vector<1x1x32xf32>
    %671 = vector.shape_cast %670 : vector<1x1x32xf32> to vector<1x32xf32>
    %672 = vector.broadcast %671 : vector<1x32xf32> to vector<8x32xf32>
    %673 = arith.addf %669, %672 : vector<8x32xf32>
    %674 = arith.addf %655, %673 : vector<8x32xf32>
    %c1_320 = arith.constant 1 : index
    %c0_321 = arith.constant 0 : index
    %c0_322 = arith.constant 0 : index
    %675 = vector.load %arg35[%c1_320, %c0_321, %c0_322] : memref<2x1x32xf32, #tpu.memory_space<vmem>>, vector<1x1x32xf32>
    %676 = vector.shape_cast %675 : vector<1x1x32xf32> to vector<1x32xf32>
    %c1_323 = arith.constant 1 : index
    %c0_324 = arith.constant 0 : index
    %c0_325 = arith.constant 0 : index
    %677 = vector.load %arg36[%c1_323, %c0_324, %c0_325] : memref<2x1x32xf32, #tpu.memory_space<vmem>>, vector<1x1x32xf32>
    %678 = vector.shape_cast %677 : vector<1x1x32xf32> to vector<1x32xf32>
    %cst_326 = arith.constant dense<0.000000e+00> : vector<8xf32>
    %679 = vector.multi_reduction <add>, %674, %cst_326 [1] : vector<8x32xf32> to vector<8xf32>
    %680 = vector.shape_cast %679 : vector<8xf32> to vector<8x1xf32>
    %cst_327 = arith.constant 3.200000e+01 : f32
    %681 = vector.broadcast %cst_327 : f32 to vector<8x1xf32>
    %682 = arith.divf %680, %681 : vector<8x1xf32>
    %683 = vector.broadcast %682 : vector<8x1xf32> to vector<8x32xf32>
    %684 = arith.subf %674, %683 : vector<8x32xf32>
    %685 = arith.mulf %684, %684 : vector<8x32xf32>
    %cst_328 = arith.constant dense<0.000000e+00> : vector<8xf32>
    %686 = vector.multi_reduction <add>, %685, %cst_328 [1] : vector<8x32xf32> to vector<8xf32>
    %687 = vector.shape_cast %686 : vector<8xf32> to vector<8x1xf32>
    %cst_329 = arith.constant 3.200000e+01 : f32
    %688 = vector.broadcast %cst_329 : f32 to vector<8x1xf32>
    %689 = arith.divf %687, %688 : vector<8x1xf32>
    %690 = vector.broadcast %682 : vector<8x1xf32> to vector<8x32xf32>
    %691 = arith.subf %674, %690 : vector<8x32xf32>
    %cst_330 = arith.constant 9.99999974E-6 : f32
    %692 = vector.broadcast %cst_330 : f32 to vector<8x1xf32>
    %693 = arith.addf %689, %692 : vector<8x1xf32>
    %694 = math.rsqrt %693 : vector<8x1xf32>
    %695 = vector.broadcast %694 : vector<8x1xf32> to vector<8x32xf32>
    %696 = arith.mulf %691, %695 : vector<8x32xf32>
    %697 = vector.broadcast %676 : vector<1x32xf32> to vector<8x32xf32>
    %698 = arith.mulf %696, %697 : vector<8x32xf32>
    %699 = vector.broadcast %678 : vector<1x32xf32> to vector<8x32xf32>
    %700 = arith.addf %698, %699 : vector<8x32xf32>
    %701 = arith.truncf %700 : vector<8x32xf32> to vector<8x32xbf16>
    %c0_331 = arith.constant 0 : index
    %c0_332 = arith.constant 0 : index
    %702 = vector.load %arg37[%c0_331, %c0_332] : memref<32x128xbf16, #tpu.memory_space<vmem>>, vector<32x128xbf16>
    %cst_333 = arith.constant dense<0.000000e+00> : vector<8x128xf32>
    %703 = tpu.matmul %701, %702, %cst_333 {dimension_numbers = #tpu.dot_dimension_numbers<[1], [0], [0], [1], [0, 0, 1, 1], [], []>} : vector<8x32xbf16>, vector<32x128xbf16>, vector<8x128xf32> -> vector<8x128xf32>
    %c0_334 = arith.constant 0 : index
    %c0_335 = arith.constant 0 : index
    %704 = vector.load %arg38[%c0_334, %c0_335] : memref<1x128xf32, #tpu.memory_space<vmem>>, vector<1x128xf32>
    %705 = vector.broadcast %704 : vector<1x128xf32> to vector<8x128xf32>
    %706 = arith.addf %703, %705 : vector<8x128xf32>
    %c0_336 = arith.constant 0 : index
    %c0_337 = arith.constant 0 : index
    %c0_338 = arith.constant 0 : index
    %707 = vector.load %arg39[%c0_336, %c0_337, %c0_338] : memref<1x8x128xf32, #tpu.memory_space<vmem>>, vector<1x8x128xf32>
    %708 = vector.shape_cast %707 : vector<1x8x128xf32> to vector<8x128xf32>
    %709 = vector.shape_cast %706 : vector<8x128xf32> to vector<1x8x128xf32>
    tpu.vector_store %arg39[%c0_336, %c0_337, %c0_338], %709 {strides = array<i32>} : memref<1x8x128xf32, #tpu.memory_space<vmem>>, vector<1x8x128xf32>,
    %cst_339 = arith.constant 0.000000e+00 : f32
    %710 = vector.broadcast %cst_339 : f32 to vector<4x8x120xf32>
    %711 = tpu.concatenate %610, %710 in 2 : vector<4x8x8xf32>, vector<4x8x120xf32> -> vector<4x8x128xf32>
    %c0_340 = arith.constant 0 : index
    %c0_341 = arith.constant 0 : index
    %c0_342 = arith.constant 0 : index
    %c0_343 = arith.constant 0 : index
    %712 = vector.load %arg40[%c0_340, %c0_341, %c0_342, %c0_343] : memref<1x4x8x128xf32, #tpu.memory_space<vmem>>, vector<1x4x8x128xf32>
    %713 = vector.shape_cast %712 : vector<1x4x8x128xf32> to vector<4x8x128xf32>
    %714 = vector.shape_cast %711 : vector<4x8x128xf32> to vector<1x4x8x128xf32>
    tpu.vector_store %arg40[%c0_340, %c0_341, %c0_342, %c0_343], %714 {strides = array<i32>} : memref<1x4x8x128xf32, #tpu.memory_space<vmem>>, vector<1x4x8x128xf32>,
    return
  }
  func.func @transform_0(%arg0: i32) -> (i32, i32, i32) {
    %c0_i32 = arith.constant 0 : i32
    %c0_i32_0 = arith.constant 0 : i32
    %c0_i32_1 = arith.constant 0 : i32
    return %arg0, %c0_i32, %c0_i32_0 : i32, i32, i32
  }
  func.func @transform_1(%arg0: i32) -> (i32, i32, i32) {
    %c0_i32 = arith.constant 0 : i32
    %c0_i32_0 = arith.constant 0 : i32
    %c0_i32_1 = arith.constant 0 : i32
    return %arg0, %c0_i32, %c0_i32_0 : i32, i32, i32
  }
  func.func @transform_2(%arg0: i32) -> (i32, i32, i32) {
    %c0_i32 = arith.constant 0 : i32
    %c0_i32_0 = arith.constant 0 : i32
    %c0_i32_1 = arith.constant 0 : i32
    return %arg0, %c0_i32, %c0_i32_0 : i32, i32, i32
  }
  func.func @transform_3(%arg0: i32) -> (i32, i32, i32) {
    %c0_i32 = arith.constant 0 : i32
    %c0_i32_0 = arith.constant 0 : i32
    %c0_i32_1 = arith.constant 0 : i32
    return %arg0, %c0_i32, %c0_i32_0 : i32, i32, i32
  }
  func.func @transform_4(%arg0: i32) -> (i32, i32, i32, i32) {
    %c0_i32 = arith.constant 0 : i32
    %c0_i32_0 = arith.constant 0 : i32
    %c0_i32_1 = arith.constant 0 : i32
    %c0_i32_2 = arith.constant 0 : i32
    %c0_i32_3 = arith.constant 0 : i32
    return %c0_i32, %c0_i32_0, %c0_i32_1, %c0_i32_2 : i32, i32, i32, i32
  }
  func.func @transform_5(%arg0: i32) -> (i32, i32, i32, i32) {
    %c0_i32 = arith.constant 0 : i32
    %c0_i32_0 = arith.constant 0 : i32
    %c0_i32_1 = arith.constant 0 : i32
    %c0_i32_2 = arith.constant 0 : i32
    %c0_i32_3 = arith.constant 0 : i32
    return %c0_i32, %c0_i32_0, %c0_i32_1, %c0_i32_2 : i32, i32, i32, i32
  }
  func.func @transform_6(%arg0: i32) -> (i32, i32, i32, i32) {
    %c0_i32 = arith.constant 0 : i32
    %c0_i32_0 = arith.constant 0 : i32
    %c0_i32_1 = arith.constant 0 : i32
    %c0_i32_2 = arith.constant 0 : i32
    %c0_i32_3 = arith.constant 0 : i32
    return %c0_i32, %c0_i32_0, %c0_i32_1, %c0_i32_2 : i32, i32, i32, i32
  }
  func.func @transform_7(%arg0: i32) -> (i32, i32, i32) {
    %c0_i32 = arith.constant 0 : i32
    %c0_i32_0 = arith.constant 0 : i32
    %c0_i32_1 = arith.constant 0 : i32
    %c0_i32_2 = arith.constant 0 : i32
    return %c0_i32, %c0_i32_0, %c0_i32_1 : i32, i32, i32
  }
  func.func @transform_8(%arg0: i32) -> (i32, i32, i32) {
    %c0_i32 = arith.constant 0 : i32
    %c0_i32_0 = arith.constant 0 : i32
    %c0_i32_1 = arith.constant 0 : i32
    %c0_i32_2 = arith.constant 0 : i32
    return %c0_i32, %c0_i32_0, %c0_i32_1 : i32, i32, i32
  }
  func.func @transform_9(%arg0: i32) -> (i32, i32, i32) {
    %c0_i32 = arith.constant 0 : i32
    %c0_i32_0 = arith.constant 0 : i32
    %c0_i32_1 = arith.constant 0 : i32
    %c0_i32_2 = arith.constant 0 : i32
    return %c0_i32, %c0_i32_0, %c0_i32_1 : i32, i32, i32
  }
  func.func @transform_10(%arg0: i32) -> (i32, i32, i32) {
    %c0_i32 = arith.constant 0 : i32
    %c0_i32_0 = arith.constant 0 : i32
    %c0_i32_1 = arith.constant 0 : i32
    %c0_i32_2 = arith.constant 0 : i32
    return %c0_i32, %c0_i32_0, %c0_i32_1 : i32, i32, i32
  }
  func.func @transform_11(%arg0: i32) -> (i32, i32, i32) {
    %c0_i32 = arith.constant 0 : i32
    %c0_i32_0 = arith.constant 0 : i32
    %c0_i32_1 = arith.constant 0 : i32
    %c0_i32_2 = arith.constant 0 : i32
    return %c0_i32, %c0_i32_0, %c0_i32_1 : i32, i32, i32
  }
  func.func @transform_12(%arg0: i32) -> (i32, i32, i32) {
    %c0_i32 = arith.constant 0 : i32
    %c0_i32_0 = arith.constant 0 : i32
    %c0_i32_1 = arith.constant 0 : i32
    %c0_i32_2 = arith.constant 0 : i32
    return %c0_i32, %c0_i32_0, %c0_i32_1 : i32, i32, i32
  }
  func.func @transform_13(%arg0: i32) -> (i32, i32, i32) {
    %c0_i32 = arith.constant 0 : i32
    %c0_i32_0 = arith.constant 0 : i32
    %c0_i32_1 = arith.constant 0 : i32
    %c0_i32_2 = arith.constant 0 : i32
    return %c0_i32, %c0_i32_0, %c0_i32_1 : i32, i32, i32
  }
  func.func @transform_14(%arg0: i32) -> (i32, i32, i32) {
    %c0_i32 = arith.constant 0 : i32
    %c0_i32_0 = arith.constant 0 : i32
    %c0_i32_1 = arith.constant 0 : i32
    %c0_i32_2 = arith.constant 0 : i32
    return %c0_i32, %c0_i32_0, %c0_i32_1 : i32, i32, i32
  }
  func.func @transform_15(%arg0: i32) -> (i32, i32, i32) {
    %c0_i32 = arith.constant 0 : i32
    %c0_i32_0 = arith.constant 0 : i32
    %c0_i32_1 = arith.constant 0 : i32
    %c0_i32_2 = arith.constant 0 : i32
    return %c0_i32, %c0_i32_0, %c0_i32_1 : i32, i32, i32
  }
  func.func @transform_16(%arg0: i32) -> (i32, i32, i32, i32) {
    %c0_i32 = arith.constant 0 : i32
    %c0_i32_0 = arith.constant 0 : i32
    %c0_i32_1 = arith.constant 0 : i32
    %c0_i32_2 = arith.constant 0 : i32
    %c0_i32_3 = arith.constant 0 : i32
    return %c0_i32, %c0_i32_0, %c0_i32_1, %c0_i32_2 : i32, i32, i32, i32
  }
  func.func @transform_17(%arg0: i32) -> (i32, i32, i32, i32) {
    %c0_i32 = arith.constant 0 : i32
    %c0_i32_0 = arith.constant 0 : i32
    %c0_i32_1 = arith.constant 0 : i32
    %c0_i32_2 = arith.constant 0 : i32
    %c0_i32_3 = arith.constant 0 : i32
    return %c0_i32, %c0_i32_0, %c0_i32_1, %c0_i32_2 : i32, i32, i32, i32
  }
  func.func @transform_18(%arg0: i32) -> (i32, i32, i32, i32) {
    %c0_i32 = arith.constant 0 : i32
    %c0_i32_0 = arith.constant 0 : i32
    %c0_i32_1 = arith.constant 0 : i32
    %c0_i32_2 = arith.constant 0 : i32
    %c0_i32_3 = arith.constant 0 : i32
    return %c0_i32, %c0_i32_0, %c0_i32_1, %c0_i32_2 : i32, i32, i32, i32
  }
  func.func @transform_19(%arg0: i32) -> (i32, i32, i32) {
    %c0_i32 = arith.constant 0 : i32
    %c0_i32_0 = arith.constant 0 : i32
    %c0_i32_1 = arith.constant 0 : i32
    %c0_i32_2 = arith.constant 0 : i32
    return %c0_i32, %c0_i32_0, %c0_i32_1 : i32, i32, i32
  }
  func.func @transform_20(%arg0: i32) -> (i32, i32, i32) {
    %c0_i32 = arith.constant 0 : i32
    %c0_i32_0 = arith.constant 0 : i32
    %c0_i32_1 = arith.constant 0 : i32
    %c0_i32_2 = arith.constant 0 : i32
    return %c0_i32, %c0_i32_0, %c0_i32_1 : i32, i32, i32
  }
  func.func @transform_21(%arg0: i32) -> (i32, i32, i32) {
    %c0_i32 = arith.constant 0 : i32
    %c0_i32_0 = arith.constant 0 : i32
    %c0_i32_1 = arith.constant 0 : i32
    %c0_i32_2 = arith.constant 0 : i32
    return %c0_i32, %c0_i32_0, %c0_i32_1 : i32, i32, i32
  }
  func.func @transform_22(%arg0: i32) -> (i32, i32, i32, i32) {
    %c0_i32 = arith.constant 0 : i32
    %c0_i32_0 = arith.constant 0 : i32
    %c0_i32_1 = arith.constant 0 : i32
    %c0_i32_2 = arith.constant 0 : i32
    %c0_i32_3 = arith.constant 0 : i32
    return %c0_i32, %c0_i32_0, %c0_i32_1, %c0_i32_2 : i32, i32, i32, i32
  }
  func.func @transform_23(%arg0: i32) -> (i32, i32, i32, i32) {
    %c0_i32 = arith.constant 0 : i32
    %c0_i32_0 = arith.constant 0 : i32
    %c0_i32_1 = arith.constant 0 : i32
    %c0_i32_2 = arith.constant 0 : i32
    %c0_i32_3 = arith.constant 0 : i32
    return %c0_i32, %c0_i32_0, %c0_i32_1, %c0_i32_2 : i32, i32, i32, i32
  }
  func.func @transform_24(%arg0: i32) -> (i32, i32, i32, i32) {
    %c0_i32 = arith.constant 0 : i32
    %c0_i32_0 = arith.constant 0 : i32
    %c0_i32_1 = arith.constant 0 : i32
    %c0_i32_2 = arith.constant 0 : i32
    %c0_i32_3 = arith.constant 0 : i32
    return %c0_i32, %c0_i32_0, %c0_i32_1, %c0_i32_2 : i32, i32, i32, i32
  }
  func.func @transform_25(%arg0: i32) -> (i32, i32, i32, i32) {
    %c0_i32 = arith.constant 0 : i32
    %c0_i32_0 = arith.constant 0 : i32
    %c0_i32_1 = arith.constant 0 : i32
    %c0_i32_2 = arith.constant 0 : i32
    %c0_i32_3 = arith.constant 0 : i32
    return %c0_i32, %c0_i32_0, %c0_i32_1, %c0_i32_2 : i32, i32, i32, i32
  }
  func.func @transform_26(%arg0: i32) -> (i32, i32, i32, i32) {
    %c0_i32 = arith.constant 0 : i32
    %c0_i32_0 = arith.constant 0 : i32
    %c0_i32_1 = arith.constant 0 : i32
    %c0_i32_2 = arith.constant 0 : i32
    %c0_i32_3 = arith.constant 0 : i32
    return %c0_i32, %c0_i32_0, %c0_i32_1, %c0_i32_2 : i32, i32, i32, i32
  }
  func.func @transform_27(%arg0: i32) -> (i32, i32, i32) {
    %c0_i32 = arith.constant 0 : i32
    %c0_i32_0 = arith.constant 0 : i32
    %c0_i32_1 = arith.constant 0 : i32
    %c0_i32_2 = arith.constant 0 : i32
    return %c0_i32, %c0_i32_0, %c0_i32_1 : i32, i32, i32
  }
  func.func @transform_28(%arg0: i32) -> (i32, i32, i32) {
    %c0_i32 = arith.constant 0 : i32
    %c0_i32_0 = arith.constant 0 : i32
    %c0_i32_1 = arith.constant 0 : i32
    %c0_i32_2 = arith.constant 0 : i32
    return %c0_i32, %c0_i32_0, %c0_i32_1 : i32, i32, i32
  }
  func.func @transform_29(%arg0: i32) -> (i32, i32, i32) {
    %c0_i32 = arith.constant 0 : i32
    %c0_i32_0 = arith.constant 0 : i32
    %c0_i32_1 = arith.constant 0 : i32
    %c0_i32_2 = arith.constant 0 : i32
    return %c0_i32, %c0_i32_0, %c0_i32_1 : i32, i32, i32
  }
  func.func @transform_30(%arg0: i32) -> (i32, i32, i32) {
    %c0_i32 = arith.constant 0 : i32
    %c0_i32_0 = arith.constant 0 : i32
    %c0_i32_1 = arith.constant 0 : i32
    %c0_i32_2 = arith.constant 0 : i32
    return %c0_i32, %c0_i32_0, %c0_i32_1 : i32, i32, i32
  }
  func.func @transform_31(%arg0: i32) -> (i32, i32, i32) {
    %c0_i32 = arith.constant 0 : i32
    %c0_i32_0 = arith.constant 0 : i32
    %c0_i32_1 = arith.constant 0 : i32
    %c0_i32_2 = arith.constant 0 : i32
    return %c0_i32, %c0_i32_0, %c0_i32_1 : i32, i32, i32
  }
  func.func @transform_32(%arg0: i32) -> (i32, i32, i32) {
    %c0_i32 = arith.constant 0 : i32
    %c0_i32_0 = arith.constant 0 : i32
    %c0_i32_1 = arith.constant 0 : i32
    %c0_i32_2 = arith.constant 0 : i32
    return %c0_i32, %c0_i32_0, %c0_i32_1 : i32, i32, i32
  }
  func.func @transform_33(%arg0: i32) -> (i32, i32, i32) {
    %c0_i32 = arith.constant 0 : i32
    %c0_i32_0 = arith.constant 0 : i32
    %c0_i32_1 = arith.constant 0 : i32
    %c0_i32_2 = arith.constant 0 : i32
    return %c0_i32, %c0_i32_0, %c0_i32_1 : i32, i32, i32
  }
  func.func @transform_34(%arg0: i32) -> (i32, i32, i32) {
    %c0_i32 = arith.constant 0 : i32
    %c0_i32_0 = arith.constant 0 : i32
    %c0_i32_1 = arith.constant 0 : i32
    %c0_i32_2 = arith.constant 0 : i32
    return %c0_i32, %c0_i32_0, %c0_i32_1 : i32, i32, i32
  }
  func.func @transform_35(%arg0: i32) -> (i32, i32, i32) {
    %c0_i32 = arith.constant 0 : i32
    %c0_i32_0 = arith.constant 0 : i32
    %c0_i32_1 = arith.constant 0 : i32
    %c0_i32_2 = arith.constant 0 : i32
    return %c0_i32, %c0_i32_0, %c0_i32_1 : i32, i32, i32
  }
  func.func @transform_36(%arg0: i32) -> (i32, i32) {
    %c0_i32 = arith.constant 0 : i32
    %c0_i32_0 = arith.constant 0 : i32
    %c0_i32_1 = arith.constant 0 : i32
    return %c0_i32, %c0_i32_0 : i32, i32
  }
  func.func @transform_37(%arg0: i32) -> (i32, i32) {
    %c0_i32 = arith.constant 0 : i32
    %c0_i32_0 = arith.constant 0 : i32
    %c0_i32_1 = arith.constant 0 : i32
    return %c0_i32, %c0_i32_0 : i32, i32
  }
  func.func @transform_38(%arg0: i32) -> (i32, i32, i32) {
    %c0_i32 = arith.constant 0 : i32
    %c0_i32_0 = arith.constant 0 : i32
    %c0_i32_1 = arith.constant 0 : i32
    return %arg0, %c0_i32, %c0_i32_0 : i32, i32, i32
  }
  func.func @transform_39(%arg0: i32) -> (i32, i32, i32, i32) {
    %c0_i32 = arith.constant 0 : i32
    %c0_i32_0 = arith.constant 0 : i32
    %c0_i32_1 = arith.constant 0 : i32
    %c0_i32_2 = arith.constant 0 : i32
    return %arg0, %c0_i32, %c0_i32_0, %c0_i32_1 : i32, i32, i32, i32
  }
}

</mosaic_0001>

<bundles_post_ra>
// kernel: seq2seq_transformer_forward.1
= control target key start
LH: loop header
LB: loop body
LE: loop exit
PB: predicated region body
PF: predicated region fallthrough
CT: control target
= control target key end

     0   :  { %s8174_s6 = smov 1   ;;  %s8175_s10 = smov 2   ;;  %s9256_s0 = inlined_call_operand.smem [shape: u32[40], index: -1, kind: input, shape index: {}] }
   0x1   :  { %s8225_s5 = sld [smem:[%s9256_s0]]   ;;  %s8176_s14 = smov 3  }
   0x2   :  { %s8230_s9 = sld [smem:[%s9256_s0 + %s8174_s6]]   ;;  %s8177_s18 = smov 4  }
   0x3   :  { %s8235_s13 = sld [smem:[%s9256_s0 + %s8175_s10]]   ;;  %s8178_s22 = smov 5  }
   0x4   :  { %s8240_s17 = sld [smem:[%s9256_s0 + %s8176_s14]]   ;;  %s8179_s26 = smov 6  }
   0x5   :  { %s8245_s21 = sld [smem:[%s9256_s0 + %s8177_s18]]   ;;  %s8180_s30 = smov 7  }
   0x6   :  { %s8250_s25 = sld [smem:[%s9256_s0 + %s8178_s22]]   ;;  %s8181_s4 = smov 8  }
   0x7   :  { %9309 = sst [smem:[#allocation8_spill]] %s8225_s5  ;;  %s8182_s10 = smov 9  }
   0x8   :  { %9310 = sst [smem:[#allocation9_spill]] %s8230_s9  ;;  %s8183_s15 = smov 10  }
   0x9   :  { %9311 = sst [smem:[#allocation10_spill]] %s8235_s13  ;;  %s8184_s20 = smov 11  }
   0xa   :  { %9312 = sst [smem:[#allocation11_spill]] %s8240_s17  ;;  %s8186_s1 = smov 13  }
   0xb   :  { %9313 = sst [smem:[#allocation12_spill]] %s8245_s21  ;;  %s8187_s7 = smov 14  }
   0xc   :  { %9314 = sst [smem:[#allocation13_spill]] %s8250_s25  ;;  %s8189_s22 = smov 16  }
   0xd   :  { %s8255_s29 = sld [smem:[%s9256_s0 + %s8179_s26]]   ;;  %s8185_s26 = smov 12  }
   0xe   :  { %s8260_s3 = sld [smem:[%s9256_s0 + %s8180_s30]]   ;;  %s8190_s28 = smov 17  }
   0xf   :  { %s8265_s8 = sld [smem:[%s9256_s0 + %s8181_s4]]  }
  0x10   :  { %s8270_s14 = sld [smem:[%s9256_s0 + %s8182_s10]]  }
  0x11   :  { %s8275_s19 = sld [smem:[%s9256_s0 + %s8183_s15]]   ;;  %s8188_s15 = smov 15  }
  0x12   :  { %s8280_s24 = sld [smem:[%s9256_s0 + %s8184_s20]]  }
  0x13   :  { %9315 = sst [smem:[#allocation14_spill]] %s8255_s29 }
  0x14   :  { %9316 = sst [smem:[#allocation15_spill]] %s8260_s3 }
  0x15   :  { %9317 = sst [smem:[#allocation16_spill]] %s8265_s8 }
  0x16   :  { %9318 = sst [smem:[#allocation17_spill]] %s8270_s14 }
  0x17   :  { %9319 = sst [smem:[#allocation18_spill]] %s8275_s19 }
  0x18   :  { %9320 = sst [smem:[#allocation19_spill]] %s8280_s24 }
  0x19   :  { %s8285_s30 = sld [smem:[%s9256_s0 + %s8185_s26]]  }
  0x1a   :  { %s8290_s6 = sld [smem:[%s9256_s0 + %s8186_s1]]  }
  0x1b   :  { %s8295_s12 = sld [smem:[%s9256_s0 + %s8187_s7]]   ;;  %s8191_s7 = smov 18  }
  0x1c   :  { %s8300_s20 = sld [smem:[%s9256_s0 + %s8188_s15]]   ;;  %s8192_s15 = smov 19  }
  0x1d   :  { %s8305_s27 = sld [smem:[%s9256_s0 + %s8189_s22]]   ;;  %s8193_s22 = smov 20  }
  0x1e   :  { %s8310_s4 = sld [smem:[%s9256_s0 + %s8190_s28]]   ;;  %s8194_s28 = smov 21  }
  0x1f   :  { %9321 = sst [smem:[#allocation20_spill]] %s8285_s30 }
  0x20   :  { %9322 = sst [smem:[#allocation21_spill]] %s8290_s6 }
  0x21   :  { %9323 = sst [smem:[#allocation22_spill]] %s8295_s12 }
  0x22   :  { %9324 = sst [smem:[#allocation23_spill]] %s8300_s20 }
  0x23   :  { %9325 = sst [smem:[#allocation24_spill]] %s8305_s27 }
  0x24   :  { %9326 = sst [smem:[#allocation25_spill]] %s8310_s4 }
  0x25   :  { %s8315_s17 = sld [smem:[%s9256_s0 + %s8191_s7]]   ;;  %s8195_s7 = smov 22  }
  0x26   :  { %s8320_s9 = sld [smem:[%s9256_s0 + %s8192_s15]]   ;;  %s8196_s15 = smov 23  }
  0x27   :  { %s8325_s27 = sld [smem:[%s9256_s0 + %s8193_s22]]   ;;  %s8197_s22 = smov 24  }
  0x28   :  { %s8330_s4 = sld [smem:[%s9256_s0 + %s8194_s28]]   ;;  %s8198_s28 = smov 25  }
  0x2b   :  { %9327 = sst [smem:[#allocation26_spill]] %s8315_s17 }
  0x2c   :  { %9328 = sst [smem:[#allocation27_spill]] %s8320_s9 }
  0x2d   :  { %9329 = sst [smem:[#allocation28_spill]] %s8325_s27 }
  0x2e   :  { %9330 = sst [smem:[#allocation29_spill]] %s8330_s4 }
  0x2f   :  { %s8335_s17 = sld [smem:[%s9256_s0 + %s8195_s7]]   ;;  %s8199_s7 = smov 26  }
  0x30   :  { %s8340_s9 = sld [smem:[%s9256_s0 + %s8196_s15]]   ;;  %s8200_s15 = smov 27  }
  0x31   :  { %s8345_s27 = sld [smem:[%s9256_s0 + %s8197_s22]]   ;;  %s8201_s22 = smov 28  }
  0x32   :  { %s8350_s4 = sld [smem:[%s9256_s0 + %s8198_s28]]   ;;  %s8202_s28 = smov 29  }
  0x35   :  { %9331 = sst [smem:[#allocation30_spill]] %s8335_s17 }
  0x36   :  { %9332 = sst [smem:[#allocation31_spill]] %s8340_s9 }
  0x37   :  { %9333 = sst [smem:[#allocation32_spill]] %s8345_s27 }
  0x38   :  { %9334 = sst [smem:[#allocation33_spill]] %s8350_s4 }
  0x39   :  { %s8355_s17 = sld [smem:[%s9256_s0 + %s8199_s7]]   ;;  %s8203_s7 = smov 30  }
  0x3a   :  { %s8360_s9 = sld [smem:[%s9256_s0 + %s8200_s15]]   ;;  %s8204_s15 = smov 31  }
  0x3b   :  { %s8365_s27 = sld [smem:[%s9256_s0 + %s8201_s22]]   ;;  %s8205_s22 = smov 32  }
  0x3c   :  { %s8370_s4 = sld [smem:[%s9256_s0 + %s8202_s28]]   ;;  %s8206_s28 = smov 33  }
  0x3f   :  { %9335 = sst [smem:[#allocation34_spill]] %s8355_s17 }
  0x40   :  { %9336 = sst [smem:[#allocation35_spill]] %s8360_s9 }
  0x41   :  { %9337 = sst [smem:[#allocation36_spill]] %s8365_s27 }
  0x42   :  { %9338 = sst [smem:[#allocation37_spill]] %s8370_s4 }
  0x43   :  { %s8375_s17 = sld [smem:[%s9256_s0 + %s8203_s7]]   ;;  %s8207_s7 = smov 34  }
  0x44   :  { %s8380_s9 = sld [smem:[%s9256_s0 + %s8204_s15]]   ;;  %s8208_s15 = smov 35  }
  0x45   :  { %s8385_s27 = sld [smem:[%s9256_s0 + %s8205_s22]]   ;;  %s8209_s22 = smov 36  }
  0x46   :  { %s8390_s4 = sld [smem:[%s9256_s0 + %s8206_s28]]   ;;  %s8210_s28 = smov 37  }
  0x49   :  { %9339 = sst [smem:[#allocation38_spill]] %s8375_s17 }
  0x4a   :  { %9340 = sst [smem:[#allocation39_spill]] %s8380_s9 }
  0x4b   :  { %9341 = sst [smem:[#allocation40_spill]] %s8385_s27 }
  0x4c   :  { %9342 = sst [smem:[#allocation41_spill]] %s8390_s4 }
  0x4d   :  { %s8395_s17 = sld [smem:[%s9256_s0 + %s8207_s7]]   ;;  %s8211_s7 = smov 38  }
  0x4e   :  { %s8400_s9 = sld [smem:[%s9256_s0 + %s8208_s15]]   ;;  %s8212_s15 = smov 39  }
  0x4f   :  { %s8405_s27 = sld [smem:[%s9256_s0 + %s8209_s22]]  }
  0x50   :  { %s8410_s4 = sld [smem:[%s9256_s0 + %s8210_s28]]  }
  0x53   :  { %9343 = sst [smem:[#allocation42_spill]] %s8395_s17 }
  0x54   :  { %9344 = sst [smem:[#allocation43_spill]] %s8400_s9 }
  0x55   :  { %s8415_s17 = sld [smem:[%s9256_s0 + %s8211_s7]]  }
  0x56   :  { %s8420_s9 = sld [smem:[%s9256_s0 + %s8212_s15]]  }
  0x5c   :  { %9345 = sst [smem:[#allocation44_spill]] %s8420_s9 }
  0x5d   :  { %85 = vsyncpa [#allocation3], 0 }
  0x5e   :  { %87 = vsyncpa [#allocation3 + $0x1], 0 }
  0x5f   :  { %88 = vsyncpa [#allocation5], 0 }
  0x60   :  { %90 = vsyncpa [#allocation5 + $0x1], 0  ;;  %s8422_s22 = smov 0   ;;  %s8424_s23 = smov 0  }
  0x61   :  { %s8426_s26 = smov 0   ;;  %s8428_s28 = smov 0  }
  0x62 LB: > { %s9346_s9 = sld [smem:[#allocation44_spill]]  ;;  %s8443_s0 = sadd.s32 4294967295, %s8172_s28   ;;  %s8160_s22 = sphi %s8422_s22, %s9395_s22   ;;  %s8172_s28 = sphi %s8428_s28, %s9392_s28   ;;  %s8168_s26 = sphi %s8426_s26, %s9394_s26   ;;  %s8164_s23 = sphi %s8424_s23, %s9396_s23  }
  0x63   : > { %s9347_s30 = sld [smem:[#allocation20_spill]]  ;;  %s6510_s1 = sadd.s32 4294967294, %s8172_s28  }
  0x64   : > { %s9348_s29 = sld [smem:[#allocation14_spill]]  ;;  %s8447_s2 = sadd.s32 1, %s8172_s28  }
  0x65   : > { %s9349_s25 = sld [smem:[#allocation13_spill]]  ;;  %s921_s7 = sadd.s32 1, %s8168_s26 }
  0x66   : > { %s9350_s24 = sld [smem:[#allocation19_spill]]  ;;  %s918_s10 = ssub.s32 %s8172_s28, %s8447_s2 }
  0x67   : > { %s9351_s21 = sld [smem:[#allocation12_spill]]  ;;  %p931_p0 = scmp.ne.s32.totalorder %s8168_s26, %s8164_s23 }
  0x68   : > { %s9352_s20 = sld [smem:[#allocation23_spill]]  ;;  %p919_p1 = scmp.eq.s32.totalorder %s918_s10, 0 }
  0x69   : > { %s9353_s19 = sld [smem:[#allocation18_spill]]  ;;  %p932_p2 = scmp.eq.s32.totalorder %s8443_s0, 1 }
  0x6a   : > { %s9354_s12 = sld [smem:[#allocation22_spill]]  ;;  %p937_p3 = scmp.ne.s32.totalorder %s8164_s23, %s8160_s22 }
  0x6b   : > { %s9355_s14 = sld [smem:[#allocation17_spill]]  ;;  %p938_p4 = scmp.eq.s32.totalorder %s6510_s1, 1 }
  0x6c   : > { %s9356_s8 = sld [smem:[#allocation16_spill]]  ;;  %p8460_p5 = por %p932_p2, %p931_p0 }
  0x6d   : > { %s9357_s6 = sld [smem:[#allocation21_spill]]  ;;  %p8464_p6 = por %p938_p4, %p937_p3 }
  0x6e   : > { %s9358_s3 = sld [smem:[#allocation15_spill]]  ;;  %p6513_p7 = scmp.ge.s32.totalorder %s8172_s28, 1 }
  0x6f   : > { %9359 = sst [smem:[#allocation45_spill]] %s8168_s26  ;;  %p1110_p8 = scmp.lt.s32.totalorder %s8172_s28, 3 }
  0x70   : > { %9360 = sst [smem:[#allocation46_spill]] %s8447_s2 }
  0x71   : > { %s8458_s11 = scalar_select %p919_p1, %s8168_s26, %s921_s7  }
  0x72   : > { %s9363_s16 = scalar_select %p8464_p6, 1, 0 }
  0x73   : > { %9361 = sst [smem:[#allocation47_spill]] %s8458_s11  ;;  %p1111_p9 = pnand %p6513_p7, %p1110_p8 }
  0x74   : > { %9364 = sst [smem:[#allocation48_spill]] %s9363_s16  ;;  %p1220_p10 = scmp.lt.s32.totalorder (!%p1111_p9), %s8443_s0, 1 }
  0x75   : > { %1114 = sbr.rel (%p1111_p9) target bundleno = 8619 (0x21ab), region = 172  ;;  %s9365_s13 = sld [smem:[#allocation10_spill]] (!%p1111_p9) }
  0x76   : > { %s9366_s5 = sld [smem:[#allocation8_spill]] (!%p1111_p9) }
  0x77   : > { %s9387_s11 = sld [smem:[#allocation41_spill]] (!%p1111_p9) }
  0x78   : > { %s9388_s26 = sld [smem:[#allocation42_spill]] (!%p1111_p9) }
  0x79   : > { %s9390_s16 = sld [smem:[#allocation43_spill]] (!%p1111_p9) }
  0x7a   : > { %v7592_v0 = vld [vmem:[%s9351_s21 + $0x8] sm:$0xff]  ;;  %v7594_v1 = vld [vmem:[%s9351_s21 + $0x18] sm:$0xff]  ;;  %v7591_v4 = vld [vmem:[%s9351_s21] sm:$0xff]  ;;  %s8478_s18 = scalar_select %p1220_p10, %s8443_s0, 1  ;;  %vm1357_vm0 = vcmask 261120   ;;  %vm1662_vm1 = vcmask 64512  }
  0x7b   : > { %v7596_v2 = vld [vmem:[%s9351_s21 + $0x28] sm:$0xff]  ;;  %v7598_v3 = vld [vmem:[%s9351_s21 + $0x38] sm:$0xff]  ;;  %1367 = vmatpush.bf16.msra.mxu0 %v7592_v0  ;;  %1392 = vmatpush.bf16.msra.mxu1 %v7594_v1  ;;  %v7593_v5 = vld [vmem:[%s9351_s21 + $0x10] sm:$0xff]  ;;  %vm1805_vm2 = vcmask 1043456   ;;  %vm2081_vm7 = vcmask 523264  }
  0x7c   : > { %1417 = vmatpush.bf16.msra.mxu2 %v7596_v2  ;;  %1442 = vmatpush.bf16.msra.mxu3 %v7598_v3  ;;  %v7595_v6 = vld [vmem:[%s9351_s21 + $0x20] sm:$0xff]  ;;  %v7597_v7 = vld [vmem:[%s9351_s21 + $0x30] sm:$0xff]  ;;  %s9278_s1 = sshll.u32 %s8478_s18, 3  ;;  %s8485_s7 = scalar_lea.vmem %s9365_s13, %s8478_s18  ;;  %v7600_v8 = vld [vmem:[%s9351_s21 + $0x48] sm:$0xff] }
  0x7d   : > { %v7602_v9 = vld [vmem:[%s9351_s21 + $0x58] sm:$0xff]  ;;  %s1223_s10 = scalar_lea.vmem %s9366_s5, %s9278_s1  ;;  %v7604_v10 = vld [vmem:[%s9351_s21 + $0x68] sm:$0xff]  ;;  %v7599_v13 = vld [vmem:[%s9351_s21 + $0x40] sm:$0xff]  ;;  %s9368_s1 = sld [smem:[#allocation24_spill]] }
  0x7e   : > { %v7606_v11 = vld [vmem:[%s9351_s21 + $0x78] sm:$0xff]  ;;  %v8494_v12 = vld [vmem:[%s1223_s10] sm:$0xff]  ;;  %v7601_v14 = vld [vmem:[%s9351_s21 + $0x50] sm:$0xff]  ;;  %s9367_s10 = sld [smem:[#allocation9_spill]]  ;;  %s9369_s5 = sshll.u32 %s8478_s18, 3 }
  0x7f   : > { %1368 = vmatpush.bf16.msra.mxu0 %v7591_v4  ;;  %1393 = vmatpush.bf16.msra.mxu1 %v7593_v5  ;;  %v1248_v15 = vpack.c.bf16 %v8494_v12, %v8494_v12  ;;  %v7603_v16 = vld [vmem:[%s9351_s21 + $0x60] sm:$0xff]  ;;  %v7605_v17 = vld [vmem:[%s9351_s21 + $0x70] sm:$0xff]  ;;  %v7612_v18 = vld [vmem:[%s9351_s21 + $0xa8] sm:$0xff]  ;;  %s9389_s2 = smov %s9388_s26 }
  0x80   : > { %1418 = vmatpush.bf16.msra.mxu2 %v7595_v6  ;;  %1443 = vmatpush.bf16.msra.mxu3 %v7597_v7  ;;  %v7608_v19 = vld [vmem:[%s9351_s21 + $0x88] sm:$0xff]  ;;  %v7610_v20 = vld [vmem:[%s9351_s21 + $0x98] sm:$0xff]  ;;  %v7611_v21 = vld [vmem:[%s9351_s21 + $0xa0] sm:$0xff] }
  0x81   : > { %v7607_v22 = vld [vmem:[%s9351_s21 + $0x80] sm:$0xff]  ;;  %v7609_v23 = vld [vmem:[%s9351_s21 + $0x90] sm:$0xff]  ;;  %v7614_v24 = vld [vmem:[%s9351_s21 + $0xb8] sm:$0xff] }
  0x82   : > { %6526 = vmatmul.msk.bf16.vlgmr.msra.gmra.mxu0 %vm1357_vm0, %v1248_v15  ;;  %6535 = vmatmul.msk.bf16.vlgmr.msra.gmra.mxu1 %vm1357_vm0, %v1248_v15  ;;  %v7613_v25 = vld [vmem:[%s9351_s21 + $0xb0] sm:$0xff]  ;;  %v7854_v32 = vld [vmem:[%s9349_s25 + $0x4] ss:$0 sm:$0xff]  ;;  %v7855_v33 = vld [vmem:[%s9349_s25 + $0x5] ss:$0 sm:$0xff] }
  0x83   : > { %1467 = vmatpush.bf16.msrb.mxu0 %v7600_v8  ;;  %1492 = vmatpush.bf16.msrb.mxu1 %v7602_v9  ;;  %v7851_v40 = vld [vmem:[%s9349_s25 + $0x1] ss:$0 sm:$0xff]  ;;  %v7850_v43 = vld [vmem:[%s9349_s25] ss:$0 sm:$0xff]  ;;  %v7856_v44 = vld [vmem:[%s9349_s25 + $0x6] ss:$0 sm:$0xff] }
  0x84   : > { %6544 = vmatmul.msk.bf16.vlgmr.msra.gmra.mxu2 %vm1357_vm0, %v1248_v15  ;;  %6553 = vmatmul.msk.bf16.vlgmr.msra.gmra.mxu3 %vm1357_vm0, %v1248_v15  ;;  %v7857_v45 = vld [vmem:[%s9349_s25 + $0x7] ss:$0 sm:$0xff]  ;;  %v7852_v57 = vld [vmem:[%s9349_s25 + $0x2] ss:$0 sm:$0xff]  ;;  %v7853_v58 = vld [vmem:[%s9349_s25 + $0x3] ss:$0 sm:$0xff]  ;;  %s1227_s13 = scalar_lea.vmem %s9367_s10, %s9369_s5 }
  0x85   : > { %1517 = vmatpush.bf16.msrb.mxu2 %v7604_v10  ;;  %1542 = vmatpush.bf16.msrb.mxu3 %v7606_v11  ;;  %v7858_v6 = vld [vmem:[%s9349_s25 + $0x8] ss:$0 sm:$0xff]  ;;  %v7859_v7 = vld [vmem:[%s9349_s25 + $0x9] ss:$0 sm:$0xff]  ;;  %s9370_s5 = sld [smem:[#allocation25_spill]] }
  0x87   : > { %1468 = vmatpush.bf16.msrb.mxu0 %v7599_v13  ;;  %1493 = vmatpush.bf16.msrb.mxu1 %v7601_v14  ;;  %v7860_v13 = vld [vmem:[%s9349_s25 + $0xa] ss:$0 sm:$0xff] }
  0x89   : > { %1518 = vmatpush.bf16.msrb.mxu2 %v7603_v16  ;;  %1543 = vmatpush.bf16.msrb.mxu3 %v7605_v17 }
  0x8b   : > { %1567 = vmatpush.bf16.msra.mxu0 %v7608_v19  ;;  %1592 = vmatpush.bf16.msra.mxu1 %v7610_v20 }
  0x8d   : > { %1617 = vmatpush.bf16.msra.mxu2 %v7612_v18  ;;  %1642 = vmatpush.bf16.msra.mxu3 %v7614_v24  ;;  %v7861_v24 = vld [vmem:[%s9349_s25 + $0xb] ss:$0 sm:$0xff] }
  0x8f   : > { %1568 = vmatpush.bf16.msra.mxu0 %v7607_v22  ;;  %1593 = vmatpush.bf16.msra.mxu1 %v7609_v23 }
  0x91   : > { %1618 = vmatpush.bf16.msra.mxu2 %v7611_v21  ;;  %1643 = vmatpush.bf16.msra.mxu3 %v7613_v25 }
  0x92   : > { %6562 = vmatmul.msk.bf16.vlgmr.msrb.gmra.mxu0 %vm1357_vm0, %v1248_v15  ;;  %6571 = vmatmul.msk.bf16.vlgmr.msrb.gmra.mxu1 %vm1357_vm0, %v1248_v15 }
  0x94   : > { %6580 = vmatmul.msk.bf16.vlgmr.msrb.gmra.mxu2 %vm1357_vm0, %v1248_v15  ;;  %6589 = vmatmul.msk.bf16.vlgmr.msrb.gmra.mxu3 %vm1357_vm0, %v1248_v15 }
  0xa2   : > { %6598 = vmatmul.msk.bf16.vlgmr.msra.gmra.mxu0 %vm1357_vm0, %v1248_v15  ;;  %6607 = vmatmul.msk.bf16.vlgmr.msra.gmra.mxu1 %vm1357_vm0, %v1248_v15 }
  0xa4   : > { %6616 = vmatmul.msk.bf16.vlgmr.msra.gmra.mxu2 %vm1357_vm0, %v1248_v15  ;;  %6625 = vmatmul.msk.bf16.vlgmr.msra.gmra.mxu3 %vm1357_vm0, %v1248_v15 }
  0xff   : > { %v1370_v26 = vpop.f32.mrf.mxu0  ;;  %v1395_v27 = vpop.f32.mrf.mxu1 }
 0x100   : > { %v1396_v48 = vadd.f32 %v7851_v40, %v1395_v27  ;;  %v1371_v51 = vadd.f32 %v7850_v43, %v1370_v26 }
 0x102   : > { %v1655_v56 = vpack.c.bf16 %v1396_v48, %v1396_v48  ;;  %v1654_v61 = vpack.c.bf16 %v1371_v51, %v1371_v51 }
 0x107   : > { %v1420_v28 = vpop.f32.mrf.mxu2  ;;  %v1445_v29 = vpop.f32.mrf.mxu3 }
 0x108   : > { %v1372_v30 = vpop.f32.mrf.mxu0  ;;  %v1397_v31 = vpop.f32.mrf.mxu1  ;;  %v1421_v0 = vadd.f32 %v7852_v57, %v1420_v28  ;;  %v1446_v1 = vadd.f32 %v7853_v58, %v1445_v29 }
 0x109   : > { %v8547_v31 = vld [vmem:[%s8485_s7] ss:$0 sm:$0xff] }
 0x10a   : > { %v1656_v4 = vpack.c.bf16 %v1421_v0, %v1421_v0  ;;  %v1657_v5 = vpack.c.bf16 %v1446_v1, %v1446_v1 }
 0x10f   : > { %v1422_v34 = vpop.f32.mrf.mxu2  ;;  %v1447_v35 = vpop.f32.mrf.mxu3 }
 0x110   : > { %v1470_v36 = vpop.f32.mrf.mxu0  ;;  %v1495_v37 = vpop.f32.mrf.mxu1 }
 0x111   : > { %v1471_v38 = vadd.f32 %v7854_v32, %v1470_v36  ;;  %v1496_v39 = vadd.f32 %v7855_v33, %v1495_v37 }
 0x113   : > { %v1658_v41 = vpack.c.bf16 %v1471_v38, %v1471_v38  ;;  %v1659_v42 = vpack.c.bf16 %v1496_v39, %v1496_v39 }
 0x115   : > { %v1667_v46 = vsel %vm1662_vm1, %v1658_v41, 0  ;;  %v1686_v47 = vsel %vm1662_vm1, %v1659_v42, 0 }
 0x116   : > { %1676 = vmatpush.bf16.xpose.msrb.mxu0 %v1667_v46  ;;  %1695 = vmatpush.bf16.xpose.msrb.mxu1 %v1686_v47 }
 0x117   : > { %v1520_v49 = vpop.f32.mrf.mxu2  ;;  %v1545_v50 = vpop.f32.mrf.mxu3 }
 0x118   : > { %v1521_v52 = vadd.f32 %v7856_v44, %v1520_v49  ;;  %v1546_v53 = vadd.f32 %v7857_v45, %v1545_v50  ;;  %v1472_v54 = vpop.f32.mrf.mxu0  ;;  %v1497_v55 = vpop.f32.mrf.mxu1 }
 0x11a   : > { %v1660_v59 = vpack.c.bf16 %v1521_v52, %v1521_v52  ;;  %v1661_v60 = vpack.c.bf16 %v1546_v53, %v1546_v53 }
 0x11c   : > { %v1705_v62 = vsel %vm1662_vm1, %v1660_v59, 0  ;;  %v1724_v63 = vsel %vm1662_vm1, %v1661_v60, 0 }
 0x11d   : > { %1714 = vmatpush.bf16.xpose.msrb.mxu2 %v1705_v62  ;;  %1733 = vmatpush.bf16.xpose.msrb.mxu3 %v1724_v63 }
 0x11e   : > { %6626 = vmatmul.msk.bf16.vlgmr.msrb.gmra.mxu0 %vm1662_vm1, %v1654_v61  ;;  %6627 = vmatmul.msk.bf16.vlgmr.msrb.gmra.mxu1 %vm1662_vm1, %v1655_v56 }
 0x11f   : > { %v1522_v2 = vpop.f32.mrf.mxu2  ;;  %v1547_v3 = vpop.f32.mrf.mxu3 }
 0x120   : > { %v1570_v8 = vpop.f32.mrf.mxu0  ;;  %v1595_v9 = vpop.f32.mrf.mxu1 }
 0x121   : > { %v1571_v10 = vadd.f32 %v7858_v6, %v1570_v8  ;;  %v1596_v11 = vadd.f32 %v7859_v7, %v1595_v9 }
 0x123   : > { %v1798_v14 = vpack.c.bf16 %v1571_v10, %v1571_v10  ;;  %v1799_v15 = vpack.c.bf16 %v1596_v11, %v1596_v11 }
 0x124   : > { %6628 = vmatmul.msk.bf16.vlgmr.msrb.gmra.mxu2 %vm1662_vm1, %v1656_v4  ;;  %6629 = vmatmul.msk.bf16.vlgmr.msrb.gmra.mxu3 %vm1662_vm1, %v1657_v5 }
 0x125   : > { %v1807_v17 = vsel %vm1805_vm2, %v1798_v14, 0  ;;  %v1826_v18 = vsel %vm1805_vm2, %v1799_v15, 0 }
 0x126   : > { %1816 = vmatpush.bf16.msra.mxu0 %v1807_v17  ;;  %1835 = vmatpush.bf16.msra.mxu1 %v1826_v18 }
 0x127   : > { %v1620_v16 = vpop.f32.mrf.mxu2  ;;  %v1645_v26 = vpop.f32.mrf.mxu3 }
 0x128   : > { %v1621_v19 = vadd.f32 %v7860_v13, %v1620_v16  ;;  %v1572_v21 = vpop.f32.mrf.mxu0  ;;  %v1597_v22 = vpop.f32.mrf.mxu1  ;;  %v1646_v27 = vadd.f32 %v7861_v24, %v1645_v26 }
 0x12a   : > { %v1800_v20 = vpack.c.bf16 %v1621_v19, %v1621_v19  ;;  %v1801_v28 = vpack.c.bf16 %v1646_v27, %v1646_v27  ;;  %v1650_v27 = vld [vmem:[%s9348_s29 + $0x4] sm:$0xf] }
 0x12c   : > { %v1845_v23 = vsel %vm1805_vm2, %v1800_v20, 0  ;;  %v1864_v29 = vsel %vm1805_vm2, %v1801_v28, 0  ;;  %v1906_v28 = vsel %vm1805_vm2, %v1650_v27, 0 }
 0x12d   : > { %1854 = vmatpush.bf16.msra.mxu2 %v1845_v23  ;;  %1873 = vmatpush.bf16.msra.mxu3 %v1864_v29  ;;  %v1651_v29 = vld [vmem:[%s9348_s29 + $0x8] sm:$0xf] }
 0x12e   : > { %1915 = vmatpush.bf16.msrb.mxu1 %v1906_v28 }
 0x12f   : > { %v1622_v25 = vpop.f32.mrf.mxu2  ;;  %v1647_v30 = vpop.f32.mrf.mxu3 }
 0x130   : > { %v1649_v25 = vld [vmem:[%s9348_s29] sm:$0xf]  ;;  %v1925_v30 = vsel %vm1805_vm2, %v1651_v29, 0  ;;  %v7618_v29 = vld [vmem:[%s9347_s30 + $0x8] sm:$0xff] }
 0x131   : > { %v1887_v26 = vsel %vm1805_vm2, %v1649_v25, 0  ;;  %1934 = vmatpush.bf16.msrb.mxu2 %v1925_v30  ;;  %v7617_v30 = vld [vmem:[%s9347_s30] sm:$0xff] }
 0x132   : > { %1896 = vmatpush.bf16.msrb.mxu0 %v1887_v26 }
 0x19b   : > { %v1678_v32 = vpop.f32.mrf.mxu0  ;;  %v1697_v33 = vpop.f32.mrf.mxu1 }
 0x19c   : > { %v1739_v34 = vmul.f32 0.35355338, %v1678_v32  ;;  %v1740_v36 = vmul.f32 0.35355338, %v1697_v33  ;;  %v1652_v32 = vld [vmem:[%s9348_s29 + $0xc] sm:$0xf] }
 0x19d   : > { %v1944_v33 = vsel %vm1805_vm2, %v1652_v32, 0  ;;  %v7865_v32 = vld [vmem:[%s9350_s24] ss:$0 sm:$0xff] }
 0x19e   : > { %v1746_v35 = vadd.f32 %v8547_v31, %v1739_v34  ;;  %v1747_v40 = vadd.f32 %v8547_v31, %v1740_v36  ;;  %1953 = vmatpush.bf16.msrb.mxu3 %v1944_v33 }
 0x1a0   : > { %v1750_v37 = vsel %vm1662_vm1, %v1746_v35, -inf  ;;  %v1753_v44 = vsel %vm1662_vm1, %v1747_v40, -inf }
 0x1a1   : > { %1751 = vmax.xlane.f32.xlu1 %v1750_v37 }
 0x1a3   : > { %v1680_v38 = vpop.f32.mrf.mxu0  ;;  %v1699_v39 = vpop.f32.mrf.mxu1 }
 0x1a7   : > { %v1716_v41 = vpop.f32.mrf.mxu2  ;;  %v1735_v42 = vpop.f32.mrf.mxu3 }
 0x1a8   : > { %v1741_v43 = vmul.f32 0.35355338, %v1716_v41  ;;  %v1742_v46 = vmul.f32 0.35355338, %v1735_v42 }
 0x1a9   : > { %1754 = vmax.xlane.f32.xlu1 %v1753_v44 }
 0x1aa   : > { %v1748_v45 = vadd.f32 %v8547_v31, %v1741_v43  ;;  %v1749_v50 = vadd.f32 %v8547_v31, %v1742_v46 }
 0x1ac   : > { %v1756_v47 = vsel %vm1662_vm1, %v1748_v45, -inf  ;;  %v1759_v51 = vsel %vm1662_vm1, %v1749_v50, -inf }
 0x1ad   : > { %1757 = vmax.xlane.f32.xlu0 %v1756_v47 }
 0x1af   : > { %v1718_v48 = vpop.f32.mrf.mxu2  ;;  %v1737_v49 = vpop.f32.mrf.mxu3 }
 0x1b5   : > { %1760 = vmax.xlane.f32.xlu0 %v1759_v51 }
 0x214   : > { %v1752_v52 = vpop.xlane.xlu1 %1751 }
 0x215   : > { %v1762_v53 = vsub.f32 %v1746_v35, %v1752_v52 }
 0x217   : > { %v1766_v54 = vmul.f32 1.442695, %v1762_v53  ;;  %v7862_v53 = vld [vmem:[%s9358_s3] ss:$0 sm:$0xff] }
 0x219   : > { %7958 = vpow2.f32 %v1766_v54 }
 0x21c   : > { %v1755_v55 = vpop.xlane.xlu1 %1754 }
 0x21d   : > { %v1763_v56 = vsub.f32 %v1747_v40, %v1755_v55 }
 0x21f   : > { %v7959_v57 = vpop.eup %7958  ;;  %v1768_v58 = vmul.f32 1.442695, %v1763_v56 }
 0x220   : > { %v1758_v59 = vpop.xlane.xlu0 %1757  ;;  %v1774_v60 = vsel %vm1662_vm1, %v7959_v57, 0.0 }
 0x221   : > { %7960 = vpow2.f32 %v1768_v58  ;;  %v1764_v61 = vsub.f32 %v1748_v45, %v1758_v59  ;;  %1775 = vadd.xlane.f32.xlu0 %v1774_v60 }
 0x223   : > { %v1770_v62 = vmul.f32 1.442695, %v1764_v61  ;;  %v8213_v61 = vmov 32.0  }
 0x225   : > { %7962 = vpow2.f32 %v1770_v62 }
 0x227   : > { %v7961_v63 = vpop.eup %7960 }
 0x228   : > { %v1761_v0 = vpop.xlane.xlu0 %1760  ;;  %v1777_v1 = vsel %vm1662_vm1, %v7961_v63, 0.0 }
 0x229   : > { %v1765_v2 = vsub.f32 %v1749_v50, %v1761_v0  ;;  %1778 = vadd.xlane.f32.xlu1 %v1777_v1 }
 0x22b   : > { %v7963_v3 = vpop.eup %7962  ;;  %v1772_v4 = vmul.f32 1.442695, %v1765_v2 }
 0x22c   : > { %v1780_v5 = vsel %vm1662_vm1, %v7963_v3, 0.0 }
 0x22d   : > { %7964 = vpow2.f32 %v1772_v4  ;;  %1781 = vadd.xlane.f32.xlu2 %v1780_v5 }
 0x233   : > { %v7965_v6 = vpop.eup %7964 }
 0x234   : > { %v1783_v7 = vsel %vm1662_vm1, %v7965_v6, 0.0 }
 0x235   : > { %1784 = vadd.xlane.f32.xlu2 %v1783_v7 }
 0x294   : > { %v1776_v8 = vpop.xlane.xlu0 %1775 }
 0x295   : > { %7966 = vrcp.f32 %v1776_v8  ;;  %v7616_v8 = vld [vmem:[%s9353_s19 + $0x8] sm:$0xff] }
 0x29b   : > { %v7967_v9 = vpop.eup %7966 }
 0x29c   : > { %v1790_v10 = vmul.f32 %v7967_v9, %v7959_v57  ;;  %v1779_v11 = vpop.xlane.xlu1 %1778  ;;  %v7615_v9 = vld [vmem:[%s9353_s19] sm:$0xff] }
 0x29d   : > { %7968 = vrcp.f32 %v1779_v11 }
 0x29e   : > { %v1794_v13 = vpack.c.bf16 %v1790_v10, %v1790_v10  ;;  %v7620_v10 = vld [vmem:[%s9347_s30 + $0x18] sm:$0xff] }
 0x2a0   : > { %v1782_v14 = vpop.xlane.xlu2 %1781  ;;  %6630 = vmatmul.msk.bf16.vlgmr.msra.gmra.mxu0 %vm1662_vm1, %v1794_v13 }
 0x2a1   : > { %7970 = vrcp.f32 %v1782_v14  ;;  %2036 = vmatpush.bf16.msra.mxu0 %v7616_v8  ;;  %v7619_v14 = vld [vmem:[%s9347_s30 + $0x10] sm:$0xff] }
 0x2a3   : > { %v7969_v15 = vpop.eup %7968 }
 0x2a4   : > { %v1791_v16 = vmul.f32 %v7969_v15, %v7961_v63 }
 0x2a5   : > { %2037 = vmatpush.bf16.msra.mxu0 %v7615_v9 }
 0x2a6   : > { %v1795_v17 = vpack.c.bf16 %v1791_v16, %v1791_v16 }
 0x2a7   : > { %v7971_v18 = vpop.eup %7970 }
 0x2a8   : > { %v1792_v19 = vmul.f32 %v7971_v18, %v7963_v3  ;;  %v1785_v20 = vpop.xlane.xlu2 %1784  ;;  %6631 = vmatmul.msk.bf16.vlgmr.msra.gmra.mxu1 %vm1662_vm1, %v1795_v17 }
 0x2a9   : > { %7972 = vrcp.f32 %v1785_v20  ;;  %2089 = vmatpush.bf16.msra.mxu1 %v7620_v10  ;;  %v7867_v10 = vld [vmem:[%s9354_s12] ss:$0 sm:$0xff] }
 0x2aa   : > { %v1796_v21 = vpack.c.bf16 %v1792_v19, %v1792_v19  ;;  %7974 = vrcp.f32 %v8213_v61 }
 0x2ac   : > { %6632 = vmatmul.msk.bf16.vlgmr.msra.gmra.mxu2 %vm1662_vm1, %v1796_v21 }
 0x2ad   : > { %2090 = vmatpush.bf16.msra.mxu1 %v7619_v14 }
 0x2af   : > { %v7973_v22 = vpop.eup %7972 }
 0x2b0   : > { %v1793_v23 = vmul.f32 %v7973_v22, %v7965_v6  ;;  %v7975_v62 = vpop.eup %7974  ;;  %v7863_v22 = vld [vmem:[%s9356_s8] ss:$0 sm:$0xff] }
 0x2b1   : > { %v1973_v63 = vmul.f32 32.0, %v7975_v62  ;;  %vm1977_vm3 = vweird.f32 %v7975_v62  ;;  %2091 = vmatpush.bf16.msra.mxu1 %v7618_v29 }
 0x2b2   : > { %v1797_v24 = vpack.c.bf16 %v1793_v23, %v1793_v23 }
 0x2b3   : > { %v1974_v0 = vsub.f32 1.0, %v1973_v63  ;;  %v7629_v63 = vld [vmem:[%s9351_s21 + $0x100] sm:$0xff] }
 0x2b4   : > { %6633 = vmatmul.msk.bf16.vlgmr.msra.gmra.mxu3 %vm1662_vm1, %v1797_v24  ;;  %v7864_v24 = vld [vmem:[%s9355_s14] ss:$0 sm:$0xff] }
 0x2b5   : > { %v1975_v1 = vmul.f32 %v7975_v62, %v1974_v0  ;;  %2092 = vmatpush.bf16.msra.mxu1 %v7617_v30  ;;  %v7631_v0 = vld [vmem:[%s9351_s21 + $0x110] sm:$0xff] }
 0x2b7   : > { %v1976_v2 = vadd.f32 %v7975_v62, %v1975_v1 }
 0x2b9   : > { %v8580_v3 = vsel %vm1977_vm3, %v7975_v62, %v1976_v2  ;;  %v7636_v62 = vld [vmem:[%s9351_s21 + $0x138] sm:$0xff]  ;;  %v7633_v2 = vld [vmem:[%s9351_s21 + $0x120] sm:$0xff] }
 0x31d   : > { %v1818_v34 = vpop.f32.mrf.mxu0 }
 0x31e   : > { %v1879_v35 = vpack.c.bf16 %v1818_v34, %v1818_v34 }
 0x320   : > { %6634 = vmatmul.msk.bf16.vlgmr.msrb.gmra.mxu0 %vm1662_vm1, %v1879_v35 }
 0x325   : > { %v1820_v36 = vpop.f32.mrf.mxu0  ;;  %v1837_v37 = vpop.f32.mrf.mxu1 }
 0x326   : > { %v1880_v38 = vpack.c.bf16 %v1837_v37, %v1837_v37 }
 0x328   : > { %6635 = vmatmul.msk.bf16.vlgmr.msrb.gmra.mxu1 %vm1662_vm1, %v1880_v38  ;;  %v7866_v38 = vld [vmem:[%s9357_s6] ss:$0 sm:$0xff] }
 0x32d   : > { %v1839_v39 = vpop.f32.mrf.mxu1 }
 0x32f   : > { %v1856_v40 = vpop.f32.mrf.mxu2 }
 0x330   : > { %v1881_v41 = vpack.c.bf16 %v1856_v40, %v1856_v40 }
 0x332   : > { %6636 = vmatmul.msk.bf16.vlgmr.msrb.gmra.mxu2 %vm1662_vm1, %v1881_v41 }
 0x337   : > { %v1858_v42 = vpop.f32.mrf.mxu2  ;;  %v1875_v43 = vpop.f32.mrf.mxu3 }
 0x338   : > { %v1882_v44 = vpack.c.bf16 %v1875_v43, %v1875_v43 }
 0x33a   : > { %6637 = vmatmul.msk.bf16.vlgmr.msrb.gmra.mxu3 %vm1662_vm1, %v1882_v44 }
 0x33f   : > { %v1877_v45 = vpop.f32.mrf.mxu3 }
 0x39d   : > { %v1898_v46 = vpop.f32.mrf.mxu0 }
 0x3a5   : > { %v1900_v47 = vpop.f32.mrf.mxu0  ;;  %v1917_v48 = vpop.f32.mrf.mxu1 }
 0x3a6   : > { %v1959_v51 = vadd.f32 %v1917_v48, %v1898_v46 }
 0x3ad   : > { %v1919_v49 = vpop.f32.mrf.mxu1 }
 0x3ae   : > { %v7622_v49 = vld [vmem:[%s9351_s21 + $0xc8] sm:$0xff] }
 0x3af   : > { %2251 = vmatpush.bf16.msra.mxu2 %v7622_v49 }
 0x3b5   : > { %v1936_v50 = vpop.f32.mrf.mxu2 }
 0x3b6   : > { %v1960_v52 = vadd.f32 %v1959_v51, %v1936_v50  ;;  %v7624_v50 = vld [vmem:[%s9351_s21 + $0xd8] sm:$0xff]  ;;  %v7626_v51 = vld [vmem:[%s9351_s21 + $0xe8] sm:$0xff] }
 0x3b7   : > { %2276 = vmatpush.bf16.msra.mxu3 %v7624_v50  ;;  %2301 = vmatpush.bf16.msrb.mxu0 %v7626_v51 }
 0x3bd   : > { %v1938_v54 = vpop.f32.mrf.mxu2  ;;  %v1955_v55 = vpop.f32.mrf.mxu3 }
 0x3be   : > { %v1961_v56 = vadd.f32 %v1960_v52, %v1955_v55  ;;  %v7628_v52 = vld [vmem:[%s9351_s21 + $0xf8] sm:$0xff]  ;;  %v7623_v54 = vld [vmem:[%s9351_s21 + $0xd0] sm:$0xff]  ;;  %v7625_v55 = vld [vmem:[%s9351_s21 + $0xe0] sm:$0xff] }
 0x3bf   : > { %2326 = vmatpush.bf16.msrb.mxu1 %v7628_v52  ;;  %2277 = vmatpush.bf16.msra.mxu3 %v7623_v54 }
 0x3c0   : > { %v1965_v57 = vadd.f32 %v7862_v53, %v1961_v56  ;;  %v7621_v53 = vld [vmem:[%s9351_s21 + $0xc0] sm:$0xff]  ;;  %v7627_v56 = vld [vmem:[%s9351_s21 + $0xf0] sm:$0xff]  ;;  %2302 = vmatpush.bf16.msrb.mxu0 %v7625_v55  ;;  %v7871_v55 = vld [vmem:[%s9349_s25 + $0xc] ss:$0 sm:$0xff] }
 0x3c1   : > { %2252 = vmatpush.bf16.msra.mxu2 %v7621_v53 }
 0x3c2   : > { %v1966_v58 = vadd.f32 %v1965_v57, %v8494_v12 }
 0x3c3   : > { %2327 = vmatpush.bf16.msrb.mxu1 %v7627_v56  ;;  %v7872_v56 = vld [vmem:[%s9349_s25 + $0xd] ss:$0 sm:$0xff] }
 0x3c4   : > { %v1969_v59 = vsel %vm1357_vm0, %v1966_v58, 0.0 }
 0x3c5   : > { %v1957_v60 = vpop.f32.mrf.mxu3  ;;  %1970 = vadd.xlane.f32.xlu2 %v1969_v59  ;;  %v7632_v59 = vld [vmem:[%s9351_s21 + $0x118] sm:$0xff] }
 0x3c6   : > { %v7634_v60 = vld [vmem:[%s9351_s21 + $0x128] sm:$0xff]  ;;  %2376 = vmatpush.bf16.msrb.mxu3 %v7632_v59 }
 0x3ca   : > { %2377 = vmatpush.bf16.msrb.mxu3 %v7631_v0 }
 0x438   : > { %v1971_v4 = vpop.xlane.xlu2 %1970 }
 0x439   : > { %v1979_v12 = vmul.f32 %v8580_v3, %v1971_v4  ;;  %v7635_v4 = vld [vmem:[%s9351_s21 + $0x130] sm:$0xff] }
 0x43b   : > { %v1980_v5 = vsub.f32 %v1966_v58, %v1979_v12  ;;  %v7630_v58 = vld [vmem:[%s9351_s21 + $0x108] sm:$0xff] }
 0x43c   : > { %2351 = vmatpush.bf16.msrb.mxu2 %v7630_v58 }
 0x43d   : > { %v1981_v6 = vmul.f32 %v1980_v5, %v1980_v5 }
 0x43f   : > { %v1982_v7 = vsel %vm1357_vm0, %v1981_v6, 0.0 }
 0x440   : > { %1983 = vadd.xlane.f32.xlu0 %v1982_v7  ;;  %2352 = vmatpush.bf16.msrb.mxu2 %v7629_v63 }
 0x4b3   : > { %v1984_v11 = vpop.xlane.xlu0 %1983 }
 0x4b4   : > { %v1985_v13 = vmul.f32 %v1984_v11, %v8580_v3 }
 0x4b6   : > { %v1986_v15 = vadd.f32 1e-05, %v1985_v13  ;;  %v7868_v13 = vld [vmem:[%s9352_s20] ss:$0 sm:$0xff] }
 0x4b8   : > { %7976 = vrsqrt.f32 %v1986_v15  ;;  %vm1993_vm5 = vweird.f32 %v1986_v15 }
 0x4be   : > { %v7977_v16 = vpop.eup %7976 }
 0x4bf   : > { %v1988_v17 = vmul.f32 %v7977_v16, %v1986_v15  ;;  %vm1994_vm4 = vweird.f32 %v7977_v16 }
 0x4c0   : > { %vm1995_vm6 = vmor %vm1993_vm5, %vm1994_vm4 }
 0x4c1   : > { %v1989_v18 = vmul.f32 %v7977_v16, %v1988_v17 }
 0x4c3   : > { %v1990_v19 = vmul.f32 0.5, %v1989_v18  ;;  %v7638_v18 = vld [vmem:[%s9351_s21 + $0x148] sm:$0xff] }
 0x4c5   : > { %v1991_v20 = vsub.f32 1.5, %v1990_v19  ;;  %v7640_v19 = vld [vmem:[%s9351_s21 + $0x158] sm:$0xff] }
 0x4c7   : > { %v1992_v21 = vmul.f32 %v7977_v16, %v1991_v20  ;;  %v7642_v20 = vld [vmem:[%s9351_s21 + $0x168] sm:$0xff] }
 0x4c9   : > { %v1996_v23 = vsel %vm1995_vm6, %v7977_v16, %v1992_v21  ;;  %v7644_v21 = vld [vmem:[%s9351_s21 + $0x178] sm:$0xff] }
 0x4ca   : > { %v1997_v25 = vmul.f32 %v1996_v23, %v1980_v5  ;;  %v7639_v23 = vld [vmem:[%s9351_s21 + $0x150] sm:$0xff] }
 0x4cc   : > { %v2001_v26 = vmul.f32 %v7863_v22, %v1997_v25  ;;  %v7637_v22 = vld [vmem:[%s9351_s21 + $0x140] sm:$0xff]  ;;  %v7643_v25 = vld [vmem:[%s9351_s21 + $0x170] sm:$0xff] }
 0x4ce   : > { %v2005_v27 = vadd.f32 %v7864_v24, %v2001_v26  ;;  %v7641_v24 = vld [vmem:[%s9351_s21 + $0x160] sm:$0xff]  ;;  %s9382_s21 = sld [smem:[#allocation38_spill]] }
 0x4d0   : > { %v2006_v28 = vpack.c.bf16 %v2005_v27, %v2005_v27 }
 0x4d2   : > { %6646 = vmatmul.msk.bf16.vlgmr.msra.gmra.mxu0 %vm1357_vm0, %v2006_v28 }
 0x4d3   : > { %2401 = vmatpush.bf16.msra.mxu0 %v7634_v60 }
 0x4d7   : > { %2402 = vmatpush.bf16.msra.mxu0 %v7633_v2 }
 0x54f   : > { %v2039_v33 = vpop.f32.mrf.mxu0 }
 0x550   : > { %v2040_v34 = vadd.f32 %v7865_v32, %v2039_v33 }
 0x552   : > { %v2043_v35 = vmax.f32 %v2040_v34, 0.0 }
 0x554   : > { %v2044_v36 = vpack.c.bf16 %v2043_v35, %v2043_v35  ;;  %v7873_v35 = vld [vmem:[%s9349_s25 + $0x12] ss:$0 sm:$0xff] }
 0x556   : > { %6663 = vmatmul.msk.bf16.vlgmr.msra.gmra.mxu1 %vm2081_vm7, %v2044_v36  ;;  %v7874_v36 = vld [vmem:[%s9349_s25 + $0x13] ss:$0 sm:$0xff] }
 0x557   : > { %v2041_v37 = vpop.f32.mrf.mxu0  ;;  %2426 = vmatpush.bf16.msra.mxu1 %v7636_v62 }
 0x55b   : > { %2427 = vmatpush.bf16.msra.mxu1 %v7635_v4 }
 0x5d3   : > { %v2094_v39 = vpop.f32.mrf.mxu1 }
 0x5d4   : > { %v2095_v40 = vadd.f32 %v7866_v38, %v2094_v39 }
 0x5d6   : > { %v2098_v41 = vadd.f32 %v2095_v40, %v2005_v27 }
 0x5d8   : > { %v2101_v42 = vsel %vm1357_vm0, %v2098_v41, 0.0 }
 0x5d9   : > { %2102 = vadd.xlane.f32.xlu1 %v2101_v42  ;;  %v7876_v42 = vld [vmem:[%s9349_s25 + $0x11] ss:$0 sm:$0xff] }
 0x5db   : > { %v2096_v43 = vpop.f32.mrf.mxu1 }
 0x5dc   : > { %v7869_v43 = vld [vmem:[%s9349_s25 + $0xe] ss:$0 sm:$0xff] }
 0x64c   : > { %v2103_v44 = vpop.xlane.xlu1 %2102 }
 0x64d   : > { %v2104_v45 = vmul.f32 %v2103_v44, %v8580_v3  ;;  %v7870_v44 = vld [vmem:[%s9349_s25 + $0xf] ss:$0 sm:$0xff] }
 0x64f   : > { %v2105_v46 = vsub.f32 %v2098_v41, %v2104_v45  ;;  %v7875_v41 = vld [vmem:[%s9349_s25 + $0x10] ss:$0 sm:$0xff] }
 0x651   : > { %v2106_v47 = vmul.f32 %v2105_v46, %v2105_v46 }
 0x653   : > { %v2107_v48 = vsel %vm1357_vm0, %v2106_v47, 0.0 }
 0x654   : > { %2108 = vadd.xlane.f32.xlu2 %v2107_v48 }
 0x6c7   : > { %v2109_v57 = vpop.xlane.xlu2 %2108 }
 0x6c8   : > { %v2110_v61 = vmul.f32 %v2109_v57, %v8580_v3 }
 0x6ca   : > { %v2111_v1 = vadd.f32 1e-05, %v2110_v61 }
 0x6cc   : > { %7978 = vrsqrt.f32 %v2111_v1  ;;  %vm2118_vm9 = vweird.f32 %v2111_v1 }
 0x6d2   : > { %v7979_v12 = vpop.eup %7978 }
 0x6d3   : > { %v2113_v5 = vmul.f32 %v7979_v12, %v2111_v1  ;;  %vm2119_vm8 = vweird.f32 %v7979_v12 }
 0x6d4   : > { %vm2120_vm10 = vmor %vm2118_vm9, %vm2119_vm8 }
 0x6d5   : > { %v2114_v6 = vmul.f32 %v7979_v12, %v2113_v5  ;;  %v7877_v5 = vld [vmem:[%s9349_s25 + $0x16] ss:$0 sm:$0xff] }
 0x6d7   : > { %v2115_v7 = vmul.f32 0.5, %v2114_v6  ;;  %v7878_v6 = vld [vmem:[%s9349_s25 + $0x17] ss:$0 sm:$0xff] }
 0x6d9   : > { %v2116_v8 = vsub.f32 1.5, %v2115_v7 }
 0x6db   : > { %v2117_v9 = vmul.f32 %v7979_v12, %v2116_v8 }
 0x6dd   : > { %v2121_v11 = vsel %vm2120_vm10, %v7979_v12, %v2117_v9 }
 0x6de   : > { %v2122_v14 = vmul.f32 %v2121_v11, %v2105_v46 }
 0x6e0   : > { %v2126_v15 = vmul.f32 %v7867_v10, %v2122_v14  ;;  %v7879_v14 = vld [vmem:[%s9349_s25 + $0x14] ss:$0 sm:$0xff] }
 0x6e2   : > { %v8619_v16 = vadd.f32 %v7868_v13, %v2126_v15  ;;  %v7880_v15 = vld [vmem:[%s9349_s25 + $0x15] ss:$0 sm:$0xff]  ;;  %s9384_s25 = sld [smem:[#allocation36_spill]] }
 0x6e4   : > { %v2131_v17 = vpack.c.bf16 %v8619_v16, %v8619_v16 }
 0x6e6   : > { %6732 = vmatmul.msk.bf16.vlgmr.msra.gmra.mxu2 %vm1357_vm0, %v2131_v17  ;;  %6741 = vmatmul.msk.bf16.vlgmr.msra.gmra.mxu3 %vm1357_vm0, %v2131_v17 }
 0x6e7   : > { %6750 = vmatmul.msk.bf16.vlgmr.msrb.gmra.mxu0 %vm1357_vm0, %v2131_v17  ;;  %6759 = vmatmul.msk.bf16.vlgmr.msrb.gmra.mxu1 %vm1357_vm0, %v2131_v17 }
 0x6e8   : > { %2451 = vmatpush.bf16.msra.mxu2 %v7638_v18  ;;  %2476 = vmatpush.bf16.msra.mxu3 %v7640_v19 }
 0x6e9   : > { %2501 = vmatpush.bf16.msrb.mxu0 %v7642_v20  ;;  %2526 = vmatpush.bf16.msrb.mxu1 %v7644_v21 }
 0x6ec   : > { %2452 = vmatpush.bf16.msra.mxu2 %v7637_v22  ;;  %2477 = vmatpush.bf16.msra.mxu3 %v7639_v23 }
 0x6ed   : > { %2502 = vmatpush.bf16.msrb.mxu0 %v7641_v24  ;;  %2527 = vmatpush.bf16.msrb.mxu1 %v7643_v25 }
 0x6f6   : > { %6768 = vmatmul.msk.bf16.vlgmr.msrb.gmra.mxu2 %vm1357_vm0, %v2131_v17  ;;  %6777 = vmatmul.msk.bf16.vlgmr.msrb.gmra.mxu3 %vm1357_vm0, %v2131_v17 }
 0x6f7   : > { %6786 = vmatmul.msk.bf16.vlgmr.msra.gmra.mxu0 %vm1357_vm0, %v2131_v17  ;;  %6795 = vmatmul.msk.bf16.vlgmr.msra.gmra.mxu1 %vm1357_vm0, %v2131_v17 }
 0x706   : > { %6804 = vmatmul.msk.bf16.vlgmr.msra.gmra.mxu2 %vm1357_vm0, %v2131_v17  ;;  %6813 = vmatmul.msk.bf16.vlgmr.msra.gmra.mxu3 %vm1357_vm0, %v2131_v17 }
 0x707   : > { %6822 = vmatmul.msk.bf16.vlgmr.msrb.gmra.mxu0 %vm1357_vm0, %v2131_v17  ;;  %6831 = vmatmul.msk.bf16.vlgmr.msrb.gmra.mxu1 %vm1357_vm0, %v2131_v17 }
 0x764   : > { %v2304_v26 = vpop.f32.mrf.mxu0  ;;  %v2329_v27 = vpop.f32.mrf.mxu1 }
 0x765   : > { %v2305_v53 = vadd.f32 %v7869_v43, %v2304_v26  ;;  %v2330_v54 = vadd.f32 %v7870_v44, %v2329_v27 }
 0x767   : > { %v2542_v63 = vpack.c.bf16 %v2305_v53, %v2305_v53  ;;  %v2543_v0 = vpack.c.bf16 %v2330_v54, %v2330_v54 }
 0x769   : > { %v2254_v28 = vpop.f32.mrf.mxu2  ;;  %v2279_v29 = vpop.f32.mrf.mxu3 }
 0x76a   : > { %v2255_v1 = vadd.f32 %v7871_v55, %v2254_v28  ;;  %v2280_v2 = vadd.f32 %v7872_v56, %v2279_v29 }
 0x76c   : > { %v2306_v30 = vpop.f32.mrf.mxu0  ;;  %v2331_v32 = vpop.f32.mrf.mxu1  ;;  %v2540_v7 = vpack.c.bf16 %v2255_v1, %v2255_v1  ;;  %v2541_v8 = vpack.c.bf16 %v2280_v2, %v2280_v2 }
 0x771   : > { %v2256_v33 = vpop.f32.mrf.mxu2  ;;  %v2281_v34 = vpop.f32.mrf.mxu3 }
 0x774   : > { %v2404_v37 = vpop.f32.mrf.mxu0  ;;  %v2429_v38 = vpop.f32.mrf.mxu1 }
 0x775   : > { %v2405_v39 = vadd.f32 %v7873_v35, %v2404_v37  ;;  %v2430_v40 = vadd.f32 %v7874_v36, %v2429_v38 }
 0x777   : > { %v2546_v45 = vpack.c.bf16 %v2405_v39, %v2405_v39  ;;  %v2547_v46 = vpack.c.bf16 %v2430_v40, %v2430_v40 }
 0x779   : > { %v2590_v47 = vsel %vm1662_vm1, %v2546_v45, 0  ;;  %v2609_v48 = vsel %vm1662_vm1, %v2547_v46, 0  ;;  %v2354_v49 = vpop.f32.mrf.mxu2  ;;  %v2379_v50 = vpop.f32.mrf.mxu3 }
 0x77a   : > { %v2355_v51 = vadd.f32 %v7875_v41, %v2354_v49  ;;  %v2380_v52 = vadd.f32 %v7876_v42, %v2379_v50  ;;  %2599 = vmatpush.bf16.xpose.msra.mxu0 %v2590_v47  ;;  %2618 = vmatpush.bf16.xpose.msra.mxu1 %v2609_v48 }
 0x77c   : > { %v2544_v57 = vpack.c.bf16 %v2355_v51, %v2355_v51  ;;  %v2545_v58 = vpack.c.bf16 %v2380_v52, %v2380_v52  ;;  %v2406_v59 = vpop.f32.mrf.mxu0  ;;  %v2431_v60 = vpop.f32.mrf.mxu1 }
 0x77e   : > { %v2552_v61 = vsel %vm1662_vm1, %v2544_v57, 0  ;;  %v2571_v62 = vsel %vm1662_vm1, %v2545_v58, 0 }
 0x77f   : > { %2561 = vmatpush.bf16.xpose.msrb.mxu2 %v2552_v61  ;;  %2580 = vmatpush.bf16.xpose.msrb.mxu3 %v2571_v62 }
 0x781   : > { %6839 = vmatmul.msk.bf16.vlgmr.msra.gmra.mxu0 %vm1662_vm1, %v2542_v63  ;;  %6840 = vmatmul.msk.bf16.vlgmr.msra.gmra.mxu1 %vm1662_vm1, %v2543_v0  ;;  %v2356_v4 = vpop.f32.mrf.mxu2  ;;  %v2381_v12 = vpop.f32.mrf.mxu3 }
 0x784   : > { %v2504_v9 = vpop.f32.mrf.mxu0  ;;  %v2529_v10 = vpop.f32.mrf.mxu1 }
 0x785   : > { %v2505_v11 = vadd.f32 %v7877_v5, %v2504_v9  ;;  %v2530_v13 = vadd.f32 %v7878_v6, %v2529_v10 }
 0x786   : > { %6837 = vmatmul.msk.bf16.vlgmr.msrb.gmra.mxu2 %vm1662_vm1, %v2540_v7  ;;  %6838 = vmatmul.msk.bf16.vlgmr.msrb.gmra.mxu3 %vm1662_vm1, %v2541_v8 }
 0x787   : > { %v2682_v17 = vpack.c.bf16 %v2505_v11, %v2505_v11  ;;  %v2683_v18 = vpack.c.bf16 %v2530_v13, %v2530_v13 }
 0x789   : > { %v2726_v19 = vsel %vm1805_vm2, %v2682_v17, 0  ;;  %v2745_v20 = vsel %vm1805_vm2, %v2683_v18, 0  ;;  %v2454_v21 = vpop.f32.mrf.mxu2  ;;  %v2479_v22 = vpop.f32.mrf.mxu3 }
 0x78a   : > { %v2455_v23 = vadd.f32 %v7879_v14, %v2454_v21  ;;  %v2480_v24 = vadd.f32 %v7880_v15, %v2479_v22  ;;  %2735 = vmatpush.bf16.msrb.mxu0 %v2726_v19  ;;  %2754 = vmatpush.bf16.msrb.mxu1 %v2745_v20 }
 0x78c   : > { %v2680_v25 = vpack.c.bf16 %v2455_v23, %v2455_v23  ;;  %v2681_v26 = vpack.c.bf16 %v2480_v24, %v2480_v24  ;;  %v2506_v27 = vpop.f32.mrf.mxu0  ;;  %v2531_v28 = vpop.f32.mrf.mxu1 }
 0x78d   : > { %v6834_v27 = vld [vmem:[%s9348_s29 + $0x18] sm:$0xf] }
 0x78e   : > { %v2688_v29 = vsel %vm1805_vm2, %v2680_v25, 0  ;;  %v2707_v30 = vsel %vm1805_vm2, %v2681_v26, 0  ;;  %v2806_v28 = vsel %vm1805_vm2, %v6834_v27, 0 }
 0x78f   : > { %2697 = vmatpush.bf16.msra.mxu2 %v2688_v29  ;;  %2716 = vmatpush.bf16.msra.mxu3 %v2707_v30  ;;  %v6832_v29 = vld [vmem:[%s9348_s29 + $0x10] sm:$0xf]  ;;  %v6833_v30 = vld [vmem:[%s9348_s29 + $0x14] sm:$0xf] }
 0x790   : > { %2815 = vmatpush.bf16.msra.mxu0 %v2806_v28 }
 0x791   : > { %v2456_v32 = vpop.f32.mrf.mxu2  ;;  %v2481_v33 = vpop.f32.mrf.mxu3 }
 0x792   : > { %v2768_v32 = vsel %vm1805_vm2, %v6832_v29, 0  ;;  %v2787_v33 = vsel %vm1805_vm2, %v6833_v30, 0  ;;  %v7664_v30 = vld [vmem:[%s9368_s1 + $0x68] sm:$0xff] }
 0x793   : > { %2777 = vmatpush.bf16.msrb.mxu2 %v2768_v32  ;;  %2796 = vmatpush.bf16.msrb.mxu3 %v2787_v33  ;;  %v7653_v33 = vld [vmem:[%s9368_s1 + $0x10] sm:$0xff] }
 0x7fe   : > { %v2601_v34 = vpop.f32.mrf.mxu0  ;;  %v2620_v35 = vpop.f32.mrf.mxu1 }
 0x7ff   : > { %v2626_v36 = vmul.f32 0.35355338, %v2601_v34  ;;  %v2627_v47 = vmul.f32 0.35355338, %v2620_v35  ;;  %v6835_v34 = vld [vmem:[%s9348_s29 + $0x1c] sm:$0xf] }
 0x800   : > { %v2825_v35 = vsel %vm1805_vm2, %v6835_v34, 0  ;;  %s9385_s29 = sld [smem:[#allocation37_spill]] }
 0x801   : > { %v2630_v37 = vadd.f32 %v8547_v31, %v2626_v36  ;;  %v2631_v52 = vadd.f32 %v8547_v31, %v2627_v47  ;;  %2834 = vmatpush.bf16.msra.mxu1 %v2825_v35  ;;  %v7662_v35 = vld [vmem:[%s9368_s1 + $0x58] sm:$0xff] }
 0x803   : > { %v2638_v38 = vsel %vm1662_vm1, %v2630_v37, -inf  ;;  %v2641_v53 = vsel %vm1662_vm1, %v2631_v52, -inf }
 0x804   : > { %2639 = vmax.xlane.f32.xlu2 %v2638_v38 }
 0x806   : > { %v2603_v39 = vpop.f32.mrf.mxu0  ;;  %v2622_v40 = vpop.f32.mrf.mxu1 }
 0x809   : > { %v2563_v41 = vpop.f32.mrf.mxu2  ;;  %v2582_v42 = vpop.f32.mrf.mxu3 }
 0x80a   : > { %v2624_v43 = vmul.f32 0.35355338, %v2563_v41  ;;  %v2625_v44 = vmul.f32 0.35355338, %v2582_v42 }
 0x80c   : > { %v2629_v45 = vadd.f32 %v8547_v31, %v2625_v44  ;;  %v2628_v46 = vadd.f32 %v8547_v31, %v2624_v43 }
 0x80e   : > { %v2635_v48 = vsel %vm1662_vm1, %v2629_v45, -inf  ;;  %v2632_v49 = vsel %vm1662_vm1, %v2628_v46, -inf }
 0x80f   : > { %2636 = vmax.xlane.f32.xlu1 %v2635_v48  ;;  %2633 = vmax.xlane.f32.xlu0 %v2632_v49 }
 0x811   : > { %v2565_v50 = vpop.f32.mrf.mxu2  ;;  %v2584_v51 = vpop.f32.mrf.mxu3 }
 0x817   : > { %2642 = vmax.xlane.f32.xlu0 %v2641_v53 }
 0x877   : > { %v2640_v54 = vpop.xlane.xlu2 %2639 }
 0x878   : > { %v2646_v55 = vsub.f32 %v2630_v37, %v2640_v54 }
 0x87a   : > { %v2652_v56 = vmul.f32 1.442695, %v2646_v55  ;;  %v7881_v55 = vld [vmem:[%s9358_s3 + $0x1] ss:$0 sm:$0xff]  ;;  %s9374_s3 = sld [smem:[#allocation30_spill]] }
 0x87c   : > { %7980 = vpow2.f32 %v2652_v56 }
 0x882   : > { %v7981_v57 = vpop.eup %7980  ;;  %v2637_v58 = vpop.xlane.xlu1 %2636 }
 0x883   : > { %v2634_v59 = vpop.xlane.xlu0 %2633  ;;  %v2645_v60 = vsub.f32 %v2629_v45, %v2637_v58  ;;  %v2662_v62 = vsel %vm1662_vm1, %v7981_v57, 0.0 }
 0x884   : > { %v2644_v61 = vsub.f32 %v2628_v46, %v2634_v59  ;;  %2663 = vadd.xlane.f32.xlu0 %v2662_v62 }
 0x885   : > { %v2650_v63 = vmul.f32 1.442695, %v2645_v60 }
 0x886   : > { %v2648_v0 = vmul.f32 1.442695, %v2644_v61 }
 0x887   : > { %7982 = vpow2.f32 %v2650_v63  ;;  %v7652_v63 = vld [vmem:[%s9368_s1 + $0x8] sm:$0xff] }
 0x888   : > { %7984 = vpow2.f32 %v2648_v0  ;;  %v7651_v0 = vld [vmem:[%s9368_s1] sm:$0xff] }
 0x88b   : > { %v2643_v31 = vpop.xlane.xlu0 %2642 }
 0x88c   : > { %v2647_v1 = vsub.f32 %v2631_v52, %v2643_v31  ;;  %v8703_v31 = vld [vmem:[%s1227_s13] sm:$0xff]  ;;  %s9371_s13 = sld [smem:[#allocation11_spill]] }
 0x88d   : > { %v7983_v2 = vpop.eup %7982 }
 0x88e   : > { %v2654_v4 = vmul.f32 1.442695, %v2647_v1  ;;  %v7985_v12 = vpop.eup %7984  ;;  %v2659_v5 = vsel %vm1662_vm1, %v7983_v2, 0.0  ;;  %v7660_v1 = vld [vmem:[%s9368_s1 + $0x48] sm:$0xff] }
 0x88f   : > { %2660 = vadd.xlane.f32.xlu2 %v2659_v5  ;;  %v2656_v6 = vsel %vm1662_vm1, %v7985_v12, 0.0 }
 0x890   : > { %7986 = vpow2.f32 %v2654_v4  ;;  %2657 = vadd.xlane.f32.xlu1 %v2656_v6 }
 0x892   : > { %s1233_s10 = scalar_lea.vmem %s9371_s13, %s8478_s18  ;;  %s9372_s18 = sld [smem:[#allocation26_spill]] }
 0x893   : > { %s9377_s13 = sld [smem:[#allocation29_spill]] }
 0x896   : > { %v7987_v7 = vpop.eup %7986 }
 0x897   : > { %v2665_v8 = vsel %vm1662_vm1, %v7987_v7, 0.0 }
 0x898   : > { %2666 = vadd.xlane.f32.xlu1 %v2665_v8  ;;  %v7646_v8 = vld [vmem:[%s9353_s19 + $0x18] sm:$0xff] }
 0x8f7   : > { %v2664_v9 = vpop.xlane.xlu0 %2663 }
 0x8f8   : > { %7988 = vrcp.f32 %v2664_v9  ;;  %v7645_v9 = vld [vmem:[%s9353_s19 + $0x10] sm:$0xff]  ;;  %s9380_s19 = sld [smem:[#allocation34_spill]] }
 0x8fe   : > { %v7989_v10 = vpop.eup %7988 }
 0x8ff   : > { %v2674_v11 = vmul.f32 %v7989_v10, %v7981_v57  ;;  %v7656_v10 = vld [vmem:[%s9368_s1 + $0x28] sm:$0xff] }
 0x901   : > { %v2678_v13 = vpack.c.bf16 %v2674_v11, %v2674_v11 }
 0x902   : > { %v2661_v14 = vpop.xlane.xlu2 %2660 }
 0x903   : > { %7990 = vrcp.f32 %v2661_v14  ;;  %v2658_v15 = vpop.xlane.xlu1 %2657  ;;  %6843 = vmatmul.msk.bf16.vlgmr.msrb.gmra.mxu0 %vm1662_vm1, %v2678_v13  ;;  %v7655_v14 = vld [vmem:[%s9368_s1 + $0x20] sm:$0xff] }
 0x904   : > { %7992 = vrcp.f32 %v2658_v15  ;;  %3132 = vmatpush.bf16.msrb.mxu0 %v7652_v63 }
 0x908   : > { %3133 = vmatpush.bf16.msrb.mxu0 %v7651_v0  ;;  %v7666_v0 = vld [vmem:[%s9368_s1 + $0x78] sm:$0xff] }
 0x909   : > { %v7991_v17 = vpop.eup %7990 }
 0x90a   : > { %v7993_v18 = vpop.eup %7992  ;;  %v2673_v19 = vmul.f32 %v7991_v17, %v7983_v2  ;;  %v8708_v2 = vpack.c.bf16 %v8703_v31, %v8703_v31 }
 0x90b   : > { %v2672_v20 = vmul.f32 %v7993_v18, %v7985_v12  ;;  %v2667_v21 = vpop.xlane.xlu1 %2666 }
 0x90c   : > { %v2677_v22 = vpack.c.bf16 %v2673_v19, %v2673_v19  ;;  %7994 = vrcp.f32 %v2667_v21 }
 0x90d   : > { %v2676_v23 = vpack.c.bf16 %v2672_v20, %v2672_v20  ;;  %v7654_v20 = vld [vmem:[%s9368_s1 + $0x18] sm:$0xff] }
 0x90e   : > { %6842 = vmatmul.msk.bf16.vlgmr.msra.gmra.mxu3 %vm1662_vm1, %v2677_v22 }
 0x90f   : > { %6841 = vmatmul.msk.bf16.vlgmr.msra.gmra.mxu2 %vm1662_vm1, %v2676_v23 }
 0x910   : > { %2914 = vmatpush.bf16.msra.mxu2 %v7646_v8 }
 0x912   : > { %v7995_v24 = vpop.eup %7994 }
 0x913   : > { %v2675_v25 = vmul.f32 %v7995_v24, %v7987_v7  ;;  %v7882_v24 = vld [vmem:[%s9356_s8 + $0x1] ss:$0 sm:$0xff]  ;;  %s9376_s8 = sld [smem:[#allocation28_spill]] }
 0x914   : > { %2915 = vmatpush.bf16.msra.mxu2 %v7645_v9 }
 0x915   : > { %v2679_v26 = vpack.c.bf16 %v2675_v25, %v2675_v25 }
 0x917   : > { %6844 = vmatmul.msk.bf16.vlgmr.msrb.gmra.mxu1 %vm1662_vm1, %v2679_v26  ;;  %v7883_v26 = vld [vmem:[%s9355_s14 + $0x1] ss:$0 sm:$0xff]  ;;  %s9378_s14 = sld [smem:[#allocation33_spill]] }
 0x918   : > { %3157 = vmatpush.bf16.msrb.mxu1 %v7654_v20 }
 0x91c   : > { %3158 = vmatpush.bf16.msrb.mxu1 %v7653_v33 }
 0x980   : > { %v2737_v36 = vpop.f32.mrf.mxu0 }
 0x981   : > { %v2762_v37 = vpack.c.bf16 %v2737_v36, %v2737_v36  ;;  %v7668_v36 = vld [vmem:[%s9368_s1 + $0x88] sm:$0xff] }
 0x983   : > { %6847 = vmatmul.msk.bf16.vlgmr.msra.gmra.mxu0 %vm1662_vm1, %v2762_v37  ;;  %v7663_v37 = vld [vmem:[%s9368_s1 + $0x60] sm:$0xff] }
 0x984   : > { %3232 = vmatpush.bf16.msra.mxu0 %v7660_v1 }
 0x988   : > { %v2739_v38 = vpop.f32.mrf.mxu0 }
 0x989   : > { %v7661_v38 = vld [vmem:[%s9368_s1 + $0x50] sm:$0xff] }
 0x991   : > { %v2718_v39 = vpop.f32.mrf.mxu3 }
 0x992   : > { %v2699_v40 = vpop.f32.mrf.mxu2  ;;  %v2761_v41 = vpack.c.bf16 %v2718_v39, %v2718_v39  ;;  %v7667_v39 = vld [vmem:[%s9368_s1 + $0x80] sm:$0xff] }
 0x993   : > { %v2760_v42 = vpack.c.bf16 %v2699_v40, %v2699_v40  ;;  %6901 = vmatmul.msk.bf16.vlgmr.msrb.gmra.mxu0 %vm1357_vm0, %v8708_v2  ;;  %v7650_v40 = vld [vmem:[%s9347_s30 + $0x38] sm:$0xff] }
 0x994   : > { %v2756_v43 = vpop.f32.mrf.mxu1  ;;  %6846 = vmatmul.msk.bf16.vlgmr.msrb.gmra.mxu3 %vm1662_vm1, %v2761_v41  ;;  %v7649_v41 = vld [vmem:[%s9347_s30 + $0x30] sm:$0xff] }
 0x995   : > { %v2763_v44 = vpack.c.bf16 %v2756_v43, %v2756_v43  ;;  %6845 = vmatmul.msk.bf16.vlgmr.msrb.gmra.mxu2 %vm1662_vm1, %v2760_v42  ;;  %2968 = vmatpush.bf16.msra.mxu3 %v7650_v40  ;;  %v7885_v43 = vld [vmem:[%s9370_s5 + $0x4] ss:$0 sm:$0xff] }
 0x996   : > { %3182 = vmatpush.bf16.msrb.mxu2 %v7656_v10  ;;  %v1237_v10 = vlaneseq }
 0x997   : > { %6848 = vmatmul.msk.bf16.vlgmr.msra.gmra.mxu1 %vm1662_vm1, %v2763_v44 }
 0x998   : > { %3257 = vmatpush.bf16.msra.mxu1 %v7662_v35  ;;  %v1240_v20 = vand.u32 127, %v1237_v10 }
 0x999   : > { %v2720_v45 = vpop.f32.mrf.mxu3  ;;  %2969 = vmatpush.bf16.msra.mxu3 %v7649_v41 }
 0x99a   : > { %v2701_v46 = vpop.f32.mrf.mxu2  ;;  %3183 = vmatpush.bf16.msrb.mxu2 %v7655_v14  ;;  %v7884_v45 = vld [vmem:[%s9370_s5] ss:$0 sm:$0xff] }
 0x99c   : > { %v2758_v47 = vpop.f32.mrf.mxu1  ;;  %3258 = vmatpush.bf16.msra.mxu1 %v7661_v38 }
 0x9a7   : > { %6910 = vmatmul.msk.bf16.vlgmr.msrb.gmra.mxu1 %vm1357_vm0, %v8708_v2 }
 0x9b7   : > { %6946 = vmatmul.msk.bf16.vlgmr.msra.gmra.mxu1 %vm1357_vm0, %v8708_v2 }
 0xa00   : > { %v2817_v48 = vpop.f32.mrf.mxu0 }
 0xa08   : > { %v2819_v49 = vpop.f32.mrf.mxu0 }
 0xa10   : > { %v3135_v34 = vpop.f32.mrf.mxu0 }
 0xa14   : > { %v2836_v50 = vpop.f32.mrf.mxu1 }
 0xa17   : > { %v2798_v51 = vpop.f32.mrf.mxu3 }
 0xa18   : > { %v2779_v52 = vpop.f32.mrf.mxu2  ;;  %v3137_v42 = vpop.f32.mrf.mxu0 }
 0xa19   : > { %v2840_v53 = vadd.f32 %v2798_v51, %v2779_v52  ;;  %v7648_v52 = vld [vmem:[%s9347_s30 + $0x28] sm:$0xff] }
 0xa1a   : > { %2970 = vmatpush.bf16.msra.mxu3 %v7648_v52 }
 0xa1b   : > { %v2841_v54 = vadd.f32 %v2840_v53, %v2817_v48  ;;  %v3136_v48 = vadd.f32 %v7884_v45, %v3135_v34  ;;  %v7647_v53 = vld [vmem:[%s9347_s30 + $0x20] sm:$0xff]  ;;  %s9386_s30 = sld [smem:[#allocation39_spill]] }
 0xa1c   : > { %v2838_v56 = vpop.f32.mrf.mxu1  ;;  %v7889_v34 = vld [vmem:[%s9370_s5 + $0x6] ss:$0 sm:$0xff] }
 0xa1d   : > { %v2842_v57 = vadd.f32 %v2841_v54, %v2836_v50  ;;  %v3419_v51 = vpack.c.bf16 %v3136_v48, %v3136_v48  ;;  %v7658_v54 = vld [vmem:[%s9368_s1 + $0x38] sm:$0xff]  ;;  %v7672_v56 = vld [vmem:[%s9368_s1 + $0xa8] sm:$0xff] }
 0xa1e   : > { %2971 = vmatpush.bf16.msra.mxu3 %v7647_v53  ;;  %v7674_v48 = vld [vmem:[%s9368_s1 + $0xb8] sm:$0xff] }
 0xa1f   : > { %v2800_v58 = vpop.f32.mrf.mxu3  ;;  %v2846_v59 = vadd.f32 %v7881_v55, %v2842_v57  ;;  %v7657_v55 = vld [vmem:[%s9368_s1 + $0x30] sm:$0xff]  ;;  %v7671_v57 = vld [vmem:[%s9368_s1 + $0xa0] sm:$0xff] }
 0xa20   : > { %v2781_v60 = vpop.f32.mrf.mxu2  ;;  %v7886_v58 = vld [vmem:[%s9350_s24 + $0x1] ss:$0 sm:$0xff]  ;;  %s9383_s24 = sld [smem:[#allocation40_spill]] }
 0xa21   : > { %v2847_v61 = vadd.f32 %v2846_v59, %v8619_v16  ;;  %v7659_v16 = vld [vmem:[%s9368_s1 + $0x40] sm:$0xff] }
 0xa22   : > { %3233 = vmatpush.bf16.msra.mxu0 %v7659_v16  ;;  %3207 = vmatpush.bf16.msrb.mxu3 %v7658_v54 }
 0xa23   : > { %v2852_v62 = vsel %vm1357_vm0, %v2847_v61, 0.0 }
 0xa24   : > { %2853 = vadd.xlane.f32.xlu2 %v2852_v62  ;;  %v3160_v59 = vpop.f32.mrf.mxu1  ;;  %v7670_v62 = vld [vmem:[%s9368_s1 + $0x98] sm:$0xff] }
 0xa25   : > { %6937 = vmatmul.msk.bf16.vlgmr.msra.gmra.mxu0 %vm1357_vm0, %v8708_v2  ;;  %3357 = vmatpush.bf16.msrb.mxu1 %v7670_v62 }
 0xa26   : > { %3332 = vmatpush.bf16.msrb.mxu0 %v7668_v36  ;;  %3208 = vmatpush.bf16.msrb.mxu3 %v7657_v55  ;;  %v7896_v55 = vld [vmem:[%s9370_s5 + $0x9] ss:$0 sm:$0xff] }
 0xa2a   : > { %3333 = vmatpush.bf16.msrb.mxu0 %v7667_v39  ;;  %v7887_v39 = vld [vmem:[%s9370_s5 + $0x2] ss:$0 sm:$0xff] }
 0xa2c   : > { %v3162_v16 = vpop.f32.mrf.mxu1 }
 0xa34   : > { %v3260_v9 = vpop.f32.mrf.mxu1 }
 0xa35   : > { %6973 = vmatmul.msk.bf16.vlgmr.msrb.gmra.mxu0 %vm1357_vm0, %v8708_v2 }
 0xa97   : > { %v2854_v4 = vpop.xlane.xlu2 %2853 }
 0xa98   : > { %v2855_v12 = vmul.f32 %v2854_v4, %v8580_v3  ;;  %v7669_v4 = vld [vmem:[%s9368_s1 + $0x90] sm:$0xff] }
 0xa99   : > { %3358 = vmatpush.bf16.msrb.mxu1 %v7669_v4  ;;  %v7897_v4 = vld [vmem:[%s9370_s5 + $0x7] ss:$0 sm:$0xff] }
 0xa9a   : > { %v2856_v5 = vsub.f32 %v2847_v61, %v2855_v12 }
 0xa9c   : > { %v2857_v6 = vmul.f32 %v2856_v5, %v2856_v5  ;;  %6982 = vmatmul.msk.bf16.vlgmr.msrb.gmra.mxu1 %vm1357_vm0, %v8708_v2 }
 0xa9e   : > { %v2858_v7 = vsel %vm1357_vm0, %v2857_v6, 0.0  ;;  %v7890_v6 = vld [vmem:[%s9370_s5 + $0x5] ss:$0 sm:$0xff] }
 0xa9f   : > { %2859 = vadd.xlane.f32.xlu0 %v2858_v7  ;;  %v7891_v7 = vld [vmem:[%s9370_s5 + $0x8] ss:$0 sm:$0xff] }
 0xaa2   : > { %v3235_v44 = vpop.f32.mrf.mxu0 }
 0xaa3   : > { %v3236_v46 = vadd.f32 %v7885_v43, %v3235_v44 }
 0xaa5   : > { %v3423_v47 = vpack.c.bf16 %v3236_v46, %v3236_v46 }
 0xaa7   : > { %v3431_v49 = vsel %vm1662_vm1, %v3423_v47, 0 }
 0xaa8   : > { %3440 = vmatpush.bf16.xpose.msra.mxu0 %v3431_v49  ;;  %v7673_v49 = vld [vmem:[%s9368_s1 + $0xb0] sm:$0xff] }
 0xaaa   : > { %v3237_v50 = vpop.f32.mrf.mxu0 }
 0xaab   : > { %v7895_v50 = vld [vmem:[%s9370_s5 + $0xa] ss:$0 sm:$0xff] }
 0xaaf   : > { %7001 = vmatmul.msk.bf16.vlgmr.msra.gmra.mxu0 %vm1662_vm1, %v3419_v51 }
 0xab2   : > { %v3335_v8 = vpop.f32.mrf.mxu0 }
 0xab3   : > { %v3336_v14 = vadd.f32 %v7891_v7, %v3335_v8 }
 0xb12   : > { %v2860_v11 = vpop.xlane.xlu0 %2859 }
 0xb13   : > { %v2861_v13 = vmul.f32 %v2860_v11, %v8580_v3  ;;  %v7888_v11 = vld [vmem:[%s9370_s5 + $0x1] ss:$0 sm:$0xff] }
 0xb15   : > { %v2862_v15 = vadd.f32 1e-05, %v2861_v13  ;;  %v3261_v13 = vadd.f32 %v7890_v6, %v3260_v9  ;;  %v7894_v6 = vld [vmem:[%s9370_s5 + $0x3] ss:$0 sm:$0xff] }
 0xb17   : > { %7996 = vrsqrt.f32 %v2862_v15  ;;  %vm2869_vm12 = vweird.f32 %v2862_v15 }
 0xb1d   : > { %v7997_v17 = vpop.eup %7996 }
 0xb1e   : > { %v2864_v18 = vmul.f32 %v7997_v17, %v2862_v15  ;;  %vm2870_vm11 = vweird.f32 %v7997_v17 }
 0xb1f   : > { %vm2871_vm13 = vmor %vm2869_vm12, %vm2870_vm11 }
 0xb20   : > { %v2865_v19 = vmul.f32 %v7997_v17, %v2864_v18  ;;  %v3559_v18 = vpack.c.bf16 %v3336_v14, %v3336_v14 }
 0xb22   : > { %v2866_v21 = vmul.f32 0.5, %v2865_v19  ;;  %v1238_v19 = vshrl.u32 %v1237_v10, 7 }
 0xb24   : > { %v2867_v22 = vsub.f32 1.5, %v2866_v21  ;;  %v3161_v21 = vadd.f32 %v7888_v11, %v3160_v59  ;;  %vm1241_vm14 = vcmp.ge.s32.totalorder %v1238_v19, %v1240_v20 }
 0xb26   : > { %v2868_v23 = vmul.f32 %v7997_v17, %v2867_v22 }
 0xb28   : > { %v2872_v25 = vsel %vm2871_vm13, %v7997_v17, %v2868_v23  ;;  %v3424_v17 = vpack.c.bf16 %v3261_v13, %v3261_v13  ;;  %v3567_v23 = vsel %vm1805_vm2, %v3559_v18, 0 }
 0xb29   : > { %v2873_v27 = vmul.f32 %v2872_v25, %v2856_v5  ;;  %v7665_v5 = vld [vmem:[%s9368_s1 + $0x70] sm:$0xff]  ;;  %3576 = vmatpush.bf16.msrb.mxu0 %v3567_v23  ;;  %v3262_v25 = vpop.f32.mrf.mxu1 }
 0xb2a   : > { %v3450_v22 = vsel %vm1662_vm1, %v3424_v17, 0 }
 0xb2b   : > { %v2877_v28 = vmul.f32 %v7882_v24, %v2873_v27  ;;  %3459 = vmatpush.bf16.xpose.msra.mxu1 %v3450_v22  ;;  %v3337_v24 = vpop.f32.mrf.mxu0 }
 0xb2d   : > { %v8725_v29 = vadd.f32 %v7883_v26, %v2877_v28  ;;  %v3420_v26 = vpack.c.bf16 %v3161_v21, %v3161_v21  ;;  %v7892_v28 = vld [vmem:[%s1233_s10] ss:$0 sm:$0xff]  ;;  %s9373_s10 = sld [smem:[#allocation27_spill]] }
 0xb2f   : > { %v2882_v32 = vpack.c.bf16 %v8725_v29, %v8725_v29 }
 0xb31   : > { %6864 = vmatmul.msk.bf16.vlgmr.msra.gmra.mxu2 %vm1357_vm0, %v2882_v32 }
 0xb32   : > { %3282 = vmatpush.bf16.msra.mxu2 %v7664_v30  ;;  %v8214_v30 = vmov -1e+10   ;;  %7002 = vmatmul.msk.bf16.vlgmr.msra.gmra.mxu1 %vm1662_vm1, %v3420_v26  ;;  %v7893_v26 = vld [vmem:[%s9357_s6 + $0x1] ss:$0 sm:$0xff]  ;;  %s9375_s6 = sld [smem:[#allocation32_spill]] }
 0xb33   : > { %v1242_v32 = vsel %vm1241_vm14, 0.0, %v8214_v30  ;;  %v3442_v35 = vpop.f32.mrf.mxu0 }
 0xb34   : > { %v8782_v33 = vadd.f32 %v7892_v28, %v1242_v32  ;;  %v3503_v36 = vmul.f32 0.35355338, %v3442_v35 }
 0xb36   : > { %3283 = vmatpush.bf16.msra.mxu2 %v7663_v37  ;;  %v3507_v38 = vadd.f32 %v3503_v36, %v8782_v33 }
 0xb38   : > { %v3511_v41 = vsel %vm1662_vm1, %v3507_v38, -inf }
 0xb39   : > { %3512 = vmax.xlane.f32.xlu0 %v3511_v41 }
 0xb3b   : > { %v3444_v45 = vpop.f32.mrf.mxu0 }
 0xb41   : > { %6919 = vmatmul.msk.bf16.vlgmr.msrb.gmra.mxu2 %vm1357_vm0, %v8708_v2 }
 0xb42   : > { %3382 = vmatpush.bf16.msrb.mxu2 %v7672_v56  ;;  %v3360_v56 = vpop.f32.mrf.mxu1 }
 0xb46   : > { %3383 = vmatpush.bf16.msrb.mxu2 %v7671_v57 }
 0xb4a   : > { %v3362_v62 = vpop.f32.mrf.mxu1 }
 0xb51   : > { %6955 = vmatmul.msk.bf16.vlgmr.msra.gmra.mxu2 %vm1357_vm0, %v8708_v2 }
 0xb61   : > { %6991 = vmatmul.msk.bf16.vlgmr.msrb.gmra.mxu2 %vm1357_vm0, %v8708_v2 }
 0xbac   : > { %v3513_v9 = vpop.xlane.xlu0 %3512 }
 0xbb4   : > { %v2917_v60 = vpop.f32.mrf.mxu2 }
 0xbb5   : > { %v2918_v61 = vadd.f32 %v7886_v58, %v2917_v60  ;;  %v3361_v58 = vadd.f32 %v7896_v55, %v3360_v56 }
 0xbb7   : > { %v2921_v63 = vmax.f32 %v2918_v61, 0.0  ;;  %v3560_v60 = vpack.c.bf16 %v3361_v58, %v3361_v58  ;;  %v3414_v58 = vld [vmem:[%s9372_s18] sm:$0xf] }
 0xbb9   : > { %v2922_v1 = vpack.c.bf16 %v2921_v63, %v2921_v63  ;;  %v3586_v61 = vsel %vm1805_vm2, %v3560_v60, 0 }
 0xbba   : > { %3595 = vmatpush.bf16.msrb.mxu1 %v3586_v61 }
 0xbbb   : > { %6890 = vmatmul.msk.bf16.vlgmr.msra.gmra.mxu3 %vm2081_vm7, %v2922_v1 }
 0xbbc   : > { %v2919_v12 = vpop.f32.mrf.mxu2  ;;  %3307 = vmatpush.bf16.msra.mxu3 %v7666_v0 }
 0xbc0   : > { %3308 = vmatpush.bf16.msra.mxu3 %v7665_v5 }
 0xbc4   : > { %v3185_v15 = vpop.f32.mrf.mxu2 }
 0xbc5   : > { %v3186_v43 = vadd.f32 %v7887_v39, %v3185_v15  ;;  %v3523_v15 = vsub.f32 %v3507_v38, %v3513_v9 }
 0xbc7   : > { %v3421_v47 = vpack.c.bf16 %v3186_v43, %v3186_v43  ;;  %v3527_v21 = vmul.f32 1.442695, %v3523_v15 }
 0xbc9   : > { %7998 = vpow2.f32 %v3527_v21 }
 0xbcb   : > { %6928 = vmatmul.msk.bf16.vlgmr.msrb.gmra.mxu3 %vm1357_vm0, %v8708_v2 }
 0xbcc   : > { %v3187_v27 = vpop.f32.mrf.mxu2  ;;  %3407 = vmatpush.bf16.msrb.mxu3 %v7674_v48 }
 0xbcf   : > { %v7999_v25 = vpop.eup %7998 }
 0xbd0   : > { %3408 = vmatpush.bf16.msrb.mxu3 %v7673_v49  ;;  %v3535_v27 = vsel %vm1662_vm1, %v7999_v25, 0.0 }
 0xbd4   : > { %v3285_v37 = vpop.f32.mrf.mxu2 }
 0xbd5   : > { %v3286_v40 = vadd.f32 %v7889_v34, %v3285_v37  ;;  %v7898_v34 = vld [vmem:[%s9370_s5 + $0xb] ss:$0 sm:$0xff] }
 0xbd7   : > { %v3425_v42 = vpack.c.bf16 %v3286_v40, %v3286_v40 }
 0xbd9   : > { %v3469_v44 = vsel %vm1662_vm1, %v3425_v42, 0 }
 0xbda   : > { %3478 = vmatpush.bf16.xpose.msra.mxu2 %v3469_v44 }
 0xbdb   : > { %6964 = vmatmul.msk.bf16.vlgmr.msra.gmra.mxu3 %vm1357_vm0, %v8708_v2 }
 0xbdc   : > { %v3287_v46 = vpop.f32.mrf.mxu2 }
 0xbe1   : > { %7003 = vmatmul.msk.bf16.vlgmr.msra.gmra.mxu2 %vm1662_vm1, %v3421_v47 }
 0xbe4   : > { %v3385_v51 = vpop.f32.mrf.mxu2 }
 0xbe5   : > { %v3386_v52 = vadd.f32 %v7895_v50, %v3385_v51 }
 0xbe7   : > { %v3561_v53 = vpack.c.bf16 %v3386_v52, %v3386_v52 }
 0xbe9   : > { %v3605_v54 = vsel %vm1805_vm2, %v3561_v53, 0 }
 0xbea   : > { %3614 = vmatpush.bf16.msrb.mxu2 %v3605_v54 }
 0xbeb   : > { %7000 = vmatmul.msk.bf16.vlgmr.msrb.gmra.mxu3 %vm1357_vm0, %v8708_v2  ;;  %v3461_v2 = vpop.f32.mrf.mxu1 }
 0xbec   : > { %v3387_v57 = vpop.f32.mrf.mxu2  ;;  %v3504_v18 = vmul.f32 0.35355338, %v3461_v2 }
 0xbee   : > { %v3508_v22 = vadd.f32 %v3504_v18, %v8782_v33  ;;  %v3417_v18 = vld [vmem:[%s9372_s18 + $0xc] sm:$0xf] }
 0xbf0   : > { %v3514_v24 = vsel %vm1662_vm1, %v3508_v22, -inf }
 0xbf3   : > { %v3463_v1 = vpop.f32.mrf.mxu1 }
 0xc3e   : > { %v2973_v59 = vpop.f32.mrf.mxu3 }
 0xc3f   : > { %v2974_v28 = vadd.f32 %v7893_v26, %v2973_v59  ;;  %v3647_v59 = vsel %vm1805_vm2, %v3414_v58, 0 }
 0xc40   : > { %3656 = vmatpush.bf16.msra.mxu0 %v3647_v59  ;;  %v7676_v59 = vld [vmem:[%s9374_s3 + $0x8] sm:$0xff] }
 0xc41   : > { %v8811_v30 = vadd.f32 %v2974_v28, %v8725_v29 }
 0xc43   : > { %v2982_v32 = vsel %vm1357_vm0, %v8811_v30, 0.0 }
 0xc46   : > { %v2975_v63 = vpop.f32.mrf.mxu3 }
 0xc4e   : > { %v3210_v0 = vpop.f32.mrf.mxu3 }
 0xc4f   : > { %v3211_v11 = vadd.f32 %v7894_v6, %v3210_v0 }
 0xc51   : > { %v3422_v19 = vpack.c.bf16 %v3211_v11, %v3211_v11  ;;  %v3416_v11 = vld [vmem:[%s9372_s18 + $0x8] sm:$0xf] }
 0xc56   : > { %v3212_v16 = vpop.f32.mrf.mxu3 }
 0xc5e   : > { %v3310_v12 = vpop.f32.mrf.mxu3 }
 0xc5f   : > { %v3311_v5 = vadd.f32 %v7897_v4, %v3310_v12 }
 0xc61   : > { %v3426_v7 = vpack.c.bf16 %v3311_v5, %v3311_v5 }
 0xc63   : > { %v3488_v8 = vsel %vm1662_vm1, %v3426_v7, 0 }
 0xc64   : > { %v3480_v10 = vpop.f32.mrf.mxu2  ;;  %3497 = vmatpush.bf16.xpose.msra.mxu3 %v3488_v8 }
 0xc65   : > { %v3505_v13 = vmul.f32 0.35355338, %v3480_v10 }
 0xc66   : > { %v3312_v14 = vpop.f32.mrf.mxu3 }
 0xc67   : > { %v3509_v17 = vadd.f32 %v3505_v13, %v8782_v33  ;;  %v3685_v13 = vsel %vm1805_vm2, %v3416_v11, 0  ;;  %v3415_v14 = vld [vmem:[%s9372_s18 + $0x4] sm:$0xf]  ;;  %v7685_v11 = vld [vmem:[%s9375_s6 + $0x10] sm:$0xff] }
 0xc68   : > { %3694 = vmatpush.bf16.msra.mxu2 %v3685_v13  ;;  %v3666_v15 = vsel %vm1805_vm2, %v3415_v14, 0  ;;  %v7687_v14 = vld [vmem:[%s9375_s6 + $0x20] sm:$0xff] }
 0xc69   : > { %v3517_v20 = vsel %vm1662_vm1, %v3509_v17, -inf  ;;  %3675 = vmatpush.bf16.msra.mxu1 %v3666_v15  ;;  %v7689_v15 = vld [vmem:[%s9375_s6 + $0x30] sm:$0xff] }
 0xc6a   : > { %3518 = vmax.xlane.f32.xlu1 %v3517_v20 }
 0xc6b   : > { %7004 = vmatmul.msk.bf16.vlgmr.msra.gmra.mxu3 %vm1662_vm1, %v3422_v19  ;;  %v3704_v19 = vsel %vm1805_vm2, %v3417_v18, 0 }
 0xc6c   : > { %v3482_v23 = vpop.f32.mrf.mxu2 }
 0xc6e   : > { %v3410_v35 = vpop.f32.mrf.mxu3 }
 0xc6f   : > { %v3411_v36 = vadd.f32 %v7898_v34, %v3410_v35 }
 0xc71   : > { %v3562_v37 = vpack.c.bf16 %v3411_v36, %v3411_v36 }
 0xc72   : > { %3515 = vmax.xlane.f32.xlu1 %v3514_v24 }
 0xc73   : > { %v3624_v38 = vsel %vm1805_vm2, %v3562_v37, 0 }
 0xc74   : > { %3633 = vmatpush.bf16.msrb.mxu3 %v3624_v38 }
 0xc76   : > { %v3412_v39 = vpop.f32.mrf.mxu3 }
 0xc78   : > { %3713 = vmatpush.bf16.msra.mxu3 %v3704_v19 }
 0xc7a   : > { %3536 = vadd.xlane.f32.xlu1 %v3535_v27 }
 0xc82   : > { %2983 = vadd.xlane.f32.xlu1 %v2982_v32 }
 0xcdd   : > { %v3519_v40 = vpop.xlane.xlu1 %3518 }
 0xcde   : > { %v3525_v42 = vsub.f32 %v3509_v17, %v3519_v40 }
 0xce0   : > { %v3531_v44 = vmul.f32 1.442695, %v3525_v42 }
 0xce5   : > { %v3516_v41 = vpop.xlane.xlu1 %3515 }
 0xce6   : > { %v3524_v47 = vsub.f32 %v3508_v22, %v3516_v41 }
 0xce8   : > { %v3529_v51 = vmul.f32 1.442695, %v3524_v47 }
 0xced   : > { %v3537_v43 = vpop.xlane.xlu1 %3536 }
 0xcee   : > { %8000 = vrcp.f32 %v3537_v43  ;;  %v3499_v29 = vpop.f32.mrf.mxu3 }
 0xcef   : > { %v3506_v45 = vmul.f32 0.35355338, %v3499_v29  ;;  %8002 = vpow2.f32 %v3531_v44  ;;  %v7899_v44 = vld [vmem:[%s9373_s10] ss:$0 sm:$0xff] }
 0xcf0   : > { %8004 = vpow2.f32 %v3529_v51 }
 0xcf1   : > { %v3510_v46 = vadd.f32 %v3506_v45, %v8782_v33 }
 0xcf3   : > { %v3520_v48 = vsel %vm1662_vm1, %v3510_v46, -inf }
 0xcf4   : > { %v8001_v49 = vpop.eup %8000  ;;  %3521 = vmax.xlane.f32.xlu2 %v3520_v48 }
 0xcf5   : > { %v3551_v50 = vmul.f32 %v8001_v49, %v7999_v25  ;;  %v8003_v54 = vpop.eup %8002  ;;  %v2984_v29 = vpop.xlane.xlu1 %2983 }
 0xcf6   : > { %v3501_v52 = vpop.f32.mrf.mxu3  ;;  %v3541_v55 = vsel %vm1662_vm1, %v8003_v54, 0.0  ;;  %v8005_v56 = vpop.eup %8004  ;;  %v2985_v47 = vmul.f32 %v2984_v29, %v8580_v3  ;;  %v7900_v29 = vld [vmem:[%s9354_s12 + $0x1] ss:$0 sm:$0xff]  ;;  %s9379_s12 = sld [smem:[#allocation31_spill]] }
 0xcf7   : > { %v3555_v53 = vpack.c.bf16 %v3551_v50, %v3551_v50  ;;  %v3538_v57 = vsel %vm1662_vm1, %v8005_v56, 0.0 }
 0xcf8   : > { %v8842_v50 = vsub.f32 %v8811_v30, %v2985_v47  ;;  %v7693_v47 = vld [vmem:[%s9375_s6 + $0x50] sm:$0xff] }
 0xcf9   : > { %7005 = vmatmul.msk.bf16.vlgmr.msrb.gmra.mxu0 %vm1662_vm1, %v3555_v53 }
 0xcfa   : > { %v2987_v53 = vmul.f32 %v8842_v50, %v8842_v50  ;;  %3813 = vmatpush.bf16.msrb.mxu0 %v7676_v59  ;;  %v7909_v59 = vld [vmem:[%s9378_s14 + $0x1] ss:$0 sm:$0xff] }
 0xcfc   : > { %3542 = vadd.xlane.f32.xlu2 %v3541_v55 }
 0xd04   : > { %3539 = vadd.xlane.f32.xlu2 %v3538_v57 }
 0xd67   : > { %v3522_v60 = vpop.xlane.xlu2 %3521 }
 0xd68   : > { %v3526_v61 = vsub.f32 %v3510_v46, %v3522_v60  ;;  %v7678_v60 = vld [vmem:[%s9374_s3 + $0x18] sm:$0xff] }
 0xd6a   : > { %v3533_v62 = vmul.f32 1.442695, %v3526_v61  ;;  %v7680_v61 = vld [vmem:[%s9374_s3 + $0x28] sm:$0xff] }
 0xd6c   : > { %8006 = vpow2.f32 %v3533_v62  ;;  %v7682_v62 = vld [vmem:[%s9374_s3 + $0x38] sm:$0xff] }
 0xd6f   : > { %v3543_v63 = vpop.xlane.xlu2 %3542 }
 0xd70   : > { %8008 = vrcp.f32 %v3543_v63 }
 0xd72   : > { %v8007_v2 = vpop.eup %8006 }
 0xd73   : > { %v3544_v0 = vsel %vm1662_vm1, %v8007_v2, 0.0 }
 0xd74   : > { %3545 = vadd.xlane.f32.xlu0 %v3544_v0  ;;  %v7677_v0 = vld [vmem:[%s9374_s3 + $0x10] sm:$0xff] }
 0xd76   : > { %v8009_v1 = vpop.eup %8008  ;;  %v3578_v16 = vpop.f32.mrf.mxu0 }
 0xd77   : > { %v3553_v4 = vmul.f32 %v8009_v1, %v8003_v54  ;;  %v3639_v12 = vpack.c.bf16 %v3578_v16, %v3578_v16  ;;  %v3540_v5 = vpop.xlane.xlu2 %3539  ;;  %v2988_v54 = vsel %vm1357_vm0, %v2987_v53, 0.0  ;;  %v7679_v1 = vld [vmem:[%s9374_s3 + $0x20] sm:$0xff]  ;;  %v7681_v16 = vld [vmem:[%s9374_s3 + $0x30] sm:$0xff] }
 0xd78   : > { %8010 = vrcp.f32 %v3540_v5  ;;  %v7684_v5 = vld [vmem:[%s9375_s6 + $0x8] sm:$0xff] }
 0xd79   : > { %v3557_v6 = vpack.c.bf16 %v3553_v4, %v3553_v4  ;;  %7009 = vmatmul.msk.bf16.vlgmr.msra.gmra.mxu0 %vm1662_vm1, %v3639_v12 }
 0xd7b   : > { %7007 = vmatmul.msk.bf16.vlgmr.msrb.gmra.mxu2 %vm1662_vm1, %v3557_v6  ;;  %v7686_v6 = vld [vmem:[%s9375_s6 + $0x18] sm:$0xff] }
 0xd7c   : > { %3863 = vmatpush.bf16.msrb.mxu2 %v7680_v61 }
 0xd7e   : > { %v8011_v7 = vpop.eup %8010  ;;  %v3580_v8 = vpop.f32.mrf.mxu0 }
 0xd7f   : > { %v3552_v9 = vmul.f32 %v8011_v7, %v8005_v56  ;;  %v7688_v7 = vld [vmem:[%s9375_s6 + $0x28] sm:$0xff] }
 0xd80   : > { %3864 = vmatpush.bf16.msrb.mxu2 %v7679_v1  ;;  %v7904_v1 = vld [vmem:[%s9379_s12] ss:$0 sm:$0xff] }
 0xd81   : > { %v3556_v10 = vpack.c.bf16 %v3552_v9, %v3552_v9  ;;  %v7690_v9 = vld [vmem:[%s9375_s6 + $0x38] sm:$0xff] }
 0xd83   : > { %7006 = vmatmul.msk.bf16.vlgmr.msrb.gmra.mxu1 %vm1662_vm1, %v3556_v10  ;;  %v7683_v10 = vld [vmem:[%s9375_s6] sm:$0xff] }
 0xd84   : > { %3838 = vmatpush.bf16.msrb.mxu1 %v7678_v60 }
 0xd88   : > { %3839 = vmatpush.bf16.msrb.mxu1 %v7677_v0 }
 0xde7   : > { %v3546_v17 = vpop.xlane.xlu0 %3545 }
 0xde8   : > { %8012 = vrcp.f32 %v3546_v17 }
 0xdee   : > { %v8013_v20 = vpop.eup %8012 }
 0xdef   : > { %v3554_v21 = vmul.f32 %v8013_v20, %v8007_v2  ;;  %v7675_v2 = vld [vmem:[%s9374_s3] sm:$0xff] }
 0xdf0   : > { %3814 = vmatpush.bf16.msrb.mxu0 %v7675_v2 }
 0xdf1   : > { %v3558_v22 = vpack.c.bf16 %v3554_v21, %v3554_v21 }
 0xdf3   : > { %7008 = vmatmul.msk.bf16.vlgmr.msrb.gmra.mxu3 %vm1662_vm1, %v3558_v22 }
 0xdf4   : > { %3888 = vmatpush.bf16.msrb.mxu3 %v7682_v62  ;;  %3980 = vmatpush.bf16.msra.mxu0 %v7684_v5  ;;  %v7910_v5 = vld [vmem:[%s9378_s14 + $0x2] ss:$0 sm:$0xff] }
 0xdf6   : > { %v3658_v23 = vpop.f32.mrf.mxu0 }
 0xdf8   : > { %3889 = vmatpush.bf16.msrb.mxu3 %v7681_v16  ;;  %3981 = vmatpush.bf16.msra.mxu0 %v7683_v10 }
 0xdfe   : > { %v3616_v24 = vpop.f32.mrf.mxu2  ;;  %v3660_v25 = vpop.f32.mrf.mxu0 }
 0xdff   : > { %v3641_v26 = vpack.c.bf16 %v3616_v24, %v3616_v24 }
 0xe00   : > { %v3597_v27 = vpop.f32.mrf.mxu1 }
 0xe01   : > { %v3640_v28 = vpack.c.bf16 %v3597_v27, %v3597_v27  ;;  %7011 = vmatmul.msk.bf16.vlgmr.msra.gmra.mxu2 %vm1662_vm1, %v3641_v26  ;;  %v7902_v27 = vld [vmem:[%s9376_s8] ss:$0 sm:$0xff] }
 0xe02   : > { %4030 = vmatpush.bf16.msra.mxu2 %v7688_v7 }
 0xe03   : > { %7010 = vmatmul.msk.bf16.vlgmr.msra.gmra.mxu1 %vm1662_vm1, %v3640_v28 }
 0xe04   : > { %4005 = vmatpush.bf16.msra.mxu1 %v7686_v6  ;;  %v7911_v6 = vld [vmem:[%s9378_s14 + $0x3] ss:$0 sm:$0xff] }
 0xe06   : > { %v3618_v32 = vpop.f32.mrf.mxu2  ;;  %4031 = vmatpush.bf16.msra.mxu2 %v7687_v14 }
 0xe08   : > { %v3599_v34 = vpop.f32.mrf.mxu1  ;;  %4006 = vmatpush.bf16.msra.mxu1 %v7685_v11 }
 0xe09   : > { %v7903_v34 = vld [vmem:[%s9377_s13] ss:$0 sm:$0xff] }
 0xe76   : > { %v3635_v35 = vpop.f32.mrf.mxu3 }
 0xe77   : > { %v3642_v36 = vpack.c.bf16 %v3635_v35, %v3635_v35 }
 0xe79   : > { %7012 = vmatmul.msk.bf16.vlgmr.msra.gmra.mxu3 %vm1662_vm1, %v3642_v36 }
 0xe7a   : > { %4055 = vmatpush.bf16.msra.mxu3 %v7690_v9 }
 0xe7e   : > { %v3637_v37 = vpop.f32.mrf.mxu3  ;;  %4056 = vmatpush.bf16.msra.mxu3 %v7689_v15 }
 0xe80   : > { %v3677_v38 = vpop.f32.mrf.mxu1 }
 0xe81   : > { %v3719_v39 = vadd.f32 %v3677_v38, %v3658_v23 }
 0xe84   : > { %v3696_v40 = vpop.f32.mrf.mxu2 }
 0xe85   : > { %v3720_v41 = vadd.f32 %v3719_v39, %v3696_v40  ;;  %v7692_v40 = vld [vmem:[%s9375_s6 + $0x48] sm:$0xff] }
 0xe88   : > { %v3679_v42 = vpop.f32.mrf.mxu1 }
 0xe8c   : > { %v3698_v43 = vpop.f32.mrf.mxu2 }
 0xe8d   : > { %v7696_v43 = vld [vmem:[%s9375_s6 + $0x68] sm:$0xff] }
 0xefc   : > { %v3715_v45 = vpop.f32.mrf.mxu3 }
 0xefd   : > { %v3721_v46 = vadd.f32 %v3720_v41, %v3715_v45  ;;  %v7694_v41 = vld [vmem:[%s9375_s6 + $0x58] sm:$0xff] }
 0xeff   : > { %v3725_v48 = vadd.f32 %v7899_v44, %v3721_v46  ;;  %v7698_v44 = vld [vmem:[%s9375_s6 + $0x78] sm:$0xff]  ;;  %v7691_v46 = vld [vmem:[%s9375_s6 + $0x40] sm:$0xff] }
 0xf01   : > { %v3726_v49 = vadd.f32 %v3725_v48, %v8703_v31  ;;  %v7695_v48 = vld [vmem:[%s9375_s6 + $0x60] sm:$0xff] }
 0xf03   : > { %v3729_v51 = vsel %vm1357_vm0, %v3726_v49, 0.0 }
 0xf04   : > { %3730 = vadd.xlane.f32.xlu0 %v3729_v51  ;;  %v3717_v52 = vpop.f32.mrf.mxu3  ;;  %v7901_v51 = vld [vmem:[%s9352_s20 + $0x1] ss:$0 sm:$0xff]  ;;  %s9381_s20 = sld [smem:[#allocation35_spill]] }
 0xf0c   : > { %2989 = vadd.xlane.f32.xlu0 %v2988_v54 }
 0xf77   : > { %v3731_v55 = vpop.xlane.xlu0 %3730 }
 0xf78   : > { %v3732_v31 = vmul.f32 %v3731_v55, %v8580_v3 }
 0xf7a   : > { %v3733_v56 = vsub.f32 %v3726_v49, %v3732_v31  ;;  %v7697_v49 = vld [vmem:[%s9375_s6 + $0x70] sm:$0xff] }
 0xf7c   : > { %v3734_v30 = vmul.f32 %v3733_v56, %v3733_v56 }
 0xf7e   : > { %v3735_v57 = vsel %vm1357_vm0, %v3734_v30, 0.0 }
 0xf7f   : > { %3736 = vadd.xlane.f32.xlu2 %v3735_v57  ;;  %v2990_v58 = vpop.xlane.xlu0 %2989 }
 0xf80   : > { %v2991_v63 = vmul.f32 %v2990_v58, %v8580_v3  ;;  %v7908_v58 = vld [vmem:[%s9378_s14] ss:$0 sm:$0xff] }
 0xf82   : > { %v2992_v4 = vadd.f32 1e-05, %v2991_v63 }
 0xf84   : > { %8014 = vrsqrt.f32 %v2992_v4  ;;  %vm2999_vm6 = vweird.f32 %v2992_v4 }
 0xf8a   : > { %v8015_v17 = vpop.eup %8014 }
 0xf8b   : > { %v2994_v18 = vmul.f32 %v8015_v17, %v2992_v4  ;;  %vm3000_vm5 = vweird.f32 %v8015_v17 }
 0xf8c   : > { %vm3001_vm8 = vmor %vm2999_vm6, %vm3000_vm5 }
 0xf8d   : > { %v2995_v21 = vmul.f32 %v8015_v17, %v2994_v18 }
 0xf8f   : > { %v2996_v24 = vmul.f32 0.5, %v2995_v21 }
 0xf91   : > { %v2997_v28 = vsub.f32 1.5, %v2996_v24 }
 0xf93   : > { %v2998_v37 = vmul.f32 %v8015_v17, %v2997_v28  ;;  %v7913_v28 = vld [vmem:[%s9378_s14 + $0x5] ss:$0 sm:$0xff] }
 0xf95   : > { %v3002_v42 = vsel %vm3001_vm8, %v8015_v17, %v2998_v37 }
 0xf96   : > { %v3003_v45 = vmul.f32 %v3002_v42, %v8842_v50 }
 0xf98   : > { %v3007_v52 = vmul.f32 %v7900_v29, %v3003_v45  ;;  %v7914_v45 = vld [vmem:[%s9378_s14 + $0x6] ss:$0 sm:$0xff] }
 0xf9a   : > { %v3011_v53 = vadd.f32 %v7901_v51, %v3007_v52 }
 0xf9c   : > { %v8889_v54 = vpack.c.bf16 %v3011_v53, %v3011_v53 }
 0xff2   : > { %v3737_v12 = vpop.xlane.xlu2 %3736 }
 0xff3   : > { %v3738_v8 = vmul.f32 %v3737_v12, %v8580_v3  ;;  %v7905_v12 = vld [vmem:[%s9379_s12 + $0x1] ss:$0 sm:$0xff] }
 0xff5   : > { %v3739_v13 = vadd.f32 1e-05, %v3738_v8 }
 0xff7   : > { %8016 = vrsqrt.f32 %v3739_v13  ;;  %vm3746_vm3 = vweird.f32 %v3739_v13 }
 0xffd   : > { %v8017_v19 = vpop.eup %8016 }
 0xffe   : > { %v3741_v20 = vmul.f32 %v8017_v19, %v3739_v13  ;;  %vm3747_vm15 = vweird.f32 %v8017_v19 }
 0xfff   : > { %vm3748_vm4 = vmor %vm3746_vm3, %vm3747_vm15 }
0x1000   : > { %v3742_v22 = vmul.f32 %v8017_v19, %v3741_v20  ;;  %v7907_v20 = vld [vmem:[%s9379_s12 + $0x3] ss:$0 sm:$0xff] }
0x1002   : > { %v3743_v23 = vmul.f32 0.5, %v3742_v22 }
0x1004   : > { %v3744_v25 = vsub.f32 1.5, %v3743_v23 }
0x1006   : > { %v3745_v26 = vmul.f32 %v8017_v19, %v3744_v25 }
0x1008   : > { %v3749_v32 = vsel %vm3748_vm4, %v8017_v19, %v3745_v26  ;;  %v7906_v19 = vld [vmem:[%s9379_s12 + $0x2] ss:$0 sm:$0xff] }
0x1009   : > { %v3750_v35 = vmul.f32 %v3749_v32, %v3733_v56 }
0x100b   : > { %v3754_v36 = vmul.f32 %v7902_v27, %v3750_v35  ;;  %v7912_v27 = vld [vmem:[%s9378_s14 + $0x4] ss:$0 sm:$0xff] }
0x100d   : > { %v8870_v38 = vadd.f32 %v7903_v34, %v3754_v36 }
0x100f   : > { %v3759_v39 = vpack.c.bf16 %v8870_v38, %v8870_v38 }
0x1011   : > { %7021 = vmatmul.msk.bf16.vlgmr.msrb.gmra.mxu0 %vm1357_vm0, %v3759_v39  ;;  %7030 = vmatmul.msk.bf16.vlgmr.msrb.gmra.mxu1 %vm1357_vm0, %v3759_v39 }
0x1012   : > { %7039 = vmatmul.msk.bf16.vlgmr.msrb.gmra.mxu2 %vm1357_vm0, %v3759_v39  ;;  %7048 = vmatmul.msk.bf16.vlgmr.msrb.gmra.mxu3 %vm1357_vm0, %v3759_v39 }
0x1013   : > { %4080 = vmatpush.bf16.msrb.mxu0 %v7692_v40  ;;  %4105 = vmatpush.bf16.msrb.mxu1 %v7694_v41 }
0x1014   : > { %4130 = vmatpush.bf16.msrb.mxu2 %v7696_v43  ;;  %4155 = vmatpush.bf16.msrb.mxu3 %v7698_v44 }
0x1017   : > { %4081 = vmatpush.bf16.msrb.mxu0 %v7691_v46  ;;  %4106 = vmatpush.bf16.msrb.mxu1 %v7693_v47  ;;  %v7915_v46 = vld [vmem:[%s9378_s14 + $0x7] ss:$0 sm:$0xff] }
0x1018   : > { %4131 = vmatpush.bf16.msrb.mxu2 %v7695_v48  ;;  %4156 = vmatpush.bf16.msrb.mxu3 %v7697_v49 }
0x1021   : > { %7057 = vmatmul.msk.bf16.vlgmr.msra.gmra.mxu0 %vm1357_vm0, %v8889_v54  ;;  %7066 = vmatmul.msk.bf16.vlgmr.msra.gmra.mxu1 %vm1357_vm0, %v8889_v54 }
0x1022   : > { %7075 = vmatmul.msk.bf16.vlgmr.msra.gmra.mxu2 %vm1357_vm0, %v8889_v54  ;;  %7084 = vmatmul.msk.bf16.vlgmr.msra.gmra.mxu3 %vm1357_vm0, %v8889_v54 }
0x1031   : > { %7093 = vmatmul.msk.bf16.vlgmr.msrb.gmra.mxu0 %vm1357_vm0, %v8889_v54  ;;  %7102 = vmatmul.msk.bf16.vlgmr.msrb.gmra.mxu1 %vm1357_vm0, %v8889_v54 }
0x1032   : > { %7111 = vmatmul.msk.bf16.vlgmr.msrb.gmra.mxu2 %vm1357_vm0, %v8889_v54  ;;  %7120 = vmatmul.msk.bf16.vlgmr.msrb.gmra.mxu3 %vm1357_vm0, %v8889_v54 }
0x108e   : > { %v3816_v50 = vpop.f32.mrf.mxu0  ;;  %v3841_v55 = vpop.f32.mrf.mxu1 }
0x108f   : > { %v3817_v11 = vadd.f32 %v7904_v1, %v3816_v50  ;;  %v3842_v13 = vadd.f32 %v7905_v12, %v3841_v55 }
0x1091   : > { %v4167_v23 = vpack.c.bf16 %v3817_v11, %v3817_v11  ;;  %v4168_v24 = vpack.c.bf16 %v3842_v13, %v3842_v13 }
0x1095   : > { %v3866_v31 = vpop.f32.mrf.mxu2  ;;  %v3891_v56 = vpop.f32.mrf.mxu3 }
0x1096   : > { %v3818_v30 = vpop.f32.mrf.mxu0  ;;  %v3843_v57 = vpop.f32.mrf.mxu1  ;;  %v3867_v32 = vadd.f32 %v7906_v19, %v3866_v31  ;;  %v3892_v34 = vadd.f32 %v7907_v20, %v3891_v56 }
0x1098   : > { %v4169_v42 = vpack.c.bf16 %v3867_v32, %v3867_v32  ;;  %v4170_v43 = vpack.c.bf16 %v3892_v34, %v3892_v34 }
0x109d   : > { %v3868_v60 = vpop.f32.mrf.mxu2  ;;  %v3893_v61 = vpop.f32.mrf.mxu3 }
0x109e   : > { %v3983_v62 = vpop.f32.mrf.mxu0  ;;  %v4008_v63 = vpop.f32.mrf.mxu1 }
0x109f   : > { %v3984_v2 = vadd.f32 %v7908_v58, %v3983_v62  ;;  %v4009_v0 = vadd.f32 %v7909_v59, %v4008_v63  ;;  %v8076_v63 = vld [vmem:[%s8485_s7] ss:$0 sm:$0xff] }
0x10a1   : > { %v4171_v16 = vpack.c.bf16 %v3984_v2, %v3984_v2  ;;  %v4172_v4 = vpack.c.bf16 %v4009_v0, %v4009_v0 }
0x10a3   : > { %v4179_v7 = vsel %vm1662_vm1, %v4171_v16, 0  ;;  %v4198_v8 = vsel %vm1662_vm1, %v4172_v4, 0 }
0x10a4   : > { %4188 = vmatpush.bf16.xpose.msra.mxu0 %v4179_v7  ;;  %4207 = vmatpush.bf16.xpose.msra.mxu1 %v4198_v8 }
0x10a5   : > { %v4033_v9 = vpop.f32.mrf.mxu2  ;;  %v4058_v10 = vpop.f32.mrf.mxu3 }
0x10a6   : > { %v4034_v14 = vadd.f32 %v7910_v5, %v4033_v9  ;;  %v4059_v15 = vadd.f32 %v7911_v6, %v4058_v10  ;;  %v3985_v17 = vpop.f32.mrf.mxu0  ;;  %v4010_v18 = vpop.f32.mrf.mxu1 }
0x10a8   : > { %v4173_v21 = vpack.c.bf16 %v4034_v14, %v4034_v14  ;;  %v4174_v22 = vpack.c.bf16 %v4059_v15, %v4059_v15 }
0x10aa   : > { %v4217_v25 = vsel %vm1662_vm1, %v4173_v21, 0  ;;  %v4236_v26 = vsel %vm1662_vm1, %v4174_v22, 0 }
0x10ab   : > { %4226 = vmatpush.bf16.xpose.msra.mxu2 %v4217_v25  ;;  %4245 = vmatpush.bf16.xpose.msra.mxu3 %v4236_v26 }
0x10ac   : > { %7121 = vmatmul.msk.bf16.vlgmr.msra.gmra.mxu0 %vm1662_vm1, %v4167_v23  ;;  %7122 = vmatmul.msk.bf16.vlgmr.msra.gmra.mxu1 %vm1662_vm1, %v4168_v24 }
0x10ad   : > { %v4035_v35 = vpop.f32.mrf.mxu2  ;;  %v4060_v36 = vpop.f32.mrf.mxu3 }
0x10ae   : > { %v4083_v37 = vpop.f32.mrf.mxu0  ;;  %v4108_v39 = vpop.f32.mrf.mxu1 }
0x10af   : > { %v4084_v40 = vadd.f32 %v7912_v27, %v4083_v37  ;;  %v4109_v41 = vadd.f32 %v7913_v28, %v4108_v39 }
0x10b1   : > { %v4307_v44 = vpack.c.bf16 %v4084_v40, %v4084_v40  ;;  %v4308_v29 = vpack.c.bf16 %v4109_v41, %v4109_v41 }
0x10b2   : > { %7123 = vmatmul.msk.bf16.vlgmr.msra.gmra.mxu2 %vm1662_vm1, %v4169_v42  ;;  %7124 = vmatmul.msk.bf16.vlgmr.msra.gmra.mxu3 %vm1662_vm1, %v4170_v43 }
0x10b3   : > { %v4315_v47 = vsel %vm1805_vm2, %v4307_v44, 0  ;;  %v4334_v48 = vsel %vm1805_vm2, %v4308_v29, 0 }
0x10b4   : > { %4324 = vmatpush.bf16.msrb.mxu0 %v4315_v47  ;;  %4343 = vmatpush.bf16.msrb.mxu1 %v4334_v48 }
0x10b5   : > { %v4133_v49 = vpop.f32.mrf.mxu2  ;;  %v4158_v51 = vpop.f32.mrf.mxu3 }
0x10b6   : > { %v4134_v52 = vadd.f32 %v7914_v45, %v4133_v49  ;;  %v4159_v53 = vadd.f32 %v7915_v46, %v4158_v51  ;;  %v4085_v50 = vpop.f32.mrf.mxu0  ;;  %v4110_v55 = vpop.f32.mrf.mxu1 }
0x10b8   : > { %v4309_v31 = vpack.c.bf16 %v4134_v52, %v4134_v52  ;;  %v4310_v56 = vpack.c.bf16 %v4159_v53, %v4159_v53 }
0x10ba   : > { %v4353_v30 = vsel %vm1805_vm2, %v4309_v31, 0  ;;  %v4372_v57 = vsel %vm1805_vm2, %v4310_v56, 0 }
0x10bb   : > { %4362 = vmatpush.bf16.msrb.mxu2 %v4353_v30  ;;  %4381 = vmatpush.bf16.msrb.mxu3 %v4372_v57  ;;  %v4162_v57 = vld [vmem:[%s9380_s19] sm:$0xf] }
0x10bd   : > { %v4135_v58 = vpop.f32.mrf.mxu2  ;;  %v4160_v59 = vpop.f32.mrf.mxu3 }
0x10be   : > { %v4395_v58 = vsel %vm1805_vm2, %v4162_v57, 0  ;;  %v4164_v59 = vld [vmem:[%s9380_s19 + $0x8] sm:$0xf]  ;;  %v7701_v57 = vld [vmem:[%s9383_s24] sm:$0xff] }
0x10bf   : > { %4404 = vmatpush.bf16.msra.mxu0 %v4395_v58  ;;  %v7919_v58 = vld [vmem:[%s9386_s30] ss:$0 sm:$0xff] }
0x1129   : > { %v4190_v60 = vpop.f32.mrf.mxu0  ;;  %v4209_v61 = vpop.f32.mrf.mxu1 }
0x112a   : > { %v4251_v62 = vmul.f32 0.35355338, %v4190_v60  ;;  %v4252_v9 = vmul.f32 0.35355338, %v4209_v61  ;;  %v4165_v60 = vld [vmem:[%s9380_s19 + $0xc] sm:$0xf] }
0x112b   : > { %v4433_v61 = vsel %vm1805_vm2, %v4164_v59, 0 }
0x112c   : > { %v4255_v2 = vadd.f32 %v8076_v63, %v4251_v62  ;;  %v4256_v15 = vadd.f32 %v8076_v63, %v4252_v9  ;;  %v4452_v62 = vsel %vm1805_vm2, %v4165_v60, 0  ;;  %4442 = vmatpush.bf16.msra.mxu2 %v4433_v61 }
0x112d   : > { %4461 = vmatpush.bf16.msra.mxu3 %v4452_v62 }
0x112e   : > { %v4259_v0 = vsel %vm1662_vm1, %v4255_v2, -inf  ;;  %v4262_v17 = vsel %vm1662_vm1, %v4256_v15, -inf }
0x112f   : > { %4260 = vmax.xlane.f32.xlu0 %v4259_v0 }
0x1131   : > { %v4192_v1 = vpop.f32.mrf.mxu0  ;;  %v4211_v16 = vpop.f32.mrf.mxu1 }
0x1135   : > { %v4228_v4 = vpop.f32.mrf.mxu2  ;;  %v4247_v12 = vpop.f32.mrf.mxu3 }
0x1136   : > { %v4253_v5 = vmul.f32 0.35355338, %v4228_v4  ;;  %v4254_v6 = vmul.f32 0.35355338, %v4247_v12 }
0x1138   : > { %v4258_v7 = vadd.f32 %v8076_v63, %v4254_v6  ;;  %v4257_v8 = vadd.f32 %v8076_v63, %v4253_v5  ;;  %v4163_v63 = vld [vmem:[%s9380_s19 + $0x4] sm:$0xf] }
0x113a   : > { %v4268_v10 = vsel %vm1662_vm1, %v4258_v7, -inf  ;;  %v4265_v11 = vsel %vm1662_vm1, %v4257_v8, -inf }
0x113b   : > { %4269 = vmax.xlane.f32.xlu2 %v4268_v10  ;;  %4266 = vmax.xlane.f32.xlu1 %v4265_v11 }
0x113d   : > { %v4230_v13 = vpop.f32.mrf.mxu2  ;;  %v4249_v14 = vpop.f32.mrf.mxu3 }
0x1143   : > { %4263 = vmax.xlane.f32.xlu1 %v4262_v17 }
0x11a2   : > { %v4261_v18 = vpop.xlane.xlu0 %4260 }
0x11a3   : > { %v4271_v19 = vsub.f32 %v4255_v2, %v4261_v18  ;;  %v4414_v2 = vsel %vm1805_vm2, %v4163_v63, 0 }
0x11a4   : > { %4423 = vmatpush.bf16.msra.mxu1 %v4414_v2  ;;  %v7920_v2 = vld [vmem:[%s9387_s11] ss:$0 sm:$0xff] }
0x11a5   : > { %v4275_v20 = vmul.f32 1.442695, %v4271_v19 }
0x11a7   : > { %8018 = vpow2.f32 %v4275_v20 }
0x11ad   : > { %v8019_v21 = vpop.eup %8018 }
0x11ae   : > { %v4270_v22 = vpop.xlane.xlu2 %4269  ;;  %v4267_v23 = vpop.xlane.xlu1 %4266  ;;  %v4283_v24 = vsel %vm1662_vm1, %v8019_v21, 0.0 }
0x11af   : > { %v4274_v25 = vsub.f32 %v4258_v7, %v4270_v22  ;;  %v4273_v26 = vsub.f32 %v4257_v8, %v4267_v23  ;;  %4284 = vadd.xlane.f32.xlu1 %v4283_v24 }
0x11b1   : > { %v4281_v27 = vmul.f32 1.442695, %v4274_v25  ;;  %v4279_v28 = vmul.f32 1.442695, %v4273_v26 }
0x11b3   : > { %8020 = vpow2.f32 %v4281_v27 }
0x11b4   : > { %8022 = vpow2.f32 %v4279_v28 }
0x11b6   : > { %v4264_v32 = vpop.xlane.xlu1 %4263 }
0x11b7   : > { %v4272_v34 = vsub.f32 %v4256_v15, %v4264_v32 }
0x11b9   : > { %v8021_v35 = vpop.eup %8020  ;;  %v4277_v36 = vmul.f32 1.442695, %v4272_v34 }
0x11ba   : > { %v8023_v37 = vpop.eup %8022  ;;  %v4292_v39 = vsel %vm1662_vm1, %v8021_v35, 0.0 }
0x11bb   : > { %8024 = vpow2.f32 %v4277_v36  ;;  %v4289_v40 = vsel %vm1662_vm1, %v8023_v37, 0.0  ;;  %4293 = vadd.xlane.f32.xlu0 %v4292_v39  ;;  %v7700_v39 = vld [vmem:[%s9382_s21 + $0x8] sm:$0xff] }
0x11bc   : > { %4290 = vadd.xlane.f32.xlu2 %v4289_v40  ;;  %v7699_v40 = vld [vmem:[%s9382_s21] sm:$0xff] }
0x11c1   : > { %v8025_v41 = vpop.eup %8024 }
0x11c2   : > { %v4286_v42 = vsel %vm1662_vm1, %v8025_v41, 0.0 }
0x11c4   : > { %4287 = vadd.xlane.f32.xlu2 %v4286_v42 }
0x1222   : > { %v4285_v43 = vpop.xlane.xlu1 %4284 }
0x1223   : > { %8026 = vrcp.f32 %v4285_v43  ;;  %v7703_v43 = vld [vmem:[%s9383_s24 + $0x10] sm:$0xff] }
0x1229   : > { %v8027_v44 = vpop.eup %8026 }
0x122a   : > { %v4299_v29 = vmul.f32 %v8027_v44, %v8019_v21  ;;  %v7916_v21 = vld [vmem:[%s9381_s20] ss:$0 sm:$0xff] }
0x122c   : > { %v4303_v45 = vpack.c.bf16 %v4299_v29, %v4299_v29 }
0x122e   : > { %7125 = vmatmul.msk.bf16.vlgmr.msrb.gmra.mxu0 %vm1662_vm1, %v4303_v45  ;;  %v4294_v46 = vpop.xlane.xlu0 %4293 }
0x122f   : > { %v4291_v47 = vpop.xlane.xlu2 %4290  ;;  %8028 = vrcp.f32 %v4294_v46  ;;  %4537 = vmatpush.bf16.msrb.mxu0 %v7700_v39 }
0x1230   : > { %8030 = vrcp.f32 %v4291_v47 }
0x1233   : > { %4538 = vmatpush.bf16.msrb.mxu0 %v7699_v40 }
0x1235   : > { %v8029_v48 = vpop.eup %8028 }
0x1236   : > { %v8031_v49 = vpop.eup %8030  ;;  %v4302_v51 = vmul.f32 %v8029_v48, %v8021_v35 }
0x1237   : > { %v4301_v52 = vmul.f32 %v8031_v49, %v8023_v37  ;;  %v4288_v53 = vpop.xlane.xlu2 %4287 }
0x1238   : > { %v4306_v50 = vpack.c.bf16 %v4302_v51, %v4302_v51  ;;  %8032 = vrcp.f32 %v4288_v53  ;;  %v7917_v51 = vld [vmem:[%s9384_s25] ss:$0 sm:$0xff] }
0x1239   : > { %v4305_v55 = vpack.c.bf16 %v4301_v52, %v4301_v52  ;;  %v7918_v53 = vld [vmem:[%s9385_s29] ss:$0 sm:$0xff] }
0x123a   : > { %7128 = vmatmul.msk.bf16.vlgmr.msrb.gmra.mxu3 %vm1662_vm1, %v4306_v50 }
0x123b   : > { %7127 = vmatmul.msk.bf16.vlgmr.msrb.gmra.mxu2 %vm1662_vm1, %v4305_v55 }
0x123e   : > { %v8033_v31 = vpop.eup %8032 }
0x123f   : > { %v4300_v56 = vmul.f32 %v8033_v31, %v8025_v41  ;;  %v7704_v41 = vld [vmem:[%s9383_s24 + $0x18] sm:$0xff] }
0x1241   : > { %v4304_v30 = vpack.c.bf16 %v4300_v56, %v4300_v56 }
0x1243   : > { %7126 = vmatmul.msk.bf16.vlgmr.msrb.gmra.mxu1 %vm1662_vm1, %v4304_v30  ;;  %v7702_v30 = vld [vmem:[%s9383_s24 + $0x8] sm:$0xff] }
0x1244   : > { %4589 = vmatpush.bf16.msrb.mxu1 %v7704_v41 }
0x1248   : > { %4590 = vmatpush.bf16.msrb.mxu1 %v7703_v43  ;;  %v7922_v43 = vld [vmem:[%s9390_s16] ss:$0 sm:$0xff] }
0x124c   : > { %4591 = vmatpush.bf16.msrb.mxu1 %v7702_v30 }
0x1250   : > { %4592 = vmatpush.bf16.msrb.mxu1 %v7701_v57 }
0x12ab   : > { %v4326_v0 = vpop.f32.mrf.mxu0 }
0x12ac   : > { %v4387_v1 = vpack.c.bf16 %v4326_v0, %v4326_v0 }
0x12ae   : > { %7129 = vmatmul.msk.bf16.vlgmr.msra.gmra.mxu0 %vm1662_vm1, %v4387_v1 }
0x12b3   : > { %v4328_v16 = vpop.f32.mrf.mxu0 }
0x12bd   : > { %v4383_v4 = vpop.f32.mrf.mxu3 }
0x12be   : > { %v4364_v12 = vpop.f32.mrf.mxu2  ;;  %v4390_v5 = vpack.c.bf16 %v4383_v4, %v4383_v4 }
0x12bf   : > { %v4389_v6 = vpack.c.bf16 %v4364_v12, %v4364_v12 }
0x12c0   : > { %v4345_v7 = vpop.f32.mrf.mxu1  ;;  %7132 = vmatmul.msk.bf16.vlgmr.msra.gmra.mxu3 %vm1662_vm1, %v4390_v5 }
0x12c1   : > { %v4388_v8 = vpack.c.bf16 %v4345_v7, %v4345_v7  ;;  %7131 = vmatmul.msk.bf16.vlgmr.msra.gmra.mxu2 %vm1662_vm1, %v4389_v6 }
0x12c3   : > { %7130 = vmatmul.msk.bf16.vlgmr.msra.gmra.mxu1 %vm1662_vm1, %v4388_v8 }
0x12c5   : > { %v4385_v9 = vpop.f32.mrf.mxu3 }
0x12c6   : > { %v4366_v10 = vpop.f32.mrf.mxu2 }
0x12c7   : > { %v7706_v10 = vld [vmem:[%s9368_s1 + $0xc8] sm:$0xff] }
0x12c8   : > { %v4347_v11 = vpop.f32.mrf.mxu1  ;;  %4751 = vmatpush.bf16.msrb.mxu2 %v7706_v10 }
0x12c9   : > { %v7708_v11 = vld [vmem:[%s9368_s1 + $0xd8] sm:$0xff] }
0x12ca   : > { %4776 = vmatpush.bf16.msrb.mxu3 %v7708_v11 }
0x132b   : > { %v4406_v13 = vpop.f32.mrf.mxu0 }
0x1333   : > { %v4408_v14 = vpop.f32.mrf.mxu0 }
0x1334   : > { %v7712_v14 = vld [vmem:[%s9368_s1 + $0xf8] sm:$0xff] }
0x1335   : > { %4826 = vmatpush.bf16.msra.mxu1 %v7712_v14 }
0x1340   : > { %v4425_v15 = vpop.f32.mrf.mxu1 }
0x1341   : > { %v4467_v17 = vadd.f32 %v4425_v15, %v4406_v13  ;;  %v7710_v13 = vld [vmem:[%s9368_s1 + $0xe8] sm:$0xff]  ;;  %v7705_v15 = vld [vmem:[%s9368_s1 + $0xc0] sm:$0xff] }
0x1342   : > { %4801 = vmatpush.bf16.msra.mxu0 %v7710_v13  ;;  %4752 = vmatpush.bf16.msrb.mxu2 %v7705_v15 }
0x1343   : > { %v4463_v18 = vpop.f32.mrf.mxu3 }
0x1344   : > { %v4444_v19 = vpop.f32.mrf.mxu2 }
0x1345   : > { %v4468_v20 = vadd.f32 %v4467_v17, %v4444_v19  ;;  %v7707_v17 = vld [vmem:[%s9368_s1 + $0xd0] sm:$0xff] }
0x1346   : > { %v7711_v19 = vld [vmem:[%s9368_s1 + $0xf0] sm:$0xff]  ;;  %4777 = vmatpush.bf16.msrb.mxu3 %v7707_v17 }
0x1347   : > { %v4469_v22 = vadd.f32 %v4468_v20, %v4463_v18  ;;  %v7709_v18 = vld [vmem:[%s9368_s1 + $0xe0] sm:$0xff]  ;;  %4827 = vmatpush.bf16.msra.mxu1 %v7711_v19  ;;  %v7925_v19 = vld [vmem:[%s9370_s5 + $0xc] ss:$0 sm:$0xff] }
0x1348   : > { %v4427_v23 = vpop.f32.mrf.mxu1  ;;  %4802 = vmatpush.bf16.msra.mxu0 %v7709_v18 }
0x1349   : > { %v4473_v24 = vadd.f32 %v7916_v21, %v4469_v22  ;;  %v7714_v21 = vld [vmem:[%s9368_s1 + $0x108] sm:$0xff]  ;;  %v7716_v22 = vld [vmem:[%s9368_s1 + $0x118] sm:$0xff] }
0x134a   : > { %v7718_v23 = vld [vmem:[%s9368_s1 + $0x128] sm:$0xff]  ;;  %4851 = vmatpush.bf16.msra.mxu2 %v7714_v21  ;;  %4876 = vmatpush.bf16.msra.mxu3 %v7716_v22 }
0x134b   : > { %v4465_v25 = vpop.f32.mrf.mxu3  ;;  %v4474_v26 = vadd.f32 %v4473_v24, %v8870_v38 }
0x134c   : > { %v4446_v27 = vpop.f32.mrf.mxu2  ;;  %v7720_v25 = vld [vmem:[%s9368_s1 + $0x138] sm:$0xff] }
0x134d   : > { %v4477_v28 = vsel %vm1357_vm0, %v4474_v26, 0.0  ;;  %v7715_v27 = vld [vmem:[%s9368_s1 + $0x110] sm:$0xff] }
0x134e   : > { %4478 = vadd.xlane.f32.xlu0 %v4477_v28  ;;  %4877 = vmatpush.bf16.msra.mxu3 %v7715_v27 }
0x13c1   : > { %v4479_v32 = vpop.xlane.xlu0 %4478 }
0x13c2   : > { %v4480_v34 = vmul.f32 %v4479_v32, %v8580_v3  ;;  %v7717_v32 = vld [vmem:[%s9368_s1 + $0x120] sm:$0xff] }
0x13c4   : > { %v4481_v35 = vsub.f32 %v4474_v26, %v4480_v34  ;;  %v7713_v26 = vld [vmem:[%s9368_s1 + $0x100] sm:$0xff]  ;;  %v7719_v34 = vld [vmem:[%s9368_s1 + $0x130] sm:$0xff] }
0x13c5   : > { %4852 = vmatpush.bf16.msra.mxu2 %v7713_v26 }
0x13c6   : > { %v4482_v36 = vmul.f32 %v4481_v35, %v4481_v35 }
0x13c8   : > { %v4483_v37 = vsel %vm1357_vm0, %v4482_v36, 0.0 }
0x13c9   : > { %4484 = vadd.xlane.f32.xlu1 %v4483_v37 }
0x143c   : > { %v4485_v38 = vpop.xlane.xlu1 %4484 }
0x143d   : > { %v4486_v42 = vmul.f32 %v4485_v38, %v8580_v3  ;;  %v7921_v38 = vld [vmem:[%s9388_s26] ss:$0 sm:$0xff]  ;;  %s9162_s26 = sand.u32 1, %s8164_s23  }
0x143f   : > { %v4487_v44 = vadd.f32 1e-05, %v4486_v42 }
0x1441   : > { %8034 = vrsqrt.f32 %v4487_v44  ;;  %vm4494_vm10 = vweird.f32 %v4487_v44 }
0x1447   : > { %v8035_v29 = vpop.eup %8034 }
0x1448   : > { %v4489_v45 = vmul.f32 %v8035_v29, %v4487_v44  ;;  %vm4495_vm9 = vweird.f32 %v8035_v29 }
0x1449   : > { %vm4496_vm11 = vmor %vm4494_vm10, %vm4495_vm9 }
0x144a   : > { %v4490_v46 = vmul.f32 %v8035_v29, %v4489_v45 }
0x144c   : > { %v4491_v47 = vmul.f32 0.5, %v4490_v46 }
0x144e   : > { %v4492_v48 = vsub.f32 1.5, %v4491_v47  ;;  %v7722_v47 = vld [vmem:[%s9368_s1 + $0x148] sm:$0xff] }
0x1450   : > { %v4493_v49 = vmul.f32 %v8035_v29, %v4492_v48  ;;  %v7724_v48 = vld [vmem:[%s9368_s1 + $0x158] sm:$0xff] }
0x1452   : > { %v4497_v52 = vsel %vm4496_vm11, %v8035_v29, %v4493_v49  ;;  %v7726_v49 = vld [vmem:[%s9368_s1 + $0x168] sm:$0xff] }
0x1453   : > { %v4498_v50 = vmul.f32 %v4497_v52, %v4481_v35  ;;  %v7721_v52 = vld [vmem:[%s9368_s1 + $0x140] sm:$0xff] }
0x1455   : > { %v4502_v55 = vmul.f32 %v7917_v51, %v4498_v50  ;;  %v7728_v51 = vld [vmem:[%s9368_s1 + $0x178] sm:$0xff]  ;;  %v7725_v50 = vld [vmem:[%s9368_s1 + $0x160] sm:$0xff] }
0x1457   : > { %v4506_v31 = vadd.f32 %v7918_v53, %v4502_v55  ;;  %v7723_v53 = vld [vmem:[%s9368_s1 + $0x150] sm:$0xff] }
0x1458   : > { %v7727_v55 = vld [vmem:[%s9368_s1 + $0x170] sm:$0xff] }
0x1459   : > { %v4507_v56 = vpack.c.bf16 %v4506_v31, %v4506_v31 }
0x145b   : > { %7141 = vmatmul.msk.bf16.vlgmr.msrb.gmra.mxu0 %vm1357_vm0, %v4507_v56 }
0x145c   : > { %4901 = vmatpush.bf16.msrb.mxu0 %v7718_v23 }
0x1460   : > { %4902 = vmatpush.bf16.msrb.mxu0 %v7717_v32 }
0x14d8   : > { %v4540_v59 = vpop.f32.mrf.mxu0 }
0x14d9   : > { %v4541_v60 = vadd.f32 %v7919_v58, %v4540_v59 }
0x14db   : > { %v4544_v61 = vmax.f32 %v4541_v60, 0.0 }
0x14dd   : > { %v4545_v62 = vpack.c.bf16 %v4544_v61, %v4544_v61 }
0x14df   : > { %7158 = vmatmul.msk.bf16.vlgmr.msrb.gmra.mxu1 %vm2081_vm7, %v4545_v62  ;;  %v7927_v62 = vld [vmem:[%s9370_s5 + $0x12] ss:$0 sm:$0xff] }
0x14e0   : > { %v4542_v63 = vpop.f32.mrf.mxu0  ;;  %4926 = vmatpush.bf16.msrb.mxu1 %v7720_v25 }
0x14e1   : > { %v7928_v63 = vld [vmem:[%s9370_s5 + $0x13] ss:$0 sm:$0xff] }
0x14e4   : > { %4927 = vmatpush.bf16.msrb.mxu1 %v7719_v34 }
0x155c   : > { %v4594_v0 = vpop.f32.mrf.mxu1 }
0x155d   : > { %v4595_v1 = vadd.f32 %v7920_v2, %v4594_v0 }
0x155f   : > { %v4598_v16 = vadd.f32 %v4595_v1, %v4506_v31 }
0x1561   : > { %v4601_v4 = vsel %vm1357_vm0, %v4598_v16, 0.0 }
0x1562   : > { %4602 = vadd.xlane.f32.xlu2 %v4601_v4  ;;  %v7929_v4 = vld [vmem:[%s9370_s5 + $0x10] ss:$0 sm:$0xff] }
0x1564   : > { %v4596_v12 = vpop.f32.mrf.mxu1 }
0x1565   : > { %v7930_v12 = vld [vmem:[%s9370_s5 + $0x11] ss:$0 sm:$0xff] }
0x15d5   : > { %v4603_v5 = vpop.xlane.xlu2 %4602 }
0x15d6   : > { %v4604_v6 = vmul.f32 %v4603_v5, %v8580_v3  ;;  %v7923_v5 = vld [vmem:[%s9370_s5 + $0xe] ss:$0 sm:$0xff] }
0x15d8   : > { %v4605_v7 = vsub.f32 %v4598_v16, %v4604_v6  ;;  %v7924_v6 = vld [vmem:[%s9370_s5 + $0xf] ss:$0 sm:$0xff] }
0x15da   : > { %v4606_v8 = vmul.f32 %v4605_v7, %v4605_v7 }
0x15dc   : > { %v4607_v9 = vsel %vm1357_vm0, %v4606_v8, 0.0 }
0x15dd   : > { %4608 = vadd.xlane.f32.xlu0 %v4607_v9 }
0x1650   : > { %v4609_v20 = vpop.xlane.xlu0 %4608 }
0x1651   : > { %v4610_v24 = vmul.f32 %v4609_v20, %v8580_v3  ;;  %v7926_v20 = vld [vmem:[%s9370_s5 + $0xd] ss:$0 sm:$0xff] }
0x1653   : > { %v4611_v28 = vadd.f32 1e-05, %v4610_v24 }
0x1655   : > { %8036 = vrsqrt.f32 %v4611_v28  ;;  %vm4618_vm13 = vweird.f32 %v4611_v28 }
0x165b   : > { %v8037_v35 = vpop.eup %8036 }
0x165c   : > { %v4613_v36 = vmul.f32 %v8037_v35, %v4611_v28  ;;  %vm4619_vm12 = vweird.f32 %v8037_v35 }
0x165d   : > { %vm4620_vm14 = vmor %vm4618_vm13, %vm4619_vm12 }
0x165e   : > { %v4614_v37 = vmul.f32 %v8037_v35, %v4613_v36 }
0x1660   : > { %v4615_v39 = vmul.f32 0.5, %v4614_v37  ;;  %v7931_v37 = vld [vmem:[%s9370_s5 + $0x16] ss:$0 sm:$0xff] }
0x1662   : > { %v4616_v40 = vsub.f32 1.5, %v4615_v39  ;;  %v7932_v39 = vld [vmem:[%s9370_s5 + $0x17] ss:$0 sm:$0xff] }
0x1664   : > { %v4617_v41 = vmul.f32 %v8037_v35, %v4616_v40 }
0x1666   : > { %v4621_v42 = vsel %vm4620_vm14, %v8037_v35, %v4617_v41 }
0x1667   : > { %v4622_v44 = vmul.f32 %v4621_v42, %v4605_v7 }
0x1669   : > { %v4626_v29 = vmul.f32 %v7921_v38, %v4622_v44 }
0x166b   : > { %v8996_v45 = vadd.f32 %v7922_v43, %v4626_v29  ;;  %v7933_v29 = vld [vmem:[%s9370_s5 + $0x14] ss:$0 sm:$0xff] }
0x166d   : > { %v4631_v46 = vpack.c.bf16 %v8996_v45, %v8996_v45 }
0x166f   : > { %7227 = vmatmul.msk.bf16.vlgmr.msrb.gmra.mxu2 %vm1357_vm0, %v4631_v46  ;;  %7236 = vmatmul.msk.bf16.vlgmr.msrb.gmra.mxu3 %vm1357_vm0, %v4631_v46 }
0x1670   : > { %7245 = vmatmul.msk.bf16.vlgmr.msra.gmra.mxu0 %vm1357_vm0, %v4631_v46  ;;  %7254 = vmatmul.msk.bf16.vlgmr.msra.gmra.mxu1 %vm1357_vm0, %v4631_v46 }
0x1671   : > { %4951 = vmatpush.bf16.msrb.mxu2 %v7722_v47  ;;  %4976 = vmatpush.bf16.msrb.mxu3 %v7724_v48 }
0x1672   : > { %5001 = vmatpush.bf16.msra.mxu0 %v7726_v49  ;;  %5026 = vmatpush.bf16.msra.mxu1 %v7728_v51 }
0x1675   : > { %4952 = vmatpush.bf16.msrb.mxu2 %v7721_v52  ;;  %4977 = vmatpush.bf16.msrb.mxu3 %v7723_v53 }
0x1676   : > { %5002 = vmatpush.bf16.msra.mxu0 %v7725_v50  ;;  %5027 = vmatpush.bf16.msra.mxu1 %v7727_v55 }
0x167f   : > { %7263 = vmatmul.msk.bf16.vlgmr.msra.gmra.mxu2 %vm1357_vm0, %v4631_v46  ;;  %7272 = vmatmul.msk.bf16.vlgmr.msra.gmra.mxu3 %vm1357_vm0, %v4631_v46 }
0x1680   : > { %7281 = vmatmul.msk.bf16.vlgmr.msrb.gmra.mxu0 %vm1357_vm0, %v4631_v46  ;;  %7290 = vmatmul.msk.bf16.vlgmr.msrb.gmra.mxu1 %vm1357_vm0, %v4631_v46 }
0x168f   : > { %7299 = vmatmul.msk.bf16.vlgmr.msrb.gmra.mxu2 %vm1357_vm0, %v4631_v46  ;;  %7308 = vmatmul.msk.bf16.vlgmr.msrb.gmra.mxu3 %vm1357_vm0, %v4631_v46 }
0x1690   : > { %7317 = vmatmul.msk.bf16.vlgmr.msra.gmra.mxu0 %vm1357_vm0, %v4631_v46  ;;  %7326 = vmatmul.msk.bf16.vlgmr.msra.gmra.mxu1 %vm1357_vm0, %v4631_v46  ;;  %v7934_v46 = vld [vmem:[%s9370_s5 + $0x15] ss:$0 sm:$0xff] }
0x16ed   : > { %v4804_v31 = vpop.f32.mrf.mxu0  ;;  %v4829_v56 = vpop.f32.mrf.mxu1 }
0x16ee   : > { %v4805_v17 = vadd.f32 %v7923_v5, %v4804_v31  ;;  %v4830_v18 = vadd.f32 %v7924_v6, %v4829_v56 }
0x16f0   : > { %v5042_v27 = vpack.c.bf16 %v4805_v17, %v4805_v17  ;;  %v5043_v28 = vpack.c.bf16 %v4830_v18, %v4830_v18 }
0x16f2   : > { %v4754_v30 = vpop.f32.mrf.mxu2  ;;  %v4779_v57 = vpop.f32.mrf.mxu3 }
0x16f3   : > { %v4755_v32 = vadd.f32 %v7925_v19, %v4754_v30  ;;  %v4780_v34 = vadd.f32 %v7926_v20, %v4779_v57 }
0x16f5   : > { %v4806_v58 = vpop.f32.mrf.mxu0  ;;  %v4831_v59 = vpop.f32.mrf.mxu1  ;;  %v5040_v40 = vpack.c.bf16 %v4755_v32, %v4755_v32  ;;  %v5041_v41 = vpack.c.bf16 %v4780_v34, %v4780_v34 }
0x16fa   : > { %v4756_v60 = vpop.f32.mrf.mxu2  ;;  %v4781_v61 = vpop.f32.mrf.mxu3 }
0x16fd   : > { %v4904_v2 = vpop.f32.mrf.mxu0  ;;  %v4929_v0 = vpop.f32.mrf.mxu1 }
0x16fe   : > { %v4905_v1 = vadd.f32 %v7927_v62, %v4904_v2  ;;  %v4930_v16 = vadd.f32 %v7928_v63, %v4929_v0 }
0x1700   : > { %v5046_v7 = vpack.c.bf16 %v4905_v1, %v4905_v1  ;;  %v5047_v8 = vpack.c.bf16 %v4930_v16, %v4930_v16 }
0x1702   : > { %v5090_v9 = vsel %vm1662_vm1, %v5046_v7, 0  ;;  %v5109_v10 = vsel %vm1662_vm1, %v5047_v8, 0  ;;  %v4854_v11 = vpop.f32.mrf.mxu2  ;;  %v4879_v13 = vpop.f32.mrf.mxu3 }
0x1703   : > { %v4855_v14 = vadd.f32 %v7929_v4, %v4854_v11  ;;  %v4880_v15 = vadd.f32 %v7930_v12, %v4879_v13  ;;  %5099 = vmatpush.bf16.xpose.msrb.mxu0 %v5090_v9  ;;  %5118 = vmatpush.bf16.xpose.msrb.mxu1 %v5109_v10 }
0x1705   : > { %v5044_v21 = vpack.c.bf16 %v4855_v14, %v4855_v14  ;;  %v5045_v22 = vpack.c.bf16 %v4880_v15, %v4880_v15  ;;  %v4906_v23 = vpop.f32.mrf.mxu0  ;;  %v4931_v24 = vpop.f32.mrf.mxu1 }
0x1707   : > { %v5052_v25 = vsel %vm1662_vm1, %v5044_v21, 0  ;;  %v5071_v26 = vsel %vm1662_vm1, %v5045_v22, 0 }
0x1708   : > { %5061 = vmatpush.bf16.xpose.msra.mxu2 %v5052_v25  ;;  %5080 = vmatpush.bf16.xpose.msra.mxu3 %v5071_v26 }
0x170a   : > { %7334 = vmatmul.msk.bf16.vlgmr.msrb.gmra.mxu0 %vm1662_vm1, %v5042_v27  ;;  %7335 = vmatmul.msk.bf16.vlgmr.msrb.gmra.mxu1 %vm1662_vm1, %v5043_v28  ;;  %v4856_v35 = vpop.f32.mrf.mxu2  ;;  %v4881_v36 = vpop.f32.mrf.mxu3 }
0x170d   : > { %v5004_v38 = vpop.f32.mrf.mxu0  ;;  %v5029_v42 = vpop.f32.mrf.mxu1 }
0x170e   : > { %v5005_v43 = vadd.f32 %v7931_v37, %v5004_v38  ;;  %v5030_v44 = vadd.f32 %v7932_v39, %v5029_v42 }
0x170f   : > { %7332 = vmatmul.msk.bf16.vlgmr.msra.gmra.mxu2 %vm1662_vm1, %v5040_v40  ;;  %7333 = vmatmul.msk.bf16.vlgmr.msra.gmra.mxu3 %vm1662_vm1, %v5041_v41 }
0x1710   : > { %v5182_v47 = vpack.c.bf16 %v5005_v43, %v5005_v43  ;;  %v5183_v48 = vpack.c.bf16 %v5030_v44, %v5030_v44 }
0x1712   : > { %v5226_v49 = vsel %vm1805_vm2, %v5182_v47, 0  ;;  %v5245_v51 = vsel %vm1805_vm2, %v5183_v48, 0  ;;  %v4954_v52 = vpop.f32.mrf.mxu2  ;;  %v4979_v53 = vpop.f32.mrf.mxu3 }
0x1713   : > { %v4955_v50 = vadd.f32 %v7933_v29, %v4954_v52  ;;  %v4980_v55 = vadd.f32 %v7934_v46, %v4979_v53  ;;  %5235 = vmatpush.bf16.msra.mxu0 %v5226_v49  ;;  %5254 = vmatpush.bf16.msra.mxu1 %v5245_v51 }
0x1715   : > { %v5180_v31 = vpack.c.bf16 %v4955_v50, %v4955_v50  ;;  %v5181_v56 = vpack.c.bf16 %v4980_v55, %v4980_v55  ;;  %v5006_v30 = vpop.f32.mrf.mxu0  ;;  %v5031_v57 = vpop.f32.mrf.mxu1 }
0x1716   : > { %v7329_v57 = vld [vmem:[%s9372_s18 + $0x18] sm:$0xf] }
0x1717   : > { %v5188_v58 = vsel %vm1805_vm2, %v5180_v31, 0  ;;  %v5207_v59 = vsel %vm1805_vm2, %v5181_v56, 0 }
0x1718   : > { %5197 = vmatpush.bf16.msrb.mxu2 %v5188_v58  ;;  %5216 = vmatpush.bf16.msrb.mxu3 %v5207_v59  ;;  %v5306_v58 = vsel %vm1805_vm2, %v7329_v57, 0  ;;  %v7327_v59 = vld [vmem:[%s9372_s18 + $0x10] sm:$0xf] }
0x1719   : > { %5315 = vmatpush.bf16.msrb.mxu0 %v5306_v58 }
0x171a   : > { %v4956_v60 = vpop.f32.mrf.mxu2  ;;  %v4981_v61 = vpop.f32.mrf.mxu3 }
0x171b   : > { %v7328_v60 = vld [vmem:[%s9372_s18 + $0x14] sm:$0xf]  ;;  %v5268_v61 = vsel %vm1805_vm2, %v7327_v59, 0 }
0x171c   : > { %5277 = vmatpush.bf16.msra.mxu2 %v5268_v61 }
0x1787   : > { %v5101_v62 = vpop.f32.mrf.mxu0  ;;  %v5120_v63 = vpop.f32.mrf.mxu1 }
0x1788   : > { %v5126_v2 = vmul.f32 0.35355338, %v5101_v62  ;;  %v5127_v10 = vmul.f32 0.35355338, %v5120_v63  ;;  %v5287_v62 = vsel %vm1805_vm2, %v7328_v60, 0 }
0x1789   : > { %5296 = vmatpush.bf16.msra.mxu3 %v5287_v62  ;;  %v7330_v63 = vld [vmem:[%s9372_s18 + $0x1c] sm:$0xf]  ;;  %v7936_v60 = vld [vmem:[%s9376_s8 + $0x1] ss:$0 sm:$0xff]  ;;  %s6317_s8 = scalar_lea.sflag [#allocation5], %s9162_s26 }
0x178a   : > { %v5130_v0 = vadd.f32 %v5126_v2, %v8782_v33  ;;  %v5131_v17 = vadd.f32 %v5127_v10, %v8782_v33  ;;  %v5325_v2 = vsel %vm1805_vm2, %v7330_v63, 0  ;;  %v7937_v62 = vld [vmem:[%s9377_s13 + $0x1] ss:$0 sm:$0xff] }
0x178b   : > { %5334 = vmatpush.bf16.msrb.mxu1 %v5325_v2 }
0x178c   : > { %v5138_v1 = vsel %vm1662_vm1, %v5130_v0, -inf  ;;  %v5141_v18 = vsel %vm1662_vm1, %v5131_v17, -inf }
0x178d   : > { %5139 = vmax.xlane.f32.xlu0 %v5138_v1 }
0x178f   : > { %v5103_v16 = vpop.f32.mrf.mxu0  ;;  %v5122_v4 = vpop.f32.mrf.mxu1 }
0x1792   : > { %v5063_v12 = vpop.f32.mrf.mxu2  ;;  %v5082_v5 = vpop.f32.mrf.mxu3 }
0x1793   : > { %v5124_v6 = vmul.f32 0.35355338, %v5063_v12  ;;  %v5125_v7 = vmul.f32 0.35355338, %v5082_v5 }
0x1795   : > { %v5129_v8 = vadd.f32 %v5125_v7, %v8782_v33  ;;  %v5128_v9 = vadd.f32 %v5124_v6, %v8782_v33 }
0x1797   : > { %v5135_v11 = vsel %vm1662_vm1, %v5129_v8, -inf  ;;  %v5132_v13 = vsel %vm1662_vm1, %v5128_v9, -inf }
0x1798   : > { %5136 = vmax.xlane.f32.xlu2 %v5135_v11  ;;  %5133 = vmax.xlane.f32.xlu1 %v5132_v13 }
0x179a   : > { %v5065_v14 = vpop.f32.mrf.mxu2  ;;  %v5084_v15 = vpop.f32.mrf.mxu3 }
0x17a0   : > { %5142 = vmax.xlane.f32.xlu1 %v5141_v18 }
0x1800   : > { %v5140_v19 = vpop.xlane.xlu0 %5139 }
0x1801   : > { %v5146_v20 = vsub.f32 %v5130_v0, %v5140_v19 }
0x1803   : > { %v5152_v21 = vmul.f32 1.442695, %v5146_v20 }
0x1805   : > { %8038 = vpow2.f32 %v5152_v21  ;;  %v7935_v21 = vld [vmem:[%s9373_s10 + $0x1] ss:$0 sm:$0xff] }
0x180b   : > { %v8039_v22 = vpop.eup %8038  ;;  %v5137_v23 = vpop.xlane.xlu2 %5136 }
0x180c   : > { %v5134_v24 = vpop.xlane.xlu1 %5133  ;;  %v5145_v25 = vsub.f32 %v5129_v8, %v5137_v23  ;;  %v5162_v27 = vsel %vm1662_vm1, %v8039_v22, 0.0 }
0x180d   : > { %v5144_v26 = vsub.f32 %v5128_v9, %v5134_v24  ;;  %5163 = vadd.xlane.f32.xlu1 %v5162_v27 }
0x180e   : > { %v5150_v28 = vmul.f32 1.442695, %v5145_v25 }
0x180f   : > { %v5148_v32 = vmul.f32 1.442695, %v5144_v26 }
0x1810   : > { %8040 = vpow2.f32 %v5150_v28 }
0x1811   : > { %8042 = vpow2.f32 %v5148_v32 }
0x1814   : > { %v5143_v33 = vpop.xlane.xlu1 %5142 }
0x1815   : > { %v5147_v34 = vsub.f32 %v5131_v17, %v5143_v33 }
0x1816   : > { %v8041_v35 = vpop.eup %8040 }
0x1817   : > { %v5154_v36 = vmul.f32 1.442695, %v5147_v34  ;;  %v8043_v37 = vpop.eup %8042  ;;  %v5159_v39 = vsel %vm1662_vm1, %v8041_v35, 0.0 }
0x1818   : > { %5160 = vadd.xlane.f32.xlu0 %v5159_v39  ;;  %v5156_v40 = vsel %vm1662_vm1, %v8043_v37, 0.0  ;;  %v7732_v39 = vld [vmem:[%s9374_s3 + $0x58] sm:$0xff] }
0x1819   : > { %8044 = vpow2.f32 %v5154_v36  ;;  %5157 = vadd.xlane.f32.xlu2 %v5156_v40  ;;  %v7734_v40 = vld [vmem:[%s9374_s3 + $0x68] sm:$0xff] }
0x181f   : > { %v8045_v41 = vpop.eup %8044 }
0x1820   : > { %v5165_v38 = vsel %vm1662_vm1, %v8045_v41, 0.0 }
0x1821   : > { %5166 = vadd.xlane.f32.xlu2 %v5165_v38  ;;  %v7731_v38 = vld [vmem:[%s9374_s3 + $0x50] sm:$0xff] }
0x1880   : > { %v5164_v42 = vpop.xlane.xlu1 %5163 }
0x1881   : > { %8046 = vrcp.f32 %v5164_v42  ;;  %v7733_v42 = vld [vmem:[%s9374_s3 + $0x60] sm:$0xff] }
0x1887   : > { %v8047_v43 = vpop.eup %8046 }
0x1888   : > { %v5174_v44 = vmul.f32 %v8047_v43, %v8039_v22  ;;  %v7735_v43 = vld [vmem:[%s9374_s3 + $0x70] sm:$0xff] }
0x188a   : > { %v5178_v29 = vpack.c.bf16 %v5174_v44, %v5174_v44 }
0x188b   : > { %v5161_v46 = vpop.xlane.xlu0 %5160 }
0x188c   : > { %8048 = vrcp.f32 %v5161_v46  ;;  %v5158_v47 = vpop.xlane.xlu2 %5157  ;;  %7338 = vmatmul.msk.bf16.vlgmr.msra.gmra.mxu0 %vm1662_vm1, %v5178_v29  ;;  %v7738_v29 = vld [vmem:[%s9375_s6 + $0x88] sm:$0xff]  ;;  %v7740_v46 = vld [vmem:[%s9375_s6 + $0x98] sm:$0xff] }
0x188d   : > { %8050 = vrcp.f32 %v5158_v47  ;;  %5488 = vmatpush.bf16.msra.mxu0 %v7734_v40  ;;  %v7742_v47 = vld [vmem:[%s9375_s6 + $0xa8] sm:$0xff] }
0x1891   : > { %5489 = vmatpush.bf16.msra.mxu0 %v7733_v42  ;;  %v7941_v42 = vld [vmem:[%s9379_s12 + $0x5] ss:$0 sm:$0xff] }
0x1892   : > { %v8049_v48 = vpop.eup %8048 }
0x1893   : > { %v8051_v49 = vpop.eup %8050  ;;  %v5173_v51 = vmul.f32 %v8049_v48, %v8041_v35 }
0x1894   : > { %v5172_v52 = vmul.f32 %v8051_v49, %v8043_v37  ;;  %v5167_v53 = vpop.xlane.xlu2 %5166  ;;  %v7730_v37 = vld [vmem:[%s9374_s3 + $0x48] sm:$0xff]  ;;  %v7744_v49 = vld [vmem:[%s9375_s6 + $0xb8] sm:$0xff] }
0x1895   : > { %v5177_v50 = vpack.c.bf16 %v5173_v51, %v5173_v51  ;;  %8052 = vrcp.f32 %v5167_v53  ;;  %v7737_v51 = vld [vmem:[%s9375_s6 + $0x80] sm:$0xff] }
0x1896   : > { %v5176_v55 = vpack.c.bf16 %v5172_v52, %v5172_v52  ;;  %v7739_v52 = vld [vmem:[%s9375_s6 + $0x90] sm:$0xff] }
0x1897   : > { %7337 = vmatmul.msk.bf16.vlgmr.msrb.gmra.mxu3 %vm1662_vm1, %v5177_v50  ;;  %v7741_v50 = vld [vmem:[%s9375_s6 + $0xa0] sm:$0xff] }
0x1898   : > { %7336 = vmatmul.msk.bf16.vlgmr.msrb.gmra.mxu2 %vm1662_vm1, %v5176_v55  ;;  %5463 = vmatpush.bf16.msrb.mxu3 %v7732_v39  ;;  %v7743_v55 = vld [vmem:[%s9375_s6 + $0xb0] sm:$0xff] }
0x1899   : > { %5438 = vmatpush.bf16.msrb.mxu2 %v7730_v37 }
0x189b   : > { %v8053_v31 = vpop.eup %8052 }
0x189c   : > { %v5175_v56 = vmul.f32 %v8053_v31, %v8045_v41  ;;  %v7729_v41 = vld [vmem:[%s9374_s3 + $0x40] sm:$0xff]  ;;  %5464 = vmatpush.bf16.msrb.mxu3 %v7731_v38 }
0x189d   : > { %5439 = vmatpush.bf16.msrb.mxu2 %v7729_v41  ;;  %v7940_v38 = vld [vmem:[%s9379_s12 + $0x4] ss:$0 sm:$0xff] }
0x189e   : > { %v5179_v30 = vpack.c.bf16 %v5175_v56, %v5175_v56 }
0x18a0   : > { %7339 = vmatmul.msk.bf16.vlgmr.msra.gmra.mxu1 %vm1662_vm1, %v5179_v30 }
0x1909   : > { %v5237_v0 = vpop.f32.mrf.mxu0 }
0x190a   : > { %v5262_v1 = vpack.c.bf16 %v5237_v0, %v5237_v0 }
0x190c   : > { %7342 = vmatmul.msk.bf16.vlgmr.msrb.gmra.mxu0 %vm1662_vm1, %v5262_v1 }
0x190d   : > { %5654 = vmatpush.bf16.msrb.mxu0 %v7742_v47 }
0x1911   : > { %v5239_v16 = vpop.f32.mrf.mxu0  ;;  %5655 = vmatpush.bf16.msrb.mxu0 %v7741_v50 }
0x1912   : > { %v7746_v16 = vld [vmem:[%s9375_s6 + $0xc8] sm:$0xff] }
0x191a   : > { %v5218_v4 = vpop.f32.mrf.mxu3 }
0x191b   : > { %v5199_v12 = vpop.f32.mrf.mxu2  ;;  %v5261_v5 = vpack.c.bf16 %v5218_v4, %v5218_v4  ;;  %v7748_v4 = vld [vmem:[%s9375_s6 + $0xd8] sm:$0xff] }
0x191c   : > { %v5260_v6 = vpack.c.bf16 %v5199_v12, %v5199_v12  ;;  %v7750_v12 = vld [vmem:[%s9375_s6 + $0xe8] sm:$0xff] }
0x191d   : > { %v5256_v7 = vpop.f32.mrf.mxu1  ;;  %7341 = vmatmul.msk.bf16.vlgmr.msra.gmra.mxu3 %vm1662_vm1, %v5261_v5  ;;  %v7752_v5 = vld [vmem:[%s9375_s6 + $0xf8] sm:$0xff] }
0x191e   : > { %v5263_v8 = vpack.c.bf16 %v5256_v7, %v5256_v7  ;;  %7340 = vmatmul.msk.bf16.vlgmr.msra.gmra.mxu2 %vm1662_vm1, %v5260_v6  ;;  %5629 = vmatpush.bf16.msra.mxu3 %v7740_v46  ;;  %v7745_v6 = vld [vmem:[%s9375_s6 + $0xc0] sm:$0xff]  ;;  %v7747_v7 = vld [vmem:[%s9375_s6 + $0xd0] sm:$0xff] }
0x191f   : > { %5604 = vmatpush.bf16.msra.mxu2 %v7738_v29 }
0x1920   : > { %7343 = vmatmul.msk.bf16.vlgmr.msrb.gmra.mxu1 %vm1662_vm1, %v5263_v8  ;;  %v7749_v8 = vld [vmem:[%s9375_s6 + $0xe0] sm:$0xff] }
0x1922   : > { %v5220_v9 = vpop.f32.mrf.mxu3  ;;  %5630 = vmatpush.bf16.msra.mxu3 %v7739_v52 }
0x1923   : > { %v5201_v10 = vpop.f32.mrf.mxu2  ;;  %5605 = vmatpush.bf16.msra.mxu2 %v7737_v51  ;;  %v7751_v9 = vld [vmem:[%s9375_s6 + $0xf0] sm:$0xff] }
0x1925   : > { %v5258_v11 = vpop.f32.mrf.mxu1 }
0x1989   : > { %v5317_v13 = vpop.f32.mrf.mxu0 }
0x1991   : > { %v5319_v14 = vpop.f32.mrf.mxu0 }
0x199d   : > { %v5336_v15 = vpop.f32.mrf.mxu1 }
0x19a0   : > { %v5298_v17 = vpop.f32.mrf.mxu3 }
0x19a1   : > { %v5279_v18 = vpop.f32.mrf.mxu2 }
0x19a2   : > { %v5340_v19 = vadd.f32 %v5298_v17, %v5279_v18 }
0x19a4   : > { %v5341_v20 = vadd.f32 %v5340_v19, %v5317_v13 }
0x19a5   : > { %v5338_v22 = vpop.f32.mrf.mxu1 }
0x19a6   : > { %v5342_v23 = vadd.f32 %v5341_v20, %v5336_v15  ;;  %v7942_v20 = vld [vmem:[%s9378_s14 + $0xa] ss:$0 sm:$0xff] }
0x19a8   : > { %v5300_v24 = vpop.f32.mrf.mxu3  ;;  %v5346_v25 = vadd.f32 %v7935_v21, %v5342_v23  ;;  %v7943_v21 = vld [vmem:[%s9378_s14 + $0xb] ss:$0 sm:$0xff] }
0x19a9   : > { %v5281_v26 = vpop.f32.mrf.mxu2 }
0x19aa   : > { %v5347_v27 = vadd.f32 %v5346_v25, %v8996_v45  ;;  %v7736_v45 = vld [vmem:[%s9374_s3 + $0x78] sm:$0xff]  ;;  %v7944_v26 = vld [vmem:[%s9378_s14 + $0x8] ss:$0 sm:$0xff]  ;;  %s7761_s3 = sshll.u32 %s8443_s0, 5 }
0x19ab   : > { %5513 = vmatpush.bf16.msra.mxu1 %v7736_v45  ;;  %s6342_s5 = scalar_lea.hbm %s9346_s9, %s7761_s3 }
0x19ac   : > { %v5352_v28 = vsel %vm1357_vm0, %v5347_v27, 0.0  ;;  %s6345_s6 = sshll.u32 %s6342_s5, 4  ;;  %s6346_s6 = int_to_ptr.hbm [resolvable:$true] %s6345_s6 }
0x19ad   : > { %5353 = vadd.xlane.f32.xlu0 %v5352_v28  ;;  %v7939_v28 = vld [vmem:[%s9379_s12 + $0x7] ss:$0 sm:$0xff] }
0x19af   : > { %5514 = vmatpush.bf16.msra.mxu1 %v7735_v43 }
0x19b3   : > { %5679 = vmatpush.bf16.msrb.mxu1 %v7744_v49 }
0x19b7   : > { %5680 = vmatpush.bf16.msrb.mxu1 %v7743_v55 }
0x1a20   : > { %v5354_v32 = vpop.xlane.xlu0 %5353 }
0x1a21   : > { %v5355_v33 = vmul.f32 %v5354_v32, %v8580_v3 }
0x1a23   : > { %v5356_v34 = vsub.f32 %v5347_v27, %v5355_v33  ;;  %v7938_v27 = vld [vmem:[%s9379_s12 + $0x6] ss:$0 sm:$0xff] }
0x1a25   : > { %v5357_v35 = vmul.f32 %v5356_v34, %v5356_v34 }
0x1a27   : > { %v5358_v36 = vsel %vm1357_vm0, %v5357_v35, 0.0 }
0x1a28   : > { %5359 = vadd.xlane.f32.xlu1 %v5358_v36 }
0x1a9b   : > { %v5360_v44 = vpop.xlane.xlu1 %5359 }
0x1a9c   : > { %v5361_v48 = vmul.f32 %v5360_v44, %v8580_v3 }
0x1a9e   : > { %v5362_v53 = vadd.f32 1e-05, %v5361_v48 }
0x1aa0   : > { %8054 = vrsqrt.f32 %v5362_v53  ;;  %vm5369_vm3 = vweird.f32 %v5362_v53 }
0x1aa6   : > { %v8055_v31 = vpop.eup %8054 }
0x1aa7   : > { %v5364_v56 = vmul.f32 %v8055_v31, %v5362_v53  ;;  %vm5370_vm15 = vweird.f32 %v8055_v31 }
0x1aa8   : > { %vm5371_vm4 = vmor %vm5369_vm3, %vm5370_vm15 }
0x1aa9   : > { %v5365_v30 = vmul.f32 %v8055_v31, %v5364_v56  ;;  %v7947_v56 = vld [vmem:[%s9378_s14 + $0xf] ss:$0 sm:$0xff] }
0x1aab   : > { %v5366_v57 = vmul.f32 0.5, %v5365_v30 }
0x1aad   : > { %v5367_v58 = vsub.f32 1.5, %v5366_v57 }
0x1aaf   : > { %v5368_v59 = vmul.f32 %v8055_v31, %v5367_v58 }
0x1ab1   : > { %v5372_v61 = vsel %vm5371_vm4, %v8055_v31, %v5368_v59  ;;  %v7946_v31 = vld [vmem:[%s9378_s14 + $0xe] ss:$0 sm:$0xff] }
0x1ab2   : > { %v5373_v63 = vmul.f32 %v5372_v61, %v5356_v34 }
0x1ab4   : > { %v5377_v2 = vmul.f32 %v7936_v60, %v5373_v63  ;;  %v7949_v63 = vld [vmem:[%s9378_s14 + $0xd] ss:$0 sm:$0xff] }
0x1ab6   : > { %v9096_v0 = vadd.f32 %v7937_v62, %v5377_v2  ;;  %v7948_v62 = vld [vmem:[%s9378_s14 + $0xc] ss:$0 sm:$0xff] }
0x1ab8   : > { %v5382_v1 = vpack.c.bf16 %v9096_v0, %v9096_v0 }
0x1aba   : > { %7374 = vmatmul.msk.bf16.vlgmr.msrb.gmra.mxu2 %vm1357_vm0, %v5382_v1  ;;  %7383 = vmatmul.msk.bf16.vlgmr.msrb.gmra.mxu3 %vm1357_vm0, %v5382_v1 }
0x1abb   : > { %7392 = vmatmul.msk.bf16.vlgmr.msra.gmra.mxu0 %vm1357_vm0, %v5382_v1  ;;  %7401 = vmatmul.msk.bf16.vlgmr.msra.gmra.mxu1 %vm1357_vm0, %v5382_v1 }
0x1abc   : > { %5704 = vmatpush.bf16.msrb.mxu2 %v7746_v16  ;;  %5729 = vmatpush.bf16.msrb.mxu3 %v7748_v4 }
0x1abd   : > { %5754 = vmatpush.bf16.msra.mxu0 %v7750_v12  ;;  %5779 = vmatpush.bf16.msra.mxu1 %v7752_v5 }
0x1ac0   : > { %5705 = vmatpush.bf16.msrb.mxu2 %v7745_v6  ;;  %5730 = vmatpush.bf16.msrb.mxu3 %v7747_v7 }
0x1ac1   : > { %5755 = vmatpush.bf16.msra.mxu0 %v7749_v8  ;;  %5780 = vmatpush.bf16.msra.mxu1 %v7751_v9 }
0x1aca   : > { %7450 = vmatmul.msk.bf16.vlgmr.msra.gmra.mxu2 %vm1357_vm0, %v8889_v54  ;;  %7459 = vmatmul.msk.bf16.vlgmr.msra.gmra.mxu3 %vm1357_vm0, %v8889_v54 }
0x1acb   : > { %7468 = vmatmul.msk.bf16.vlgmr.msrb.gmra.mxu0 %vm1357_vm0, %v8889_v54  ;;  %7477 = vmatmul.msk.bf16.vlgmr.msrb.gmra.mxu1 %vm1357_vm0, %v8889_v54 }
0x1ada   : > { %7486 = vmatmul.msk.bf16.vlgmr.msrb.gmra.mxu2 %vm1357_vm0, %v8889_v54  ;;  %7495 = vmatmul.msk.bf16.vlgmr.msrb.gmra.mxu3 %vm1357_vm0, %v8889_v54 }
0x1adb   : > { %7504 = vmatmul.msk.bf16.vlgmr.msra.gmra.mxu0 %vm1357_vm0, %v8889_v54  ;;  %7513 = vmatmul.msk.bf16.vlgmr.msra.gmra.mxu1 %vm1357_vm0, %v8889_v54  ;;  %v7945_v54 = vld [vmem:[%s9378_s14 + $0x9] ss:$0 sm:$0xff] }
0x1b38   : > { %v5491_v10 = vpop.f32.mrf.mxu0  ;;  %v5516_v11 = vpop.f32.mrf.mxu1 }
0x1b39   : > { %v5492_v45 = vadd.f32 %v7938_v27, %v5491_v10  ;;  %v5517_v41 = vadd.f32 %v7939_v28, %v5516_v11 }
0x1b3b   : > { %v5795_v49 = vpack.c.bf16 %v5492_v45, %v5492_v45  ;;  %v5796_v51 = vpack.c.bf16 %v5517_v41, %v5517_v41 }
0x1b3d   : > { %v5441_v13 = vpop.f32.mrf.mxu2  ;;  %v5466_v14 = vpop.f32.mrf.mxu3 }
0x1b3e   : > { %v5442_v52 = vadd.f32 %v7940_v38, %v5441_v13  ;;  %v5467_v53 = vadd.f32 %v7941_v42, %v5466_v14 }
0x1b40   : > { %v5493_v15 = vpop.f32.mrf.mxu0  ;;  %v5518_v17 = vpop.f32.mrf.mxu1  ;;  %v5793_v30 = vpack.c.bf16 %v5442_v52, %v5442_v52  ;;  %v5794_v57 = vpack.c.bf16 %v5467_v53, %v5467_v53 }
0x1b45   : > { %v5443_v18 = vpop.f32.mrf.mxu2  ;;  %v5468_v19 = vpop.f32.mrf.mxu3 }
0x1b48   : > { %v5657_v22 = vpop.f32.mrf.mxu0  ;;  %v5682_v23 = vpop.f32.mrf.mxu1 }
0x1b49   : > { %v5658_v24 = vadd.f32 %v7942_v20, %v5657_v22  ;;  %v5683_v25 = vadd.f32 %v7943_v21, %v5682_v23  ;;  %v8077_v21 = vld [vmem:[%s8485_s7] ss:$0 sm:$0xff]  ;;  %s6515_s7 = sshll.u32 %s9162_s26, 5 }
0x1b4a   : > { %s9166_s1 = scalar_lea.vmem [#allocation4], %s6515_s7 }
0x1b4b   : > { %v5799_v32 = vpack.c.bf16 %v5658_v24, %v5658_v24  ;;  %v5800_v33 = vpack.c.bf16 %v5683_v25, %v5683_v25  ;;  %s6343_s7 = sshll.u32 %s9166_s1, 4  ;;  %s6344_s7 = int_to_ptr.vmem [resolvable:$true] %s6343_s7 }
0x1b4d   : > { %v5843_v34 = vsel %vm1662_vm1, %v5799_v32, 0  ;;  %v5862_v35 = vsel %vm1662_vm1, %v5800_v33, 0  ;;  %v5607_v36 = vpop.f32.mrf.mxu2  ;;  %v5632_v37 = vpop.f32.mrf.mxu3 }
0x1b4e   : > { %v5608_v39 = vadd.f32 %v7944_v26, %v5607_v36  ;;  %v5633_v40 = vadd.f32 %v7945_v54, %v5632_v37  ;;  %5852 = vmatpush.bf16.xpose.msrb.mxu0 %v5843_v34  ;;  %5871 = vmatpush.bf16.xpose.msrb.mxu1 %v5862_v35 }
0x1b50   : > { %v5797_v43 = vpack.c.bf16 %v5608_v39, %v5608_v39  ;;  %v5798_v44 = vpack.c.bf16 %v5633_v40, %v5633_v40  ;;  %v5659_v29 = vpop.f32.mrf.mxu0  ;;  %v5684_v46 = vpop.f32.mrf.mxu1 }
0x1b52   : > { %v5805_v47 = vsel %vm1662_vm1, %v5797_v43, 0  ;;  %v5824_v48 = vsel %vm1662_vm1, %v5798_v44, 0 }
0x1b53   : > { %5814 = vmatpush.bf16.xpose.msra.mxu2 %v5805_v47  ;;  %5833 = vmatpush.bf16.xpose.msra.mxu3 %v5824_v48 }
0x1b55   : > { %7521 = vmatmul.msk.bf16.vlgmr.msrb.gmra.mxu0 %vm1662_vm1, %v5795_v49  ;;  %7522 = vmatmul.msk.bf16.vlgmr.msrb.gmra.mxu1 %vm1662_vm1, %v5796_v51  ;;  %v5609_v50 = vpop.f32.mrf.mxu2  ;;  %v5634_v55 = vpop.f32.mrf.mxu3 }
0x1b58   : > { %v5757_v58 = vpop.f32.mrf.mxu0  ;;  %v5782_v59 = vpop.f32.mrf.mxu1 }
0x1b59   : > { %v5758_v60 = vadd.f32 %v7946_v31, %v5757_v58  ;;  %v5783_v61 = vadd.f32 %v7947_v56, %v5782_v59 }
0x1b5a   : > { %7519 = vmatmul.msk.bf16.vlgmr.msra.gmra.mxu2 %vm1662_vm1, %v5793_v30  ;;  %7520 = vmatmul.msk.bf16.vlgmr.msra.gmra.mxu3 %vm1662_vm1, %v5794_v57 }
0x1b5b   : > { %v5935_v2 = vpack.c.bf16 %v5758_v60, %v5758_v60  ;;  %v5936_v1 = vpack.c.bf16 %v5783_v61, %v5783_v61 }
0x1b5d   : > { %v5979_v16 = vsel %vm1805_vm2, %v5935_v2, 0  ;;  %v5998_v4 = vsel %vm1805_vm2, %v5936_v1, 0  ;;  %v5707_v12 = vpop.f32.mrf.mxu2  ;;  %v5732_v5 = vpop.f32.mrf.mxu3 }
0x1b5e   : > { %v5708_v6 = vadd.f32 %v7948_v62, %v5707_v12  ;;  %v5733_v7 = vadd.f32 %v7949_v63, %v5732_v5  ;;  %5988 = vmatpush.bf16.msra.mxu0 %v5979_v16  ;;  %6007 = vmatpush.bf16.msra.mxu1 %v5998_v4 }
0x1b60   : > { %v5933_v8 = vpack.c.bf16 %v5708_v6, %v5708_v6  ;;  %v5934_v9 = vpack.c.bf16 %v5733_v7, %v5733_v7  ;;  %v5759_v10 = vpop.f32.mrf.mxu0  ;;  %v5784_v11 = vpop.f32.mrf.mxu1 }
0x1b62   : > { %v5941_v13 = vsel %vm1805_vm2, %v5933_v8, 0  ;;  %v5960_v14 = vsel %vm1805_vm2, %v5934_v9, 0 }
0x1b63   : > { %5950 = vmatpush.bf16.msrb.mxu2 %v5941_v13  ;;  %5969 = vmatpush.bf16.msrb.mxu3 %v5960_v14 }
0x1b65   : > { %v5709_v15 = vpop.f32.mrf.mxu2  ;;  %v5734_v17 = vpop.f32.mrf.mxu3 }
0x1b66   : > { %v7516_v17 = vld [vmem:[%s9380_s19 + $0x18] sm:$0xf] }
0x1bd2   : > { %v5854_v18 = vpop.f32.mrf.mxu0  ;;  %v5873_v19 = vpop.f32.mrf.mxu1 }
0x1bd3   : > { %v5879_v20 = vmul.f32 0.35355338, %v5854_v18  ;;  %v5880_v34 = vmul.f32 0.35355338, %v5873_v19  ;;  %v6059_v18 = vsel %vm1805_vm2, %v7516_v17, 0 }
0x1bd4   : > { %6068 = vmatpush.bf16.msrb.mxu0 %v6059_v18  ;;  %v7514_v19 = vld [vmem:[%s9380_s19 + $0x10] sm:$0xf] }
0x1bd5   : > { %v5883_v22 = vadd.f32 %v8077_v21, %v5879_v20  ;;  %v5884_v40 = vadd.f32 %v8077_v21, %v5880_v34  ;;  %v7515_v20 = vld [vmem:[%s9380_s19 + $0x14] sm:$0xf] }
0x1bd7   : > { %v5891_v23 = vsel %vm1662_vm1, %v5883_v22, -inf  ;;  %v5894_v45 = vsel %vm1662_vm1, %v5884_v40, -inf }
0x1bd8   : > { %5892 = vmax.xlane.f32.xlu1 %v5891_v23  ;;  %v7517_v23 = vld [vmem:[%s9380_s19 + $0x1c] sm:$0xf] }
0x1bda   : > { %v5856_v24 = vpop.f32.mrf.mxu0  ;;  %v5875_v25 = vpop.f32.mrf.mxu1 }
0x1bdb   : > { %v6078_v24 = vsel %vm1805_vm2, %v7517_v23, 0 }
0x1bdc   : > { %6087 = vmatpush.bf16.msrb.mxu1 %v6078_v24 }
0x1bdd   : > { %v5816_v26 = vpop.f32.mrf.mxu2  ;;  %v5835_v54 = vpop.f32.mrf.mxu3 }
0x1bde   : > { %v5877_v27 = vmul.f32 0.35355338, %v5816_v26  ;;  %v5878_v28 = vmul.f32 0.35355338, %v5835_v54 }
0x1be0   : > { %v5882_v32 = vadd.f32 %v8077_v21, %v5878_v28  ;;  %v5881_v33 = vadd.f32 %v8077_v21, %v5877_v27  ;;  %v6021_v21 = vsel %vm1805_vm2, %v7514_v19, 0 }
0x1be1   : > { %6030 = vmatpush.bf16.msra.mxu2 %v6021_v21 }
0x1be2   : > { %v5888_v35 = vsel %vm1662_vm1, %v5882_v32, -inf  ;;  %v5885_v36 = vsel %vm1662_vm1, %v5881_v33, -inf }
0x1be3   : > { %5889 = vmax.xlane.f32.xlu0 %v5888_v35  ;;  %5886 = vmax.xlane.f32.xlu2 %v5885_v36 }
0x1be5   : > { %v5818_v37 = vpop.f32.mrf.mxu2  ;;  %v5837_v39 = vpop.f32.mrf.mxu3 }
0x1beb   : > { %5895 = vmax.xlane.f32.xlu2 %v5894_v45 }
0x1c4b   : > { %v5893_v41 = vpop.xlane.xlu1 %5892 }
0x1c4c   : > { %v5899_v38 = vsub.f32 %v5883_v22, %v5893_v41  ;;  %v6040_v22 = vsel %vm1805_vm2, %v7515_v20, 0 }
0x1c4d   : > { %6049 = vmatpush.bf16.msra.mxu3 %v6040_v22  ;;  %v7954_v22 = vld [vmem:[%s9387_s11 + $0x1] ss:$0 sm:$0xff]  ;;  %s8098_s11 = scalar_lea.hbm %s9346_s9, 64 }
0x1c4e   : > { %v5905_v42 = vmul.f32 1.442695, %v5899_v38 }
0x1c50   : > { %8056 = vpow2.f32 %v5905_v42 }
0x1c56   : > { %v8057_v43 = vpop.eup %8056  ;;  %v5890_v44 = vpop.xlane.xlu0 %5889 }
0x1c57   : > { %v5887_v29 = vpop.xlane.xlu2 %5886  ;;  %v5898_v46 = vsub.f32 %v5882_v32, %v5890_v44  ;;  %v5915_v48 = vsel %vm1662_vm1, %v8057_v43, 0.0 }
0x1c58   : > { %v5897_v47 = vsub.f32 %v5881_v33, %v5887_v29  ;;  %5916 = vadd.xlane.f32.xlu2 %v5915_v48  ;;  %v7950_v29 = vld [vmem:[%s9381_s20 + $0x1] ss:$0 sm:$0xff] }
0x1c59   : > { %v5903_v49 = vmul.f32 1.442695, %v5898_v46 }
0x1c5a   : > { %v5901_v51 = vmul.f32 1.442695, %v5897_v47 }
0x1c5b   : > { %8058 = vpow2.f32 %v5903_v49 }
0x1c5c   : > { %8060 = vpow2.f32 %v5901_v51 }
0x1c5f   : > { %v5896_v52 = vpop.xlane.xlu2 %5895 }
0x1c60   : > { %v5900_v53 = vsub.f32 %v5884_v40, %v5896_v52 }
0x1c61   : > { %v8059_v50 = vpop.eup %8058 }
0x1c62   : > { %v5907_v55 = vmul.f32 1.442695, %v5900_v53  ;;  %v8061_v31 = vpop.eup %8060  ;;  %v5912_v56 = vsel %vm1662_vm1, %v8059_v50, 0.0 }
0x1c63   : > { %5913 = vadd.xlane.f32.xlu1 %v5912_v56  ;;  %v5909_v30 = vsel %vm1662_vm1, %v8061_v31, 0.0 }
0x1c64   : > { %8062 = vpow2.f32 %v5907_v55  ;;  %5910 = vadd.xlane.f32.xlu0 %v5909_v30 }
0x1c6a   : > { %v8063_v57 = vpop.eup %8062 }
0x1c6b   : > { %v5918_v58 = vsel %vm1662_vm1, %v8063_v57, 0.0 }
0x1c6c   : > { %5919 = vadd.xlane.f32.xlu0 %v5918_v58  ;;  %v7753_v58 = vld [vmem:[%s9382_s21 + $0x10] sm:$0xff] }
0x1ccb   : > { %v5917_v59 = vpop.xlane.xlu2 %5916 }
0x1ccc   : > { %8064 = vrcp.f32 %v5917_v59  ;;  %v7758_v59 = vld [vmem:[%s9383_s24 + $0x38] sm:$0xff] }
0x1cd2   : > { %v8065_v60 = vpop.eup %8064 }
0x1cd3   : > { %v5927_v61 = vmul.f32 %v8065_v60, %v8057_v43 }
0x1cd5   : > { %v5931_v62 = vpack.c.bf16 %v5927_v61, %v5927_v61  ;;  %v6305_v63 = vsel %vm1662_vm1, %v5927_v61, 0.0  ;;  %v7757_v61 = vld [vmem:[%s9383_s24 + $0x30] sm:$0xff] }
0x1cd6   : > { %v5914_v2 = vpop.xlane.xlu1 %5913  ;;  %6309 = vst [vmem:[%s9166_s1 + $0x10] sm:$0xff] %v6305_v63 }
0x1cd7   : > { %8066 = vrcp.f32 %v5914_v2  ;;  %v5911_v1 = vpop.xlane.xlu0 %5910  ;;  %7525 = vmatmul.msk.bf16.vlgmr.msra.gmra.mxu0 %vm1662_vm1, %v5931_v62 }
0x1cd8   : > { %8068 = vrcp.f32 %v5911_v1 }
0x1cdd   : > { %v8067_v16 = vpop.eup %8066 }
0x1cde   : > { %v8069_v4 = vpop.eup %8068  ;;  %v5926_v12 = vmul.f32 %v8067_v16, %v8059_v50 }
0x1cdf   : > { %v5925_v5 = vmul.f32 %v8069_v4, %v8061_v31  ;;  %v5920_v6 = vpop.xlane.xlu0 %5919 }
0x1ce0   : > { %v5930_v7 = vpack.c.bf16 %v5926_v12, %v5926_v12  ;;  %v6304_v8 = vsel %vm1662_vm1, %v5926_v12, 0.0  ;;  %8070 = vrcp.f32 %v5920_v6 }
0x1ce1   : > { %v5929_v9 = vpack.c.bf16 %v5925_v5, %v5925_v5  ;;  %v6303_v10 = vsel %vm1662_vm1, %v5925_v5, 0.0  ;;  %6308 = vst [vmem:[%s9166_s1 + $0x8] sm:$0xff] %v6304_v8  ;;  %v7951_v5 = vld [vmem:[%s9384_s25 + $0x1] ss:$0 sm:$0xff] }
0x1ce2   : > { %7524 = vmatmul.msk.bf16.vlgmr.msrb.gmra.mxu3 %vm1662_vm1, %v5930_v7  ;;  %6307 = vst [vmem:[%s9166_s1] sm:$0xff] %v6303_v10  ;;  %v7952_v7 = vld [vmem:[%s9385_s29 + $0x1] ss:$0 sm:$0xff] }
0x1ce3   : > { %7523 = vmatmul.msk.bf16.vlgmr.msrb.gmra.mxu2 %vm1662_vm1, %v5929_v9  ;;  %6221 = vmatpush.bf16.msrb.mxu3 %v7758_v59 }
0x1ce6   : > { %v8071_v11 = vpop.eup %8070 }
0x1ce7   : > { %v5928_v13 = vmul.f32 %v8071_v11, %v8063_v57  ;;  %v7754_v57 = vld [vmem:[%s9382_s21 + $0x18] sm:$0xff]  ;;  %6222 = vmatpush.bf16.msrb.mxu3 %v7757_v61 }
0x1ce8   : > { %6167 = vmatpush.bf16.msrb.mxu2 %v7754_v57 }
0x1ce9   : > { %v5932_v14 = vpack.c.bf16 %v5928_v13, %v5928_v13  ;;  %v6306_v15 = vsel %vm1662_vm1, %v5928_v13, 0.0  ;;  %v7756_v13 = vld [vmem:[%s9383_s24 + $0x28] sm:$0xff] }
0x1cea   : > { %6310 = vst [vmem:[%s9166_s1 + $0x18] sm:$0xff] %v6306_v15  ;;  %v7953_v15 = vld [vmem:[%s9386_s30 + $0x1] ss:$0 sm:$0xff] }
0x1ceb   : > { %7526 = vmatmul.msk.bf16.vlgmr.msra.gmra.mxu1 %vm1662_vm1, %v5932_v14  ;;  %6223 = vmatpush.bf16.msrb.mxu3 %v7756_v13  ;;  %v7755_v14 = vld [vmem:[%s9383_s24 + $0x20] sm:$0xff] }
0x1cec   : > { %6168 = vmatpush.bf16.msrb.mxu2 %v7753_v58 }
0x1cef   : > { %6224 = vmatpush.bf16.msrb.mxu3 %v7755_v14 }
0x1d54   : > { %v5990_v25 = vpop.f32.mrf.mxu0 }
0x1d55   : > { %v6015_v26 = vpack.c.bf16 %v5990_v25, %v5990_v25 }
0x1d57   : > { %7529 = vmatmul.msk.bf16.vlgmr.msrb.gmra.mxu0 %vm1662_vm1, %v6015_v26 }
0x1d5c   : > { %v5992_v54 = vpop.f32.mrf.mxu0 }
0x1d65   : > { %v5971_v27 = vpop.f32.mrf.mxu3 }
0x1d66   : > { %v5952_v28 = vpop.f32.mrf.mxu2  ;;  %v6014_v32 = vpack.c.bf16 %v5971_v27, %v5971_v27 }
0x1d67   : > { %v6013_v33 = vpack.c.bf16 %v5952_v28, %v5952_v28 }
0x1d68   : > { %v6009_v34 = vpop.f32.mrf.mxu1  ;;  %7528 = vmatmul.msk.bf16.vlgmr.msra.gmra.mxu3 %vm1662_vm1, %v6014_v32 }
0x1d69   : > { %v6016_v35 = vpack.c.bf16 %v6009_v34, %v6009_v34  ;;  %7527 = vmatmul.msk.bf16.vlgmr.msra.gmra.mxu2 %vm1662_vm1, %v6013_v33 }
0x1d6b   : > { %7530 = vmatmul.msk.bf16.vlgmr.msrb.gmra.mxu1 %vm1662_vm1, %v6016_v35  ;;  %v7760_v35 = vld [vmem:[%s8405_s27 + $0x8] sm:$0xff] }
0x1d6c   : > { %6295 = vmatpush.bf16.msra.mxu0 %v7760_v35 }
0x1d6d   : > { %v5973_v36 = vpop.f32.mrf.mxu3 }
0x1d6e   : > { %v5954_v37 = vpop.f32.mrf.mxu2  ;;  %v7759_v36 = vld [vmem:[%s8405_s27] sm:$0xff] }
0x1d70   : > { %v6011_v39 = vpop.f32.mrf.mxu1  ;;  %6296 = vmatpush.bf16.msra.mxu0 %v7759_v36 }
0x1dd4   : > { %v6070_v40 = vpop.f32.mrf.mxu0 }
0x1ddc   : > { %v6072_v45 = vpop.f32.mrf.mxu0 }
0x1de8   : > { %v6089_v41 = vpop.f32.mrf.mxu1 }
0x1deb   : > { %v6051_v38 = vpop.f32.mrf.mxu3 }
0x1dec   : > { %v6032_v42 = vpop.f32.mrf.mxu2 }
0x1ded   : > { %v6093_v43 = vadd.f32 %v6051_v38, %v6032_v42 }
0x1def   : > { %v6094_v44 = vadd.f32 %v6093_v43, %v6070_v40 }
0x1df0   : > { %v6091_v46 = vpop.f32.mrf.mxu1 }
0x1df1   : > { %v6095_v47 = vadd.f32 %v6094_v44, %v6089_v41 }
0x1df3   : > { %v6053_v48 = vpop.f32.mrf.mxu3  ;;  %v6099_v49 = vadd.f32 %v7950_v29, %v6095_v47  ;;  %v7955_v29 = vld [vmem:[%s9389_s2 + $0x1] ss:$0 sm:$0xff]  ;;  %s8092_s2 = sshra.s32 %s6346_s6, 4  ;;  %s8093_s2 = int_to_ptr.hbm [resolvable:$true] %s8092_s2 }
0x1df4   : > { %v6034_v51 = vpop.f32.mrf.mxu2  ;;  %v7956_v47 = vld [vmem:[%s9390_s16 + $0x1] ss:$0 sm:$0xff]  ;;  %s8094_s10 = scalar_lea.hbm %s8093_s2, 32  ;;  %p8099_p0 = scmp.lt.s32.totalorder %s8093_s2, %s9346_s9 }
0x1df5   : > { %v6100_v52 = vadd.f32 %v6099_v49, %v9096_v0  ;;  %p8095_p11 = scmp.ne.s32.totalorder %s8093_s2, %s8094_s10  ;;  %p8100_p1 = scmp.lt.s32.totalorder %s8098_s11, %s8094_s10 }
0x1df7   : > { %v6105_v53 = vsel %vm1357_vm0, %v6100_v52, 0.0  ;;  %p8096_p12 = pnand %p8095_p11, %p8460_p5  ;;  %p8101_p2 = por %p8100_p1, %p8099_p0 }
0x1df8   : > { %6106 = vadd.xlane.f32.xlu1 %v6105_v53 }
0x1df9   : > { %p8097_p13 = pneg %p8096_p12 }
0x1dfb   : > { %p8102_p3 = pnand %p8101_p2, %p8097_p13 }
0x1e6b   : > { %v6107_v50 = vpop.xlane.xlu1 %6106 }
0x1e6c   : > { %v6108_v55 = vmul.f32 %v6107_v50, %v8580_v3 }
0x1e6e   : > { %v6109_v31 = vsub.f32 %v6100_v52, %v6108_v55 }
0x1e70   : > { %v6110_v56 = vmul.f32 %v6109_v31, %v6109_v31 }
0x1e72   : > { %v6111_v30 = vsel %vm1357_vm0, %v6110_v56, 0.0 }
0x1e73   : > { %6112 = vadd.xlane.f32.xlu2 %v6111_v30 }
0x1ee6   : > { %v6113_v60 = vpop.xlane.xlu2 %6112 }
0x1ee7   : > { %v6114_v0 = vmul.f32 %v6113_v60, %v8580_v3 }
0x1ee9   : > { %v6115_v62 = vadd.f32 1e-05, %v6114_v0 }
0x1eeb   : > { %8072 = vrsqrt.f32 %v6115_v62  ;;  %vm6122_vm2 = vweird.f32 %v6115_v62 }
0x1ef1   : > { %v8073_v63 = vpop.eup %8072 }
0x1ef2   : > { %v6117_v2 = vmul.f32 %v8073_v63, %v6115_v62  ;;  %vm6123_vm1 = vweird.f32 %v8073_v63 }
0x1ef3   : > { %vm6124_vm5 = vmor %vm6122_vm2, %vm6123_vm1 }
0x1ef4   : > { %v6118_v1 = vmul.f32 %v8073_v63, %v6117_v2 }
0x1ef6   : > { %v6119_v16 = vmul.f32 0.5, %v6118_v1 }
0x1ef8   : > { %v6120_v4 = vsub.f32 1.5, %v6119_v16 }
0x1efa   : > { %v6121_v12 = vmul.f32 %v8073_v63, %v6120_v4 }
0x1efc   : > { %v6125_v6 = vsel %vm6124_vm5, %v8073_v63, %v6121_v12 }
0x1efd   : > { %v6126_v8 = vmul.f32 %v6125_v6, %v6109_v31 }
0x1eff   : > { %v6130_v9 = vmul.f32 %v7951_v5, %v6126_v8 }
0x1f01   : > { %v6134_v10 = vadd.f32 %v7952_v7, %v6130_v9 }
0x1f03   : > { %v6135_v11 = vpack.c.bf16 %v6134_v10, %v6134_v10 }
0x1f05   : > { %7546 = vmatmul.msk.bf16.vlgmr.msrb.gmra.mxu2 %vm1357_vm0, %v6135_v11 }
0x1f88   : > { %v6170_v17 = vpop.f32.mrf.mxu2 }
0x1f89   : > { %v6171_v18 = vadd.f32 %v7953_v15, %v6170_v17 }
0x1f8b   : > { %v6174_v19 = vmax.f32 %v6171_v18, 0.0 }
0x1f8d   : > { %v6175_v20 = vpack.c.bf16 %v6174_v19, %v6174_v19 }
0x1f8f   : > { %7572 = vmatmul.msk.bf16.vlgmr.msrb.gmra.mxu3 %vm2081_vm7, %v6175_v20 }
0x1f90   : > { %v6172_v21 = vpop.f32.mrf.mxu2 }
0x2012   : > { %v6226_v23 = vpop.f32.mrf.mxu3 }
0x2013   : > { %v6227_v24 = vadd.f32 %v7954_v22, %v6226_v23 }
0x2015   : > { %v6230_v25 = vadd.f32 %v6227_v24, %v6134_v10 }
0x2017   : > { %v6235_v26 = vsel %vm1357_vm0, %v6230_v25, 0.0 }
0x2018   : > { %6236 = vadd.xlane.f32.xlu0 %v6235_v26 }
0x201a   : > { %v6228_v54 = vpop.f32.mrf.mxu3 }
0x208b   : > { %v6237_v27 = vpop.xlane.xlu0 %6236 }
0x208c   : > { %v6238_v28 = vmul.f32 %v6237_v27, %v8580_v3 }
0x208e   : > { %v6239_v32 = vsub.f32 %v6230_v25, %v6238_v28 }
0x2090   : > { %v6240_v33 = vmul.f32 %v6239_v32, %v6239_v32 }
0x2092   : > { %v6241_v34 = vsel %vm1357_vm0, %v6240_v33, 0.0 }
0x2093   : > { %6242 = vadd.xlane.f32.xlu1 %v6241_v34 }
0x2106   : > { %v6243_v37 = vpop.xlane.xlu1 %6242 }
0x2107   : > { %v6244_v39 = vmul.f32 %v6243_v37, %v8580_v3 }
0x2109   : > { %v6245_v40 = vadd.f32 1e-05, %v6244_v39 }
0x210b   : > { %8074 = vrsqrt.f32 %v6245_v40  ;;  %vm6252_vm6 = vweird.f32 %v6245_v40 }
0x2111   : > { %v8075_v45 = vpop.eup %8074 }
0x2112   : > { %v6247_v41 = vmul.f32 %v8075_v45, %v6245_v40  ;;  %vm6253_vm7 = vweird.f32 %v8075_v45 }
0x2113   : > { %vm6254_vm8 = vmor %vm6252_vm6, %vm6253_vm7 }
0x2114   : > { %v6248_v38 = vmul.f32 %v8075_v45, %v6247_v41 }
0x2116   : > { %v6249_v42 = vmul.f32 0.5, %v6248_v38 }
0x2118   : > { %v6250_v43 = vsub.f32 1.5, %v6249_v42 }
0x211a   : > { %v6251_v44 = vmul.f32 %v8075_v45, %v6250_v43 }
0x211c   : > { %v6255_v46 = vsel %vm6254_vm8, %v8075_v45, %v6251_v44 }
0x211d   : > { %v6256_v48 = vmul.f32 %v6255_v46, %v6239_v32 }
0x211f   : > { %v6260_v3 = vmul.f32 %v7955_v29, %v6256_v48 }
0x2121   : > { %v6264_v49 = vadd.f32 %v7956_v47, %v6260_v3 }
0x2123   : > { %v6265_v51 = vpack.c.bf16 %v6264_v49, %v6264_v49 }
0x2125   : > { %7583 = vmatmul.msk.bf16.vlgmr.msra.gmra.mxu0 %vm1357_vm0, %v6265_v51 }
0x2126   : > { %8105 = shalt.err (!%p8102_p3)
}
0x2127   : > { %s8215_s1 = smov 128   ;;  %s8216_s3 = smov 8   ;;  %v7957_v52 = vld [vmem:[%s8410_s4] ss:$0 sm:$0xff] }
0x2128   : > { %7763 = dma.vmem_to_hbm [thread:$0]  (%p8460_p5), %s6344_s7, 512, %s6346_s6, %s6317_s8, %s8215_s1, %s8215_s1, %s8216_s3  }
0x2129   : > { %s7586_s5 = sshll.u32 %s8443_s0, 3  ;;  %s6514_s12 = sshll.u32 %s9162_s26, 3 }
0x212a   : > { %s6327_s13 = scalar_lea.hbm %s8415_s17, %s7586_s5  ;;  %s1212_s2 = scalar_lea.vmem [#allocation2], %s6514_s12 }
0x212b   : > { %s6329_s11 = sshll.u32 %s1212_s2, 4  ;;  %s6331_s10 = sshll.u32 %s6327_s13, 4  ;;  %s6330_s11 = int_to_ptr.vmem [resolvable:$true] %s6329_s11  ;;  %s6332_s10 = int_to_ptr.hbm [resolvable:$true] %s6331_s10 }
0x212c   : > { %s6312_s9 = scalar_lea.sflag [#allocation3], %s9162_s26  ;;  %s8120_s14 = sshra.s32 %s6332_s10, 4  ;;  %s8121_s14 = int_to_ptr.hbm [resolvable:$true] %s8120_s14 }
0x212d   : > { %s8122_s16 = scalar_lea.hbm %s8121_s14, 8  ;;  %s8126_s8 = scalar_lea.hbm %s8415_s17, 16 }
0x212e   : > { %p8123_p4 = scmp.ne.s32.totalorder %s8121_s14, %s8122_s16  ;;  %p8127_p9 = scmp.lt.s32.totalorder %s8121_s14, %s8415_s17 }
0x212f   : > { %p8128_p10 = scmp.lt.s32.totalorder %s8126_s8, %s8122_s16 }
0x2130   : > { %p8124_p7 = pnand %p8123_p4, %p8460_p5 }
0x2131   : > { %p8129_p11 = por %p8128_p10, %p8127_p9 }
0x2132   : > { %p8125_p8 = pneg %p8124_p7 }
0x2134   : > { %p8130_p12 = pnand %p8129_p11, %p8125_p8 }
0x21a2   : > { %v6298_v53 = vpop.f32.mrf.mxu0 }
0x21a3   : > { %v6299_v50 = vadd.f32 %v7957_v52, %v6298_v53 }
0x21a5   : > { %6302 = vst [vmem:[%s1212_s2] sm:$0xff] %v6299_v50 }
0x21a6   : > { %8133 = shalt.err (!%p8130_p12)
}
0x21a7   : > { %7762 = dma.vmem_to_hbm [thread:$0]  (%p8460_p5), %s6330_s11, 128, %s6332_s10, %s6312_s9  }
0x21aa   : > { %v6300_v55 = vpop.f32.mrf.mxu0 }
0x21ab PF: > { %p7773_p13 = scmp.ge.s32.totalorder %s8172_s28, 2  ;;  %s6360_s12 = sand.u32 1, %s8160_s22  }
0x21ac   : > { %s6361_s0 = scalar_lea.sflag [#allocation3], %s6360_s12 }
0x21ad   : > { %p7767_p0 = pnand %p7773_p13, %p8464_p6 }
0x21af   : > { %p7768_p1 = pneg %p7767_p0 }
0x21b1   : > { %8151 = dma.done.wait (%p7768_p1), %s6361_s0, 128  }
0x21b2   : > { %8153 = vsyncadd (%p7768_p1), %s6361_s0, 4294967168  ;;  %s6371_s14 = scalar_lea.sflag [#allocation5], %s6360_s12 }
0x21b3   : > { %8155 = dma.done.wait (%p7768_p1), %s6371_s14, 512  }
0x21b4   : > { %8157 = vsyncadd (%p7768_p1), %s6371_s14, 4294966784  ;;  %s9392_s28 = sld [smem:[#allocation46_spill]]  ;;  %s9395_s22 = smov %s8164_s23 }
0x21b5   : > { %s9393_s15 = sld [smem:[#allocation45_spill]] }
0x21b6   : > { %s9394_s26 = sld [smem:[#allocation47_spill]] }
0x21ba   : > { %p93_p5 = scmp.ge.s32.totalorder %s9392_s28, 4  }
0x21bb   : > { %s9396_s23 = smov %s9393_s15 }
0x21bc   :  { %95 = sbr.rel (!%p93_p5) target bundleno = 98 (0x62), region = 304 }
0x21c1   :  { %6377 = vsyncpa [#allocation3], 1 }
0x21c2   :  { %6379 = vsyncpa [#allocation3 + $0x1], 1 }
0x21c3   :  { %6380 = vsyncpa [#allocation5], 1 }
0x21c4   :  { %6382 = vsyncpa [#allocation5 + $0x1], 1 }

</bundles_post_ra>
